<compile_context>
chip_gen: v6e
topology: v6e:2x2x1
jax: 0.10.0
libtpu: 0.0.40
codegen_flags: <defaults>
</compile_context>

<pallas_src>
import jax
import jax.numpy as jnp
from jax.experimental import pallas as pl
from jax.experimental.pallas import tpu as pltpu

# Shapes consistent with the module's constructor signature VAE(image_size, h_dim, z_dim)
IMAGE_SIZE = 256
H_DIM = 128
Z_DIM = 32
BATCH = 256          # total rows processed
PACK = 128           # lane-dense packed output width: mu(32) | log_var(32) | z(32) | pad(32)

# Fused-bias layout (each segment starts on a 128-lane boundary).
BIAS_WIDTH = 640
B1_OFF = 0           # fc1 bias   [H_DIM]
B23_OFF = 128        # fc2|fc3    [2*Z_DIM]
B4_OFF = 256         # fc4 bias   [H_DIM]
B5_OFF = 384         # fc5 bias   [IMAGE_SIZE]


def _device_kind():
    try:
        return jax.devices()[0].device_kind.lower()
    except Exception:
        return ""


def _pick_batch_tile(batch):
    """One grid step on single-TC chips; two 'parallel' steps on 2-TC devices."""
    kind = _device_kind()
    two_tc = ("v7" in kind) or ("v4" in kind) or ("v5p" in kind)
    if two_tc and batch % 2 == 0 and (batch // 2) % 8 == 0:
        return batch // 2
    return batch


def _pick_xrec_dtype():
    """bf16 epilogue output on bf16-capable VPU/EUP generations (v6e/v7x)."""
    kind = _device_kind()
    if ("v6" in kind) or ("v7" in kind):
        return jnp.bfloat16
    return jnp.float32


def vae_forward_kernel(
    x_ref, u_ref,
    w1_ref,                   # fc1     : [IMAGE_SIZE, H_DIM]    bf16
    w23_ref,                  # fc2|fc3 : [H_DIM, 2*Z_DIM]       bf16
    w4_ref,                   # fc4     : [Z_DIM, H_DIM]         bf16
    w5_ref,                   # fc5     : [H_DIM, IMAGE_SIZE]    bf16
    bias_ref,                 # fused   : [1, BIAS_WIDTH]        f32
    packed_ref, xrec_ref,
):
    # 128-lane-aligned static slices of the fused bias array.
    b1 = bias_ref[:, B1_OFF:B1_OFF + H_DIM]
    b23 = bias_ref[:, B23_OFF:B23_OFF + 2 * Z_DIM]
    b4 = bias_ref[:, B4_OFF:B4_OFF + H_DIM]
    b5 = bias_ref[:, B5_OFF:B5_OFF + IMAGE_SIZE]

    # ---------------- encode ----------------
    x_bf = x_ref[...].astype(jnp.bfloat16)
    h = jnp.dot(x_bf, w1_ref[...], preferred_element_type=jnp.float32) + b1
    h = jnp.maximum(h, 0.0)                                        # relu (f32)

    # fused mu | log_var projection
    head = jnp.dot(h.astype(jnp.bfloat16), w23_ref[...],
                   preferred_element_type=jnp.float32) + b23
    mu = head[:, :Z_DIM]

    # ---------------- reparameterize (gumbel-softmax) ----------------
    # softmax(log_softmax(mu) + g) == softmax(mu + g): per-row log-sum-exp
    # constants cancel, so the explicit log_softmax pass is dropped.
    u = u_ref[...]
    gumbel = -jnp.log(-jnp.log(u + 1e-20) + 1e-20)
    y = mu + gumbel
    ym = jnp.max(y, axis=-1, keepdims=True)
    ey = jnp.exp(y - ym)
    z = ey / jnp.sum(ey, axis=-1, keepdims=True)    # exact recip: rows sum to 1

    # ---------------- decode ----------------
    h2 = jnp.dot(z.astype(jnp.bfloat16), w4_ref[...],
                 preferred_element_type=jnp.float32) + b4
    h2 = jnp.maximum(h2, 0.0)                                      # relu (f32)
    logits_rec = jnp.dot(h2.astype(jnp.bfloat16), w5_ref[...],
                         preferred_element_type=jnp.float32) + b5

    # sigmoid(x) = 0.5*tanh(0.5*x) + 0.5 : one EUP op + one FMA, output in [0,1].
    xrec_ref[...] = (0.5 * jnp.tanh(0.5 * logits_rec) + 0.5).astype(xrec_ref.dtype)

    # ---------------- lane-dense packed slab: mu | log_var | z | pad ----------
    pad = jnp.zeros((head.shape[0], PACK - 3 * Z_DIM), jnp.float32)
    packed_ref[...] = jnp.concatenate([head, z, pad], axis=-1)


def vae_forward(x, uniform_noise, params, *, batch_tile=None, xrec_dtype=None):
    """x: [B, IMAGE_SIZE] f32, uniform_noise: [B, Z_DIM] f32 in (0,1)."""
    B = x.shape[0]
    if batch_tile is None:
        batch_tile = _pick_batch_tile(B)
    if xrec_dtype is None:
        xrec_dtype = _pick_xrec_dtype()
    assert B % batch_tile == 0 and batch_tile % 8 == 0
    tb = batch_tile
    grid = (B // tb,)

    # bf16 weights for the MXU (halves weight DMA bytes); fused fc2|fc3.
    # (In a real deployment this packing/casting would be done once at init.)
    w1 = params["w1"].astype(jnp.bfloat16)
    w23 = jnp.concatenate([params["w2"], params["w3"]], axis=-1).astype(jnp.bfloat16)
    w4 = params["w4"].astype(jnp.bfloat16)
    w5 = params["w5"].astype(jnp.bfloat16)

    # Fuse all biases into one resident, 128-lane-aligned f32 array.
    bias = jnp.zeros((1, BIAS_WIDTH), jnp.float32)
    bias = bias.at[:, B1_OFF:B1_OFF + H_DIM].set(params["b1"])
    bias = bias.at[:, B23_OFF:B23_OFF + Z_DIM].set(params["b2"])
    bias = bias.at[:, B23_OFF + Z_DIM:B23_OFF + 2 * Z_DIM].set(params["b3"])
    bias = bias.at[:, B4_OFF:B4_OFF + H_DIM].set(params["b4"])
    bias = bias.at[:, B5_OFF:B5_OFF + IMAGE_SIZE].set(params["b5"])

    def row_spec(n):
        return pl.BlockSpec((tb, n), lambda i: (i, 0))

    def resident(r, c):
        # Constant block index -> stays resident in VMEM across grid steps.
        return pl.BlockSpec((r, c), lambda i: (0, 0))

    in_specs = [
        row_spec(IMAGE_SIZE),                # x
        row_spec(Z_DIM),                     # uniform noise
        resident(IMAGE_SIZE, H_DIM),         # w1
        resident(H_DIM, 2 * Z_DIM),          # w23
        resident(Z_DIM, H_DIM),              # w4
        resident(H_DIM, IMAGE_SIZE),         # w5
        resident(1, BIAS_WIDTH),             # fused biases
    ]
    out_specs = (row_spec(PACK), row_spec(IMAGE_SIZE))
    out_shape = (
        jax.ShapeDtypeStruct((B, PACK), jnp.float32),        # packed: mu | log_var | z | pad
        jax.ShapeDtypeStruct((B, IMAGE_SIZE), xrec_dtype),   # x_rec
    )

    flops = 2 * B * (IMAGE_SIZE * H_DIM + H_DIM * 2 * Z_DIM
                     + Z_DIM * H_DIM + H_DIM * IMAGE_SIZE)
    transcendentals = B * (3 * Z_DIM + IMAGE_SIZE)
    bytes_accessed = (
        x.size * 4 + uniform_noise.size * 4
        + (w1.size + w23.size + w4.size + w5.size) * 2
        + bias.size * 4
        + B * PACK * 4
        + B * IMAGE_SIZE * jnp.dtype(xrec_dtype).itemsize
    )

    packed, x_rec = pl.pallas_call(
        vae_forward_kernel,
        grid=grid,
        in_specs=in_specs,
        out_specs=out_specs,
        out_shape=out_shape,
        compiler_params=pltpu.CompilerParams(
            dimension_semantics=("parallel",)),
        cost_estimate=pl.CostEstimate(
            flops=flops,
            transcendentals=transcendentals,
            bytes_accessed=bytes_accessed),
    )(x, uniform_noise, w1, w23, w4, w5, bias)

    mu = packed[:, 0:Z_DIM]
    log_var = packed[:, Z_DIM:2 * Z_DIM]
    z = packed[:, 2 * Z_DIM:3 * Z_DIM]
    return {"mean": mu, "log_var": log_var, "x_rec": x_rec, "sample": z}


def vae_forward_ref(x, u, params):
    """Pure-JAX f32 reference (mirrors the PyTorch module)."""
    h = jax.nn.relu(x @ params["w1"] + params["b1"])
    mu = h @ params["w2"] + params["b2"]
    log_var = h @ params["w3"] + params["b3"]
    logits = jax.nn.log_softmax(mu, axis=-1)
    gumbel = -jnp.log(-jnp.log(u + 1e-20) + 1e-20)
    z = jax.nn.softmax(logits + gumbel, axis=-1)
    h2 = jax.nn.relu(z @ params["w4"] + params["b4"])
    x_rec = jax.nn.sigmoid(h2 @ params["w5"] + params["b5"])
    return {"mean": mu, "log_var": log_var, "x_rec": x_rec, "sample": z}


def init_params(key):
    """Deterministic synthetic parameters. Weights stored as [in, out], f32."""
    ks = jax.random.split(key, 10)

    def lin(kw, kb, fan_in, fan_out):
        bound = 1.0 / jnp.sqrt(fan_in)
        w = jax.random.uniform(kw, (fan_in, fan_out), jnp.float32, -bound, bound)
        b = jax.random.uniform(kb, (1, fan_out), jnp.float32, -bound, bound)
        return w, b

    p = {}
    p["w1"], p["b1"] = lin(ks[0], ks[1], IMAGE_SIZE, H_DIM)
    p["w2"], p["b2"] = lin(ks[2], ks[3], H_DIM, Z_DIM)
    p["w3"], p["b3"] = lin(ks[4], ks[5], H_DIM, Z_DIM)
    p["w4"], p["b4"] = lin(ks[6], ks[7], Z_DIM, H_DIM)
    p["w5"], p["b5"] = lin(ks[8], ks[9], H_DIM, IMAGE_SIZE)
    return p


if __name__ == "__main__":
    key = jax.random.PRNGKey(0)
    k_param, k_x, k_u = jax.random.split(key, 3)

    params = init_params(k_param)
    x = jax.random.uniform(k_x, (BATCH, IMAGE_SIZE), jnp.float32)   # "image" in [0,1)
    u = jax.random.uniform(k_u, (BATCH, Z_DIM), jnp.float32)        # torch.rand equivalent

    res = jax.jit(vae_forward)(x, u, params)
    jax.block_until_ready(res)

    # ---- sanity checks on semantics ----
    assert res["mean"].shape == (BATCH, Z_DIM)
    assert res["log_var"].shape == (BATCH, Z_DIM)
    assert res["x_rec"].shape == (BATCH, IMAGE_SIZE)
    assert res["sample"].shape == (BATCH, Z_DIM)
    # gumbel-softmax rows sum to 1 (exact reciprocal in-kernel)
    assert jnp.allclose(jnp.sum(res["sample"], axis=-1), 1.0, atol=1e-4)
    # sigmoid output within [0, 1] (tanh identity guarantees the bound)
    x_rec_f32 = jnp.asarray(res["x_rec"], jnp.float32)
    assert bool(jnp.all(x_rec_f32 >= 0.0)) and bool(jnp.all(x_rec_f32 <= 1.0))
    assert all(bool(jnp.all(jnp.isfinite(jnp.asarray(v, jnp.float32))))
               for v in res.values())

    # ---- compare against the pure-JAX f32 reference (bf16 MXU -> loose tol) ----
    ref = vae_forward_ref(x, u, params)
    for name in ("mean", "log_var", "sample", "x_rec"):
        got = jnp.asarray(res[name], jnp.float32)
        assert jnp.allclose(got, ref[name], atol=5e-2, rtol=5e-2), name

    print("KERNEL_OK")
</pallas_src>

<mosaic_0001>
module attributes {stable_mosaic.version = 11 : i64} {
  func.func @vae_forward_kernel(%arg0: i32, %arg1: memref<256x256xf32, #tpu.memory_space<vmem>>, %arg2: memref<256x32xf32, #tpu.memory_space<vmem>>, %arg3: memref<256x128xbf16, #tpu.memory_space<vmem>>, %arg4: memref<128x64xbf16, #tpu.memory_space<vmem>>, %arg5: memref<32x128xbf16, #tpu.memory_space<vmem>>, %arg6: memref<128x256xbf16, #tpu.memory_space<vmem>>, %arg7: memref<1x640xf32, #tpu.memory_space<vmem>>, %arg8: memref<256x128xf32, #tpu.memory_space<vmem>>, %arg9: memref<256x256xf32, #tpu.memory_space<vmem>>) attributes {dimension_semantics = [#tpu.dimension_semantics<parallel>], iteration_bounds = array<i64: 1>, scalar_prefetch = 0 : i64, scratch_operands = 0 : i64, tpu.core_type = #tpu.core_type<tc>, window_params = [{transform_indices = @transform_0, window_bounds = array<i64: 256, 256>}, {transform_indices = @transform_1, window_bounds = array<i64: 256, 32>}, {pipeline_mode = #tpu.pipeline_mode<synchronous>, transform_indices = @transform_2, window_bounds = array<i64: 256, 128>}, {pipeline_mode = #tpu.pipeline_mode<synchronous>, transform_indices = @transform_3, window_bounds = array<i64: 128, 64>}, {pipeline_mode = #tpu.pipeline_mode<synchronous>, transform_indices = @transform_4, window_bounds = array<i64: 32, 128>}, {pipeline_mode = #tpu.pipeline_mode<synchronous>, transform_indices = @transform_5, window_bounds = array<i64: 128, 256>}, {pipeline_mode = #tpu.pipeline_mode<synchronous>, transform_indices = @transform_6, window_bounds = array<i64: 1, 640>}, {transform_indices = @transform_7, window_bounds = array<i64: 256, 128>}, {transform_indices = @transform_8, window_bounds = array<i64: 256, 256>}]} {
    %c0 = arith.constant 0 : index
    %c0_0 = arith.constant 0 : index
    %0 = vector.load %arg7[%c0, %c0_0] : memref<1x640xf32, #tpu.memory_space<vmem>>, vector<1x128xf32>
    %c0_1 = arith.constant 0 : index
    %c128 = arith.constant 128 : index
    %1 = vector.load %arg7[%c0_1, %c128] : memref<1x640xf32, #tpu.memory_space<vmem>>, vector<1x64xf32>
    %c0_2 = arith.constant 0 : index
    %c256 = arith.constant 256 : index
    %2 = vector.load %arg7[%c0_2, %c256] : memref<1x640xf32, #tpu.memory_space<vmem>>, vector<1x128xf32>
    %c0_3 = arith.constant 0 : index
    %c384 = arith.constant 384 : index
    %3 = vector.load %arg7[%c0_3, %c384] : memref<1x640xf32, #tpu.memory_space<vmem>>, vector<1x256xf32>
    %c0_4 = arith.constant 0 : index
    %c0_5 = arith.constant 0 : index
    %4 = vector.load %arg1[%c0_4, %c0_5] : memref<256x256xf32, #tpu.memory_space<vmem>>, vector<256x256xf32>
    %5 = arith.truncf %4 : vector<256x256xf32> to vector<256x256xbf16>
    %c0_6 = arith.constant 0 : index
    %c0_7 = arith.constant 0 : index
    %6 = vector.load %arg3[%c0_6, %c0_7] : memref<256x128xbf16, #tpu.memory_space<vmem>>, vector<256x128xbf16>
    %cst = arith.constant dense<0.000000e+00> : vector<256x128xf32>
    %7 = tpu.matmul %5, %6, %cst {dimension_numbers = #tpu.dot_dimension_numbers<[1], [0], [0], [1], [0, 0, 1, 1], [], []>} : vector<256x256xbf16>, vector<256x128xbf16>, vector<256x128xf32> -> vector<256x128xf32>
    %8 = vector.broadcast %0 : vector<1x128xf32> to vector<256x128xf32>
    %9 = arith.addf %7, %8 : vector<256x128xf32>
    %cst_8 = arith.constant 0.000000e+00 : f32
    %10 = vector.broadcast %cst_8 : f32 to vector<256x128xf32>
    %11 = arith.maximumf %9, %10 : vector<256x128xf32>
    %12 = arith.truncf %11 : vector<256x128xf32> to vector<256x128xbf16>
    %c0_9 = arith.constant 0 : index
    %c0_10 = arith.constant 0 : index
    %13 = vector.load %arg4[%c0_9, %c0_10] : memref<128x64xbf16, #tpu.memory_space<vmem>>, vector<128x64xbf16>
    %cst_11 = arith.constant dense<0.000000e+00> : vector<256x64xf32>
    %14 = tpu.matmul %12, %13, %cst_11 {dimension_numbers = #tpu.dot_dimension_numbers<[1], [0], [0], [1], [0, 0, 1, 1], [], []>} : vector<256x128xbf16>, vector<128x64xbf16>, vector<256x64xf32> -> vector<256x64xf32>
    %15 = vector.broadcast %1 : vector<1x64xf32> to vector<256x64xf32>
    %16 = arith.addf %14, %15 : vector<256x64xf32>
    %17 = vector.extract_strided_slice %16 {offsets = [0, 0], sizes = [256, 32], strides = [1, 1]} : vector<256x64xf32> to vector<256x32xf32>
    %c0_12 = arith.constant 0 : index
    %c0_13 = arith.constant 0 : index
    %18 = vector.load %arg2[%c0_12, %c0_13] : memref<256x32xf32, #tpu.memory_space<vmem>>, vector<256x32xf32>
    %cst_14 = arith.constant 9.99999968E-21 : f32
    %19 = vector.broadcast %cst_14 : f32 to vector<256x32xf32>
    %20 = arith.addf %18, %19 : vector<256x32xf32>
    %21 = math.log %20 : vector<256x32xf32>
    %cst_15 = arith.constant 0.000000e+00 : f32
    %22 = vector.broadcast %cst_15 : f32 to vector<256x32xf32>
    %23 = arith.subf %22, %21 : vector<256x32xf32>
    %cst_16 = arith.constant 9.99999968E-21 : f32
    %24 = vector.broadcast %cst_16 : f32 to vector<256x32xf32>
    %25 = arith.addf %23, %24 : vector<256x32xf32>
    %26 = math.log %25 : vector<256x32xf32>
    %cst_17 = arith.constant 0.000000e+00 : f32
    %27 = vector.broadcast %cst_17 : f32 to vector<256x32xf32>
    %28 = arith.subf %27, %26 : vector<256x32xf32>
    %29 = arith.addf %17, %28 : vector<256x32xf32>
    %cst_18 = arith.constant dense<0xFF800000> : vector<256xf32>
    %30 = vector.multi_reduction <maximumf>, %29, %cst_18 [1] : vector<256x32xf32> to vector<256xf32>
    %31 = vector.shape_cast %30 : vector<256xf32> to vector<256x1xf32>
    %32 = vector.broadcast %31 : vector<256x1xf32> to vector<256x32xf32>
    %33 = arith.subf %29, %32 : vector<256x32xf32>
    %34 = math.exp %33 : vector<256x32xf32>
    %cst_19 = arith.constant dense<0.000000e+00> : vector<256xf32>
    %35 = vector.multi_reduction <add>, %34, %cst_19 [1] : vector<256x32xf32> to vector<256xf32>
    %36 = vector.shape_cast %35 : vector<256xf32> to vector<256x1xf32>
    %37 = vector.broadcast %36 : vector<256x1xf32> to vector<256x32xf32>
    %38 = arith.divf %34, %37 : vector<256x32xf32>
    %39 = arith.truncf %38 : vector<256x32xf32> to vector<256x32xbf16>
    %c0_20 = arith.constant 0 : index
    %c0_21 = arith.constant 0 : index
    %40 = vector.load %arg5[%c0_20, %c0_21] : memref<32x128xbf16, #tpu.memory_space<vmem>>, vector<32x128xbf16>
    %cst_22 = arith.constant dense<0.000000e+00> : vector<256x128xf32>
    %41 = tpu.matmul %39, %40, %cst_22 {dimension_numbers = #tpu.dot_dimension_numbers<[1], [0], [0], [1], [0, 0, 1, 1], [], []>} : vector<256x32xbf16>, vector<32x128xbf16>, vector<256x128xf32> -> vector<256x128xf32>
    %42 = vector.broadcast %2 : vector<1x128xf32> to vector<256x128xf32>
    %43 = arith.addf %41, %42 : vector<256x128xf32>
    %cst_23 = arith.constant 0.000000e+00 : f32
    %44 = vector.broadcast %cst_23 : f32 to vector<256x128xf32>
    %45 = arith.maximumf %43, %44 : vector<256x128xf32>
    %46 = arith.truncf %45 : vector<256x128xf32> to vector<256x128xbf16>
    %c0_24 = arith.constant 0 : index
    %c0_25 = arith.constant 0 : index
    %47 = vector.load %arg6[%c0_24, %c0_25] : memref<128x256xbf16, #tpu.memory_space<vmem>>, vector<128x256xbf16>
    %cst_26 = arith.constant dense<0.000000e+00> : vector<256x256xf32>
    %48 = tpu.matmul %46, %47, %cst_26 {dimension_numbers = #tpu.dot_dimension_numbers<[1], [0], [0], [1], [0, 0, 1, 1], [], []>} : vector<256x128xbf16>, vector<128x256xbf16>, vector<256x256xf32> -> vector<256x256xf32>
    %49 = vector.broadcast %3 : vector<1x256xf32> to vector<256x256xf32>
    %50 = arith.addf %48, %49 : vector<256x256xf32>
    %cst_27 = arith.constant 5.000000e-01 : f32
    %51 = vector.broadcast %cst_27 : f32 to vector<256x256xf32>
    %52 = arith.mulf %51, %50 : vector<256x256xf32>
    %53 = math.tanh %52 : vector<256x256xf32>
    %cst_28 = arith.constant 5.000000e-01 : f32
    %54 = vector.broadcast %cst_28 : f32 to vector<256x256xf32>
    %55 = arith.mulf %54, %53 : vector<256x256xf32>
    %cst_29 = arith.constant 5.000000e-01 : f32
    %56 = vector.broadcast %cst_29 : f32 to vector<256x256xf32>
    %57 = arith.addf %55, %56 : vector<256x256xf32>
    %c0_30 = arith.constant 0 : index
    %c0_31 = arith.constant 0 : index
    %58 = vector.load %arg9[%c0_30, %c0_31] : memref<256x256xf32, #tpu.memory_space<vmem>>, vector<256x256xf32>
    tpu.vector_store %arg9[%c0_30, %c0_31], %57 {strides = array<i32>} : memref<256x256xf32, #tpu.memory_space<vmem>>, vector<256x256xf32>,
    %cst_32 = arith.constant 0.000000e+00 : f32
    %59 = vector.broadcast %cst_32 : f32 to vector<256x32xf32>
    %60 = tpu.concatenate %16, %38, %59 in 1 : vector<256x64xf32>, vector<256x32xf32>, vector<256x32xf32> -> vector<256x128xf32>
    %c0_33 = arith.constant 0 : index
    %c0_34 = arith.constant 0 : index
    %61 = vector.load %arg8[%c0_33, %c0_34] : memref<256x128xf32, #tpu.memory_space<vmem>>, vector<256x128xf32>
    tpu.vector_store %arg8[%c0_33, %c0_34], %60 {strides = array<i32>} : memref<256x128xf32, #tpu.memory_space<vmem>>, vector<256x128xf32>,
    return
  }
  func.func @transform_0(%arg0: i32) -> (i32, i32) {
    %c0_i32 = arith.constant 0 : i32
    %c0_i32_0 = arith.constant 0 : i32
    return %arg0, %c0_i32 : i32, i32
  }
  func.func @transform_1(%arg0: i32) -> (i32, i32) {
    %c0_i32 = arith.constant 0 : i32
    %c0_i32_0 = arith.constant 0 : i32
    return %arg0, %c0_i32 : i32, i32
  }
  func.func @transform_2(%arg0: i32) -> (i32, i32) {
    %c0_i32 = arith.constant 0 : i32
    %c0_i32_0 = arith.constant 0 : i32
    %c0_i32_1 = arith.constant 0 : i32
    return %c0_i32, %c0_i32_0 : i32, i32
  }
  func.func @transform_3(%arg0: i32) -> (i32, i32) {
    %c0_i32 = arith.constant 0 : i32
    %c0_i32_0 = arith.constant 0 : i32
    %c0_i32_1 = arith.constant 0 : i32
    return %c0_i32, %c0_i32_0 : i32, i32
  }
  func.func @transform_4(%arg0: i32) -> (i32, i32) {
    %c0_i32 = arith.constant 0 : i32
    %c0_i32_0 = arith.constant 0 : i32
    %c0_i32_1 = arith.constant 0 : i32
    return %c0_i32, %c0_i32_0 : i32, i32
  }
  func.func @transform_5(%arg0: i32) -> (i32, i32) {
    %c0_i32 = arith.constant 0 : i32
    %c0_i32_0 = arith.constant 0 : i32
    %c0_i32_1 = arith.constant 0 : i32
    return %c0_i32, %c0_i32_0 : i32, i32
  }
  func.func @transform_6(%arg0: i32) -> (i32, i32) {
    %c0_i32 = arith.constant 0 : i32
    %c0_i32_0 = arith.constant 0 : i32
    %c0_i32_1 = arith.constant 0 : i32
    return %c0_i32, %c0_i32_0 : i32, i32
  }
  func.func @transform_7(%arg0: i32) -> (i32, i32) {
    %c0_i32 = arith.constant 0 : i32
    %c0_i32_0 = arith.constant 0 : i32
    return %arg0, %c0_i32 : i32, i32
  }
  func.func @transform_8(%arg0: i32) -> (i32, i32) {
    %c0_i32 = arith.constant 0 : i32
    %c0_i32_0 = arith.constant 0 : i32
    return %arg0, %c0_i32 : i32, i32
  }
}

</mosaic_0001>

<bundles_post_ra>
// kernel: vae_forward.1
= control target key start
LH: loop header
LB: loop body
LE: loop exit
PB: predicated region body
PF: predicated region fallthrough
CT: control target
= control target key end

     0   :  { %s4779_s0 = inlined_call_operand.vmem [shape: f32[256,256], index: 0, kind: input, shape index: {}]   ;;  %s4780_s1 = inlined_call_operand.vmem [shape: f32[256,32], index: 1, kind: input, shape index: {}]   ;;  %s4781_s2 = inlined_call_operand.vmem [shape: bf16[256,128], index: 2, kind: input, shape index: {}]   ;;  %s4782_s3 = inlined_call_operand.vmem [shape: bf16[128,64], index: 3, kind: input, shape index: {}]   ;;  %s4783_s4 = inlined_call_operand.vmem [shape: bf16[32,128], index: 4, kind: input, shape index: {}]   ;;  %s4784_s5 = inlined_call_operand.vmem [shape: bf16[128,256], index: 5, kind: input, shape index: {}]   ;;  %s4785_s6 = inlined_call_operand.vmem [shape: f32[1,640], index: 6, kind: input, shape index: {}]   ;;  %s4786_s7 = inlined_call_operand.vmem [shape: f32[256,128], index: 7, kind: output, shape index: {0}]   ;;  %s4787_s8 = inlined_call_operand.hbm [shape: f32[256,256], index: 8, kind: output, shape index: {1}]  }
   0x1   :  { %v2858_v0 = vld [vmem:[%s4781_s2 + $0x78] sm:$0xff]   ;;  %v2860_v2 = vld [vmem:[%s4781_s2 + $0x70] sm:$0xff]   ;;  %v2862_v4 = vld [vmem:[%s4781_s2 + $0x68] sm:$0xff]  }
   0x2   :  { %v2859_v1 = vld [vmem:[%s4781_s2 + $0x38] sm:$0xff]   ;;  %2599 = vmatprep.subr.bf16.mxu0 %v2858_v0  ;;  %2837 = vmatprep.subr.bf16.mxu1 %v2858_v0  ;;  %v2861_v3 = vld [vmem:[%s4781_s2 + $0x30] sm:$0xff]   ;;  %v2863_v5 = vld [vmem:[%s4781_s2 + $0x28] sm:$0xff]  }
   0x3   :  { %2600 = vmatpush3.bf16.msra.mxu0 %v2859_v1  ;;  %2845 = vmatpush3.bf16.msra.mxu1 %v2859_v1  ;;  %v2864_v6 = vld [vmem:[%s4781_s2 + $0x60] sm:$0xff]   ;;  %v2866_v8 = vld [vmem:[%s4781_s2 + $0x58] sm:$0xff]   ;;  %v2868_v10 = vld [vmem:[%s4781_s2 + $0x50] sm:$0xff]  }
   0x4   :  { %2601 = vmatprep.subr.bf16.mxu0 %v2860_v2  ;;  %2838 = vmatprep.subr.bf16.mxu1 %v2860_v2  ;;  %v2865_v7 = vld [vmem:[%s4781_s2 + $0x20] sm:$0xff]   ;;  %v2867_v9 = vld [vmem:[%s4781_s2 + $0x18] sm:$0xff]   ;;  %v35_v11 = vld [vmem:[%s4779_s0 + $0x8] sm:$0xff] }
   0x5   :  { %v37_v12 = vld [vmem:[%s4779_s0 + $0x18] sm:$0xff]  ;;  %v2869_v14 = vld [vmem:[%s4781_s2 + $0x10] sm:$0xff]   ;;  %v2870_v15 = vld [vmem:[%s4781_s2 + $0x48] sm:$0xff]  }
   0x6   :  { %v99_v13 = vpack.c.bf16 %v37_v12, %v35_v11  ;;  %v2871_v16 = vld [vmem:[%s4781_s2 + $0x8] sm:$0xff]   ;;  %v2872_v17 = vld [vmem:[%s4781_s2 + $0x40] sm:$0xff]   ;;  %v69_v19 = vld [vmem:[%s4779_s0 + $0x118] sm:$0xff] }
   0x7   :  { %2602 = vmatpush3.bf16.msra.mxu0 %v2861_v3  ;;  %2846 = vmatpush3.bf16.msra.mxu1 %v2861_v3  ;;  %v67_v18 = vld [vmem:[%s4779_s0 + $0x108] sm:$0xff]  ;;  %v2873_v20 = vld [vmem:[%s4781_s2] sm:$0xff]   ;;  %v36_v23 = vld [vmem:[%s4779_s0 + $0x10] sm:$0xff] }
   0x8   :  { %2603 = vmatprep.subr.bf16.mxu0 %v2862_v4  ;;  %2839 = vmatprep.subr.bf16.mxu1 %v2862_v4  ;;  %v115_v21 = vpack.c.bf16 %v69_v19, %v67_v18  ;;  %v34_v22 = vld [vmem:[%s4779_s0] sm:$0xff]  ;;  %v39_v24 = vld [vmem:[%s4779_s0 + $0x28] sm:$0xff]  ;;  %v41_v25 = vld [vmem:[%s4779_s0 + $0x38] sm:$0xff] }
   0x9   :  { %296 = vmatprep.mubr.bf16.mxu0 %v99_v13  ;;  %v66_v26 = vld [vmem:[%s4779_s0 + $0x100] sm:$0xff]  ;;  %v68_v27 = vld [vmem:[%s4779_s0 + $0x110] sm:$0xff]  ;;  %v71_v28 = vld [vmem:[%s4779_s0 + $0x128] sm:$0xff]  ;;  %v98_v30 = vpack.c.bf16 %v36_v23, %v34_v22  ;;  %v101_v31 = vpack.c.bf16 %v41_v25, %v39_v24 }
   0xa   :  { %360 = vmatprep.mubr.bf16.mxu1 %v115_v21  ;;  %v73_v29 = vld [vmem:[%s4779_s0 + $0x138] sm:$0xff]  ;;  %v114_v32 = vpack.c.bf16 %v68_v27, %v66_v26  ;;  %v38_v34 = vld [vmem:[%s4779_s0 + $0x20] sm:$0xff]  ;;  %v40_v36 = vld [vmem:[%s4779_s0 + $0x30] sm:$0xff] }
   0xb   :  { %2604 = vmatpush3.bf16.msra.mxu0 %v2863_v5  ;;  %2847 = vmatpush3.bf16.msra.mxu1 %v2863_v5  ;;  %v117_v33 = vpack.c.bf16 %v73_v29, %v71_v28  ;;  %v2874_v35 = vld [vmem:[%s4782_s3 + $0x38] sm:$0xff]   ;;  %v43_v37 = vld [vmem:[%s4779_s0 + $0x48] sm:$0xff]  ;;  %v2875_v39 = vld [vmem:[%s4782_s3 + $0x30] sm:$0xff]   ;;  %v100_v44 = vpack.c.bf16 %v40_v36, %v38_v34 }
   0xc   :  { %2605 = vmatprep.subr.bf16.mxu0 %v2864_v6  ;;  %2840 = vmatprep.subr.bf16.mxu1 %v2864_v6  ;;  %v45_v38 = vld [vmem:[%s4779_s0 + $0x58] sm:$0xff]  ;;  %v70_v40 = vld [vmem:[%s4779_s0 + $0x120] sm:$0xff]  ;;  %v72_v41 = vld [vmem:[%s4779_s0 + $0x130] sm:$0xff] }
   0xd   :  { %v75_v42 = vld [vmem:[%s4779_s0 + $0x148] sm:$0xff]  ;;  %v77_v43 = vld [vmem:[%s4779_s0 + $0x158] sm:$0xff]  ;;  %v103_v46 = vpack.c.bf16 %v45_v38, %v43_v37  ;;  %v116_v47 = vpack.c.bf16 %v72_v41, %v70_v40  ;;  %v42_v49 = vld [vmem:[%s4779_s0 + $0x40] sm:$0xff] }
   0xe   :  { %v2876_v45 = vld [vmem:[%s4782_s3 + $0x28] sm:$0xff]   ;;  %v119_v48 = vpack.c.bf16 %v77_v43, %v75_v42  ;;  %v44_v50 = vld [vmem:[%s4779_s0 + $0x50] sm:$0xff]  ;;  %v49_v52 = vld [vmem:[%s4779_s0 + $0x78] sm:$0xff] }
   0xf   :  { %2606 = vmatpush3.bf16.msra.mxu0 %v2865_v7  ;;  %2848 = vmatpush3.bf16.msra.mxu1 %v2865_v7  ;;  %v47_v51 = vld [vmem:[%s4779_s0 + $0x68] sm:$0xff]  ;;  %v74_v53 = vld [vmem:[%s4779_s0 + $0x140] sm:$0xff]  ;;  %v76_v54 = vld [vmem:[%s4779_s0 + $0x150] sm:$0xff]  ;;  %v102_v59 = vpack.c.bf16 %v44_v50, %v42_v49 }
  0x10   :  { %2607 = vmatprep.subr.bf16.mxu0 %v2866_v8  ;;  %2841 = vmatprep.subr.bf16.mxu1 %v2866_v8  ;;  %v2877_v55 = vld [vmem:[%s4782_s3 + $0x20] sm:$0xff]   ;;  %v79_v56 = vld [vmem:[%s4779_s0 + $0x168] sm:$0xff]  ;;  %v81_v57 = vld [vmem:[%s4779_s0 + $0x178] sm:$0xff]  ;;  %v105_v60 = vpack.c.bf16 %v49_v52, %v47_v51  ;;  %v118_v61 = vpack.c.bf16 %v76_v54, %v74_v53 }
  0x11   :  { %v2878_v58 = vld [vmem:[%s4782_s3 + $0x18] sm:$0xff]   ;;  %v121_v62 = vpack.c.bf16 %v81_v57, %v79_v56  ;;  %v46_v63 = vld [vmem:[%s4779_s0 + $0x60] sm:$0xff]  ;;  %v48_v0 = vld [vmem:[%s4779_s0 + $0x70] sm:$0xff] }
  0x12   :  { %v51_v1 = vld [vmem:[%s4779_s0 + $0x88] sm:$0xff] }
  0x13   :  { %2608 = vmatpush3.bf16.msra.mxu0 %v2867_v9  ;;  %2849 = vmatpush3.bf16.msra.mxu1 %v2867_v9 }
  0x14   :  { %2609 = vmatprep.subr.bf16.mxu0 %v2868_v10  ;;  %2842 = vmatprep.subr.bf16.mxu1 %v2868_v10 }
  0x17   :  { %2610 = vmatpush3.bf16.msra.mxu0 %v2869_v14  ;;  %2850 = vmatpush3.bf16.msra.mxu1 %v2869_v14 }
  0x18   :  { %2611 = vmatprep.subr.bf16.mxu0 %v2870_v15  ;;  %2843 = vmatprep.subr.bf16.mxu1 %v2870_v15 }
  0x1b   :  { %2612 = vmatpush3.bf16.msra.mxu0 %v2871_v16  ;;  %2851 = vmatpush3.bf16.msra.mxu1 %v2871_v16 }
  0x1c   :  { %2613 = vmatprep.subr.bf16.mxu0 %v2872_v17  ;;  %2844 = vmatprep.subr.bf16.mxu1 %v2872_v17 }
  0x1f   :  { %2614 = vmatpush3.bf16.msra.mxu0 %v2873_v20  ;;  %2852 = vmatpush3.bf16.msra.mxu1 %v2873_v20 }
  0x20   :  { %2753 = vmatprep.subr.bf16.mxu1 %v2874_v35 }
  0x22   :  { %297 = vmatmul.mubr.bf16.vlgmr.msra.gmra.mxu0 %v98_v30  ;;  %361 = vmatmul.mubr.bf16.vlgmr.msra.gmra.mxu1 %v114_v32 }
  0x23   :  { %304 = vmatprep.mubr.bf16.mxu0 %v101_v31  ;;  %368 = vmatprep.mubr.bf16.mxu1 %v117_v33 }
  0x24   :  { %2754 = vmatpush3.bf16.msra.mxu1 %v2874_v35 }
  0x25   :  { %2755 = vmatprep.subr.bf16.mxu1 %v2875_v39 }
  0x28   :  { %2756 = vmatpush3.bf16.msra.mxu1 %v2875_v39 }
  0x29   :  { %2757 = vmatprep.subr.bf16.mxu1 %v2876_v45 }
  0x2a   :  { %305 = vmatmul.mubr.bf16.gmra.mxu0 %v100_v44  ;;  %369 = vmatmul.mubr.bf16.gmra.mxu1 %v116_v47 }
  0x2b   :  { %312 = vmatprep.mubr.bf16.mxu0 %v103_v46  ;;  %376 = vmatprep.mubr.bf16.mxu1 %v119_v48 }
  0x2c   :  { %2758 = vmatpush3.bf16.msra.mxu1 %v2876_v45 }
  0x2d   :  { %2759 = vmatprep.subr.bf16.mxu1 %v2877_v55 }
  0x30   :  { %2760 = vmatpush3.bf16.msra.mxu1 %v2877_v55 }
  0x31   :  { %2761 = vmatprep.subr.bf16.mxu1 %v2878_v58 }
  0x32   :  { %313 = vmatmul.mubr.bf16.gmra.mxu0 %v102_v59  ;;  %377 = vmatmul.mubr.bf16.gmra.mxu1 %v118_v61 }
  0x33   :  { %320 = vmatprep.mubr.bf16.mxu0 %v105_v60 }
  0x34   :  { %14 = vsyncpa [#allocation3], 0  ;;  %v53_v2 = vld [vmem:[%s4779_s0 + $0x98] sm:$0xff]  ;;  %384 = vmatprep.mubr.bf16.mxu1 %v121_v62  ;;  %v78_v3 = vld [vmem:[%s4779_s0 + $0x160] sm:$0xff]  ;;  %2762 = vmatpush3.bf16.msra.mxu1 %v2878_v58  ;;  %v104_v7 = vpack.c.bf16 %v48_v0, %v46_v63  ;;  %vm1024_vm0 = vcmask 261120   ;;  %s3314_s20 = smov 64  }
  0x35   :  { %v80_v4 = vld [vmem:[%s4779_s0 + $0x170] sm:$0xff]  ;;  %v83_v5 = vld [vmem:[%s4779_s0 + $0x188] sm:$0xff]  ;;  %v85_v6 = vld [vmem:[%s4779_s0 + $0x198] sm:$0xff]  ;;  %v107_v8 = vpack.c.bf16 %v53_v2, %v51_v1  ;;  %vm2420_vm1 = vcmask 523264   ;;  %vm2453_vm2 = vcmask 785408  }
  0x36   :  { %v120_v9 = vpack.c.bf16 %v80_v4, %v78_v3  ;;  %v123_v10 = vpack.c.bf16 %v85_v6, %v83_v5  ;;  %v50_v11 = vld [vmem:[%s4779_s0 + $0x80] sm:$0xff]  ;;  %v52_v12 = vld [vmem:[%s4779_s0 + $0x90] sm:$0xff]  ;;  %v55_v13 = vld [vmem:[%s4779_s0 + $0xa8] sm:$0xff] }
  0x37   :  { %v57_v14 = vld [vmem:[%s4779_s0 + $0xb8] sm:$0xff]  ;;  %v82_v15 = vld [vmem:[%s4779_s0 + $0x180] sm:$0xff]  ;;  %v84_v16 = vld [vmem:[%s4779_s0 + $0x190] sm:$0xff]  ;;  %v106_v19 = vpack.c.bf16 %v52_v12, %v50_v11 }
  0x38   :  { %v87_v17 = vld [vmem:[%s4779_s0 + $0x1a8] sm:$0xff]  ;;  %v89_v18 = vld [vmem:[%s4779_s0 + $0x1b8] sm:$0xff]  ;;  %v109_v20 = vpack.c.bf16 %v57_v14, %v55_v13  ;;  %v122_v21 = vpack.c.bf16 %v84_v16, %v82_v15  ;;  %v54_v23 = vld [vmem:[%s4779_s0 + $0xa0] sm:$0xff] }
  0x39   :  { %v125_v22 = vpack.c.bf16 %v89_v18, %v87_v17  ;;  %v56_v24 = vld [vmem:[%s4779_s0 + $0xb0] sm:$0xff]  ;;  %v59_v25 = vld [vmem:[%s4779_s0 + $0xc8] sm:$0xff]  ;;  %v61_v26 = vld [vmem:[%s4779_s0 + $0xd8] sm:$0xff] }
  0x3a   :  { %321 = vmatmul.mubr.bf16.gmra.mxu0 %v104_v7  ;;  %385 = vmatmul.mubr.bf16.gmra.mxu1 %v120_v9  ;;  %v86_v27 = vld [vmem:[%s4779_s0 + $0x1a0] sm:$0xff]  ;;  %v88_v28 = vld [vmem:[%s4779_s0 + $0x1b0] sm:$0xff]  ;;  %v91_v29 = vld [vmem:[%s4779_s0 + $0x1c8] sm:$0xff]  ;;  %v108_v31 = vpack.c.bf16 %v56_v24, %v54_v23  ;;  %v111_v32 = vpack.c.bf16 %v61_v26, %v59_v25 }
  0x3b   :  { %328 = vmatprep.mubr.bf16.mxu0 %v107_v8  ;;  %392 = vmatprep.mubr.bf16.mxu1 %v123_v10  ;;  %v93_v30 = vld [vmem:[%s4779_s0 + $0x1d8] sm:$0xff]  ;;  %v124_v33 = vpack.c.bf16 %v88_v28, %v86_v27  ;;  %v58_v35 = vld [vmem:[%s4779_s0 + $0xc0] sm:$0xff]  ;;  %v60_v36 = vld [vmem:[%s4779_s0 + $0xd0] sm:$0xff] }
  0x3c   :  { %v127_v34 = vpack.c.bf16 %v93_v30, %v91_v29  ;;  %v63_v37 = vld [vmem:[%s4779_s0 + $0xe8] sm:$0xff]  ;;  %v65_v38 = vld [vmem:[%s4779_s0 + $0xf8] sm:$0xff]  ;;  %v90_v39 = vld [vmem:[%s4779_s0 + $0x1c0] sm:$0xff]  ;;  %v110_v43 = vpack.c.bf16 %v60_v36, %v58_v35 }
  0x3d   :  { %v92_v40 = vld [vmem:[%s4779_s0 + $0x1d0] sm:$0xff]  ;;  %v95_v41 = vld [vmem:[%s4779_s0 + $0x1e8] sm:$0xff]  ;;  %v97_v42 = vld [vmem:[%s4779_s0 + $0x1f8] sm:$0xff]  ;;  %v113_v44 = vpack.c.bf16 %v65_v38, %v63_v37 }
  0x3e   :  { %v126_v45 = vpack.c.bf16 %v92_v40, %v90_v39  ;;  %v129_v46 = vpack.c.bf16 %v97_v42, %v95_v41  ;;  %v62_v47 = vld [vmem:[%s4779_s0 + $0xe0] sm:$0xff]  ;;  %v64_v48 = vld [vmem:[%s4779_s0 + $0xf0] sm:$0xff]  ;;  %v2880_v54 = vld [vmem:[%s4782_s3 + $0x8] sm:$0xff]  }
  0x3f   :  { %v94_v49 = vld [vmem:[%s4779_s0 + $0x1e0] sm:$0xff]  ;;  %v96_v50 = vld [vmem:[%s4779_s0 + $0x1f0] sm:$0xff]  ;;  %v112_v51 = vpack.c.bf16 %v64_v48, %v62_v47 }
  0x40   :  { %v128_v52 = vpack.c.bf16 %v96_v50, %v94_v49  ;;  %v2879_v53 = vld [vmem:[%s4782_s3 + $0x10] sm:$0xff]   ;;  %v2881_v55 = vld [vmem:[%s4782_s3] sm:$0xff]  }
  0x41   :  { %2763 = vmatprep.subr.bf16.mxu1 %v2879_v53  ;;  %v3635_v61 = vld [vmem:[%s4785_s6] ss:$0 sm:$0xff] }
  0x42   :  { %329 = vmatmul.mubr.bf16.gmra.mxu0 %v106_v19  ;;  %393 = vmatmul.mubr.bf16.gmra.mxu1 %v122_v21 }
  0x43   :  { %336 = vmatprep.mubr.bf16.mxu0 %v109_v20  ;;  %400 = vmatprep.mubr.bf16.mxu1 %v125_v22 }
  0x44   :  { %2764 = vmatpush3.bf16.msra.mxu1 %v2879_v53 }
  0x45   :  { %2765 = vmatprep.subr.bf16.mxu1 %v2880_v54 }
  0x48   :  { %2766 = vmatpush3.bf16.msra.mxu1 %v2880_v54 }
  0x49   :  { %2767 = vmatprep.subr.bf16.mxu1 %v2881_v55 }
  0x4a   :  { %337 = vmatmul.mubr.bf16.gmra.mxu0 %v108_v31  ;;  %401 = vmatmul.mubr.bf16.gmra.mxu1 %v124_v33 }
  0x4b   :  { %344 = vmatprep.mubr.bf16.mxu0 %v111_v32  ;;  %408 = vmatprep.mubr.bf16.mxu1 %v127_v34 }
  0x4c   :  { %2768 = vmatpush3.bf16.msra.mxu1 %v2881_v55 }
  0x52   :  { %345 = vmatmul.mubr.bf16.gmra.mxu0 %v110_v43  ;;  %409 = vmatmul.mubr.bf16.gmra.mxu1 %v126_v45 }
  0x53   :  { %352 = vmatprep.mubr.bf16.mxu0 %v113_v44  ;;  %416 = vmatprep.mubr.bf16.mxu1 %v129_v46 }
  0x5a   :  { %353 = vmatmul.mubr.bf16.gmra.mxu0 %v112_v51  ;;  %417 = vmatmul.mubr.bf16.gmra.mxu1 %v128_v52 }
  0xe2   :  { %v2615_v56 = vpop.f32.mrf.mxu0  ;;  %v3628_v57 = vpop.f32.mrf.mxu1 }
  0xe4   :  { %v2616_v58 = vpop.f32.mrf.mxu0  ;;  %v3630_v60 = vpop.f32.mrf.mxu1 }
  0xe5   :  { %v2617_v59 = vadd.f32 %v2616_v58, %v2615_v56 }
  0xe6   :  { %v2618_v62 = vpop.f32.mrf.mxu0  ;;  %v3637_v63 = vpop.f32.mrf.mxu1 }
  0xe7   :  { %v299_v1 = vadd.f32 %v2617_v59, %v3635_v61 }
  0xe8   :  { %v2619_v0 = vpop.f32.mrf.mxu0  ;;  %v3640_v3 = vpop.f32.mrf.mxu1 }
  0xe9   :  { %v2620_v2 = vadd.f32 %v2619_v0, %v2618_v62  ;;  %v425_v8 = vmax.f32 %v299_v1, 0.0 }
  0xea   :  { %v2621_v4 = vpop.f32.mrf.mxu0  ;;  %v3643_v6 = vpop.f32.mrf.mxu1 }
  0xeb   :  { %v302_v5 = vadd.f32 %v2620_v2, %v3635_v61 }
  0xec   :  { %v2622_v7 = vpop.f32.mrf.mxu0  ;;  %v3645_v11 = vpop.f32.mrf.mxu1 }
  0xed   :  { %v426_v9 = vmax.f32 %v302_v5, 0.0  ;;  %v2623_v10 = vadd.f32 %v2622_v7, %v2621_v4 }
  0xee   :  { %v2624_v12 = vpop.f32.mrf.mxu0  ;;  %v3647_v14 = vpop.f32.mrf.mxu1 }
  0xef   :  { %v457_v13 = vpack.c.bf16 %v426_v9, %v425_v8  ;;  %v307_v16 = vadd.f32 %v2623_v10, %v3635_v61 }
  0xf0   :  { %v2625_v15 = vpop.f32.mrf.mxu0  ;;  %v3650_v18 = vpop.f32.mrf.mxu1 }
  0xf1   :  { %v2626_v17 = vadd.f32 %v2625_v15, %v2624_v12  ;;  %2769 = vmatprep.mubr.bf16.mxu1 %v457_v13  ;;  %v427_v23 = vmax.f32 %v307_v16, 0.0 }
  0xf2   :  { %v2627_v19 = vpop.f32.mrf.mxu0  ;;  %v3653_v21 = vpop.f32.mrf.mxu1 }
  0xf3   :  { %v310_v20 = vadd.f32 %v2626_v17, %v3635_v61 }
  0xf4   :  { %v2628_v22 = vpop.f32.mrf.mxu0  ;;  %v3655_v26 = vpop.f32.mrf.mxu1 }
  0xf5   :  { %v428_v24 = vmax.f32 %v310_v20, 0.0  ;;  %v2629_v25 = vadd.f32 %v2628_v22, %v2627_v19 }
  0xf6   :  { %v2630_v27 = vpop.f32.mrf.mxu0  ;;  %v3657_v29 = vpop.f32.mrf.mxu1 }
  0xf7   :  { %v458_v28 = vpack.c.bf16 %v428_v24, %v427_v23  ;;  %v315_v31 = vadd.f32 %v2629_v25, %v3635_v61 }
  0xf8   :  { %v2631_v30 = vpop.f32.mrf.mxu0  ;;  %v3660_v33 = vpop.f32.mrf.mxu1 }
  0xf9   :  { %v2632_v32 = vadd.f32 %v2631_v30, %v2630_v27  ;;  %2770 = vmatmul.mubr.bf16.vlgmr.msra.gmra.mxu1 %v458_v28  ;;  %v429_v38 = vmax.f32 %v315_v31, 0.0 }
  0xfa   :  { %v2633_v34 = vpop.f32.mrf.mxu0  ;;  %v3663_v36 = vpop.f32.mrf.mxu1 }
  0xfb   :  { %v318_v35 = vadd.f32 %v2632_v32, %v3635_v61 }
  0xfc   :  { %v2634_v37 = vpop.f32.mrf.mxu0  ;;  %v3665_v41 = vpop.f32.mrf.mxu1 }
  0xfd   :  { %v430_v39 = vmax.f32 %v318_v35, 0.0  ;;  %v2635_v40 = vadd.f32 %v2634_v37, %v2633_v34 }
  0xfe   :  { %v2636_v42 = vpop.f32.mrf.mxu0  ;;  %v3667_v44 = vpop.f32.mrf.mxu1 }
  0xff   :  { %v459_v43 = vpack.c.bf16 %v430_v39, %v429_v38  ;;  %v323_v46 = vadd.f32 %v2635_v40, %v3635_v61  ;;  %v2665_v40 = vadd.f32 %v3630_v60, %v3628_v57 }
 0x100   :  { %v2637_v45 = vpop.f32.mrf.mxu0  ;;  %v3670_v48 = vpop.f32.mrf.mxu1 }
 0x101   :  { %v2638_v47 = vadd.f32 %v2637_v45, %v2636_v42  ;;  %2773 = vmatprep.mubr.bf16.mxu1 %v459_v43  ;;  %v431_v53 = vmax.f32 %v323_v46, 0.0  ;;  %v2668_v42 = vadd.f32 %v3640_v3, %v3637_v63  ;;  %v2671_v63 = vadd.f32 %v3645_v11, %v3643_v6 }
 0x102   :  { %v2639_v49 = vpop.f32.mrf.mxu0  ;;  %v3673_v51 = vpop.f32.mrf.mxu1 }
 0x103   :  { %v326_v50 = vadd.f32 %v2638_v47, %v3635_v61 }
 0x104   :  { %v2640_v52 = vpop.f32.mrf.mxu0  ;;  %v3675_v56 = vpop.f32.mrf.mxu1 }
 0x105   :  { %v432_v54 = vmax.f32 %v326_v50, 0.0  ;;  %v2641_v55 = vadd.f32 %v2640_v52, %v2639_v49 }
 0x106   :  { %v2642_v58 = vpop.f32.mrf.mxu0  ;;  %v3678_v0 = vpop.f32.mrf.mxu1 }
 0x107   :  { %v331_v59 = vadd.f32 %v2641_v55, %v3635_v61  ;;  %v460_v62 = vpack.c.bf16 %v432_v54, %v431_v53  ;;  %v363_v53 = vadd.f32 %v2665_v40, %v3635_v61  ;;  %v366_v54 = vadd.f32 %v2668_v42, %v3635_v61 }
 0x108   :  { %v2643_v1 = vpop.f32.mrf.mxu0  ;;  %v3680_v4 = vpop.f32.mrf.mxu1 }
 0x109   :  { %v2644_v2 = vadd.f32 %v2643_v1, %v2642_v58  ;;  %2774 = vmatmul.mubr.bf16.gmra.mxu1 %v460_v62  ;;  %v433_v7 = vmax.f32 %v331_v59, 0.0  ;;  %v2674_v62 = vadd.f32 %v3650_v18, %v3647_v14  ;;  %v441_v1 = vmax.f32 %v363_v53, 0.0 }
 0x10a   :  { %v2645_v5 = vpop.f32.mrf.mxu0  ;;  %v3683_v9 = vpop.f32.mrf.mxu1 }
 0x10b   :  { %v334_v8 = vadd.f32 %v2644_v2, %v3635_v61  ;;  %v442_v2 = vmax.f32 %v366_v54, 0.0  ;;  %v374_v11 = vadd.f32 %v2674_v62, %v3635_v61 }
 0x10c   :  { %v2646_v10 = vpop.f32.mrf.mxu0  ;;  %v3685_v16 = vpop.f32.mrf.mxu1 }
 0x10d   :  { %v434_v12 = vmax.f32 %v334_v8, 0.0  ;;  %v2647_v13 = vadd.f32 %v2646_v10, %v2645_v5  ;;  %v2677_v5 = vadd.f32 %v3655_v26, %v3653_v21  ;;  %v444_v26 = vmax.f32 %v374_v11, 0.0 }
 0x10e   :  { %v2648_v15 = vpop.f32.mrf.mxu0  ;;  %v3688_v24 = vpop.f32.mrf.mxu1 }
 0x10f   :  { %v339_v17 = vadd.f32 %v2647_v13, %v3635_v61  ;;  %v461_v19 = vpack.c.bf16 %v434_v12, %v433_v7  ;;  %v2680_v7 = vadd.f32 %v3660_v33, %v3657_v29  ;;  %v371_v13 = vadd.f32 %v2671_v63, %v3635_v61  ;;  %v706_v63 = vld [vmem:[%s4780_s1 + $0x10] sm:$0xff] }
 0x110   :  { %v2649_v20 = vpop.f32.mrf.mxu0  ;;  %v3691_v34 = vpop.f32.mrf.mxu1  ;;  %v379_v14 = vadd.f32 %v2677_v5, %v3635_v61  ;;  %v2683_v29 = vadd.f32 %v3665_v41, %v3663_v36  ;;  %v2686_v33 = vadd.f32 %v3670_v48, %v3667_v44  ;;  %v738_v62 = vadd.f32 1e-20, %v706_v63 }
 0x111   :  { %v2650_v22 = vadd.f32 %v2649_v20, %v2648_v15  ;;  %2777 = vmatprep.mubr.bf16.mxu1 %v461_v19  ;;  %v435_v25 = vmax.f32 %v339_v17, 0.0  ;;  %v382_v18 = vadd.f32 %v2680_v7, %v3635_v61  ;;  %v465_v15 = vpack.c.bf16 %v442_v2, %v441_v1  ;;  %v705_v2 = vld [vmem:[%s4780_s1 + $0x8] sm:$0xff] }
 0x112   :  { %v2651_v23 = vpop.f32.mrf.mxu0  ;;  %v2699_v45 = vpop.f32.mrf.mxu1  ;;  %v443_v21 = vmax.f32 %v371_v13, 0.0  ;;  %v445_v20 = vmax.f32 %v379_v14, 0.0  ;;  %2908 = vlog2.f32 %v738_v62  ;;  %v737_v7 = vadd.f32 1e-20, %v705_v2  ;;  %v709_v13 = vld [vmem:[%s4780_s1 + $0x28] sm:$0xff] }
 0x113   :  { %v342_v27 = vadd.f32 %v2650_v22, %v3635_v61  ;;  %v446_v22 = vmax.f32 %v382_v18, 0.0 }
 0x114   :  { %v2652_v28 = vpop.f32.mrf.mxu0  ;;  %v2700_v58 = vpop.f32.mrf.mxu1 }
 0x115   :  { %v436_v30 = vmax.f32 %v342_v27, 0.0  ;;  %v2653_v31 = vadd.f32 %v2652_v28, %v2651_v23  ;;  %v2689_v23 = vadd.f32 %v3675_v56, %v3673_v51  ;;  %v387_v28 = vadd.f32 %v2683_v29, %v3635_v61 }
 0x116   :  { %v2654_v32 = vpop.f32.mrf.mxu0  ;;  %v2702_v8 = vpop.f32.mrf.mxu1  ;;  %v2695_v51 = vadd.f32 %v3685_v16, %v3683_v9  ;;  %v2698_v56 = vadd.f32 %v3691_v34, %v3688_v24 }
 0x117   :  { %v347_v35 = vadd.f32 %v2653_v31, %v3635_v61  ;;  %v462_v37 = vpack.c.bf16 %v436_v30, %v435_v25  ;;  %v2692_v25 = vadd.f32 %v3680_v4, %v3678_v0  ;;  %v390_v30 = vadd.f32 %v2686_v33, %v3635_v61 }
 0x118   :  { %v2655_v38 = vpop.f32.mrf.mxu0  ;;  %v2703_v17 = vpop.f32.mrf.mxu1  ;;  %v466_v31 = vpack.c.bf16 %v444_v26, %v443_v21  ;;  %v395_v36 = vadd.f32 %v2689_v23, %v3635_v61  ;;  %v447_v48 = vmax.f32 %v387_v28, 0.0  ;;  %v403_v42 = vadd.f32 %v2695_v51, %v3635_v61  ;;  %v715_v51 = vld [vmem:[%s4780_s1 + $0x58] sm:$0xff] }
 0x119   :  { %v2656_v39 = vadd.f32 %v2655_v38, %v2654_v32  ;;  %2778 = vmatmul.mubr.bf16.gmra.mxu1 %v462_v37  ;;  %v437_v46 = vmax.f32 %v347_v35, 0.0  ;;  %v467_v32 = vpack.c.bf16 %v446_v22, %v445_v20  ;;  %v398_v41 = vadd.f32 %v2692_v25, %v3635_v61  ;;  %v712_v25 = vld [vmem:[%s4780_s1 + $0x40] sm:$0xff] }
 0x11a   :  { %v2657_v43 = vpop.f32.mrf.mxu0  ;;  %v2705_v27 = vpop.f32.mrf.mxu1  ;;  %v448_v35 = vmax.f32 %v390_v30, 0.0  ;;  %v449_v0 = vmax.f32 %v395_v36, 0.0  ;;  %v2701_v37 = vadd.f32 %v2700_v58, %v2699_v45  ;;  %v2704_v38 = vadd.f32 %v2703_v17, %v2702_v8  ;;  %v708_v8 = vld [vmem:[%s4780_s1 + $0x20] sm:$0xff]  ;;  %v714_v36 = vld [vmem:[%s4780_s1 + $0x50] sm:$0xff] }
 0x11b   :  { %v350_v47 = vadd.f32 %v2656_v39, %v3635_v61  ;;  %v450_v4 = vmax.f32 %v398_v41, 0.0  ;;  %v451_v16 = vmax.f32 %v403_v42, 0.0  ;;  %v740_v11 = vadd.f32 1e-20, %v708_v8  ;;  %v719_v8 = vld [vmem:[%s4780_s1 + $0x78] sm:$0xff] }
 0x11c   :  { %v2658_v49 = vpop.f32.mrf.mxu0  ;;  %v2706_v44 = vpop.f32.mrf.mxu1  ;;  %v468_v40 = vpack.c.bf16 %v448_v35, %v447_v48  ;;  %v741_v17 = vadd.f32 1e-20, %v709_v13  ;;  %v713_v48 = vld [vmem:[%s4780_s1 + $0x48] sm:$0xff]  ;;  %v746_v35 = vadd.f32 1e-20, %v714_v36 }
 0x11d   :  { %v438_v50 = vmax.f32 %v350_v47, 0.0  ;;  %v2659_v52 = vadd.f32 %v2658_v49, %v2657_v43  ;;  %v406_v43 = vadd.f32 %v2698_v56, %v3635_v61  ;;  %v469_v47 = vpack.c.bf16 %v450_v4, %v449_v0 }
 0x11e   :  { %v2660_v55 = vpop.f32.mrf.mxu0  ;;  %v2708_v39 = vpop.f32.mrf.mxu1  ;;  %v414_v49 = vadd.f32 %v2704_v38, %v3635_v61  ;;  %v2707_v34 = vadd.f32 %v2706_v44, %v2705_v27  ;;  %v745_v0 = vadd.f32 1e-20, %v713_v48  ;;  %v747_v38 = vadd.f32 1e-20, %v715_v51 }
 0x11f   :  { %v355_v59 = vadd.f32 %v2659_v52, %v3635_v61  ;;  %v463_v57 = vpack.c.bf16 %v438_v50, %v437_v46  ;;  %v411_v46 = vadd.f32 %v2701_v37, %v3635_v61  ;;  %v452_v24 = vmax.f32 %v406_v43, 0.0 }
 0x120   :  { %v2661_v60 = vpop.f32.mrf.mxu0  ;;  %v2709_v9 = vpop.f32.mrf.mxu1  ;;  %v454_v45 = vmax.f32 %v414_v49, 0.0  ;;  %v419_v54 = vadd.f32 %v2707_v34, %v3635_v61 }
 0x121   :  { %v2662_v3 = vadd.f32 %v2661_v60, %v2660_v55  ;;  %2781 = vmatprep.mubr.bf16.mxu1 %v463_v57  ;;  %v439_v10 = vmax.f32 %v355_v59, 0.0  ;;  %v2710_v50 = vadd.f32 %v2709_v9, %v2708_v39  ;;  %v453_v52 = vmax.f32 %v411_v46, 0.0 }
 0x122   :  { %v470_v53 = vpack.c.bf16 %v452_v24, %v451_v16  ;;  %v455_v59 = vmax.f32 %v419_v54, 0.0  ;;  %v718_v54 = vld [vmem:[%s4780_s1 + $0x70] sm:$0xff] }
 0x123   :  { %v358_v12 = vadd.f32 %v2662_v3, %v3635_v61  ;;  %v422_v55 = vadd.f32 %v2710_v50, %v3635_v61  ;;  %v471_v58 = vpack.c.bf16 %v454_v45, %v453_v52  ;;  %v704_v3 = vld [vmem:[%s4780_s1] sm:$0xff]  ;;  %v707_v61 = vld [vmem:[%s4780_s1 + $0x18] sm:$0xff]  ;;  %v750_v2 = vadd.f32 1e-20, %v718_v54  ;;  %v725_v54 = vld [vmem:[%s4780_s1 + $0xa8] sm:$0xff] }
 0x124   :  { %v736_v1 = vadd.f32 1e-20, %v704_v3  ;;  %v739_v5 = vadd.f32 1e-20, %v707_v61  ;;  %v716_v52 = vld [vmem:[%s4780_s1 + $0x60] sm:$0xff] }
 0x125   :  { %v440_v6 = vmax.f32 %v358_v12, 0.0  ;;  %v456_v57 = vmax.f32 %v422_v55, 0.0  ;;  %v710_v12 = vld [vmem:[%s4780_s1 + $0x30] sm:$0xff]  ;;  %v748_v3 = vadd.f32 1e-20, %v716_v52 }
 0x126   :  { %2910 = vlog2.f32 %v736_v1  ;;  %v742_v18 = vadd.f32 1e-20, %v710_v12  ;;  %v3782_v61 = vld [vmem:[%s4785_s6 + $0x1] ss:$0 sm:$0xff]  ;;  %v717_v1 = vld [vmem:[%s4780_s1 + $0x68] sm:$0xff] }
 0x127   :  { %v464_v19 = vpack.c.bf16 %v440_v6, %v439_v10  ;;  %v472_v60 = vpack.c.bf16 %v456_v57, %v455_v59  ;;  %2912 = vlog2.f32 %v739_v5  ;;  %v2909_v10 = vpop.eup %2908 }
 0x128   :  { %2914 = vlog2.f32 %v737_v7  ;;  %v773_v14 = vmul.f32 0.6931472, %v2909_v10 }
 0x129   :  { %2782 = vmatmul.mubr.bf16.gmra.mxu1 %v464_v19  ;;  %v711_v19 = vld [vmem:[%s4780_s1 + $0x38] sm:$0xff]  ;;  %2916 = vlog2.f32 %v740_v11  ;;  %v720_v11 = vld [vmem:[%s4780_s1 + $0x80] sm:$0xff] }
 0x12a   :  { %2785 = vmatprep.mubr.bf16.mxu1 %v465_v15  ;;  %v834_v29 = vsub.f32 0.0, %v773_v14  ;;  %2918 = vlog2.f32 %v742_v18  ;;  %v743_v20 = vadd.f32 1e-20, %v711_v19 }
 0x12b   :  { %2920 = vlog2.f32 %v741_v17  ;;  %v749_v17 = vadd.f32 1e-20, %v717_v1  ;;  %v757_v1 = vadd.f32 1e-20, %v725_v54 }
 0x12c   :  { %v866_v27 = vadd.f32 1e-20, %v834_v29  ;;  %2922 = vlog2.f32 %v743_v20  ;;  %v722_v29 = vld [vmem:[%s4780_s1 + $0x90] sm:$0xff] }
 0x12e   :  { %2924 = vlog2.f32 %v866_v27 }
 0x131   :  { %2786 = vmatmul.mubr.bf16.gmra.mxu1 %v466_v31  ;;  %v744_v31 = vadd.f32 1e-20, %v712_v25 }
 0x132   :  { %2789 = vmatprep.mubr.bf16.mxu1 %v467_v32 }
 0x133   :  { %v2911_v6 = vpop.eup %2910  ;;  %2926 = vlog2.f32 %v744_v31  ;;  %v721_v31 = vld [vmem:[%s4780_s1 + $0x88] sm:$0xff] }
 0x134   :  { %v2913_v15 = vpop.eup %2912  ;;  %v769_v26 = vmul.f32 0.6931472, %v2911_v6 }
 0x135   :  { %v2915_v21 = vpop.eup %2914  ;;  %v775_v33 = vmul.f32 0.6931472, %v2913_v15 }
 0x136   :  { %v771_v22 = vmul.f32 0.6931472, %v2915_v21  ;;  %v832_v23 = vsub.f32 0.0, %v769_v26  ;;  %v2917_v56 = vpop.eup %2916  ;;  %v751_v26 = vadd.f32 1e-20, %v719_v8 }
 0x137   :  { %v835_v28 = vsub.f32 0.0, %v775_v33  ;;  %v2919_v4 = vpop.eup %2918  ;;  %v777_v39 = vmul.f32 0.6931472, %v2917_v56  ;;  %v723_v56 = vld [vmem:[%s4780_s1 + $0x98] sm:$0xff] }
 0x138   :  { %v833_v30 = vsub.f32 0.0, %v771_v22  ;;  %v864_v32 = vadd.f32 1e-20, %v832_v23  ;;  %v2921_v37 = vpop.eup %2920  ;;  %v752_v23 = vadd.f32 1e-20, %v720_v11 }
 0x139   :  { %2790 = vmatmul.mubr.bf16.gmra.mxu1 %v468_v40  ;;  %v867_v41 = vadd.f32 1e-20, %v835_v28  ;;  %v781_v40 = vmul.f32 0.6931472, %v2919_v4  ;;  %v2923_v42 = vpop.eup %2922  ;;  %v779_v43 = vmul.f32 0.6931472, %v2921_v37 }
 0x13a   :  { %2793 = vmatprep.mubr.bf16.mxu1 %v469_v47  ;;  %v865_v44 = vadd.f32 1e-20, %v833_v30  ;;  %2928 = vlog2.f32 %v864_v32  ;;  %v836_v46 = vsub.f32 0.0, %v777_v39  ;;  %v783_v49 = vmul.f32 0.6931472, %v2923_v42 }
 0x13b   :  { %2930 = vlog2.f32 %v867_v41  ;;  %v838_v47 = vsub.f32 0.0, %v781_v40  ;;  %v2925_v9 = vpop.eup %2924  ;;  %v837_v16 = vsub.f32 0.0, %v779_v43  ;;  %v753_v37 = vadd.f32 1e-20, %v721_v31  ;;  %v724_v43 = vld [vmem:[%s4780_s1 + $0xa0] sm:$0xff] }
 0x13c   :  { %2932 = vlog2.f32 %v865_v44  ;;  %v868_v50 = vadd.f32 1e-20, %v836_v46  ;;  %v754_v44 = vadd.f32 1e-20, %v722_v29  ;;  %v755_v42 = vadd.f32 1e-20, %v723_v56 }
 0x13d   :  { %2934 = vlog2.f32 %v746_v35  ;;  %v870_v45 = vadd.f32 1e-20, %v838_v47  ;;  %v869_v59 = vadd.f32 1e-20, %v837_v16  ;;  %v726_v16 = vld [vmem:[%s4780_s1 + $0xb0] sm:$0xff] }
 0x13e   :  { %2936 = vlog2.f32 %v745_v0 }
 0x13f   :  { %2938 = vlog2.f32 %v747_v38 }
 0x140   :  { %v2927_v24 = vpop.eup %2926  ;;  %2940 = vlog2.f32 %v868_v50 }
 0x141   :  { %2794 = vmatmul.mubr.bf16.gmra.mxu1 %v470_v53  ;;  %v839_v53 = vsub.f32 0.0, %v783_v49  ;;  %v785_v57 = vmul.f32 0.6931472, %v2927_v24  ;;  %2942 = vlog2.f32 %v870_v45  ;;  %v756_v45 = vadd.f32 1e-20, %v724_v43 }
 0x142   :  { %2797 = vmatprep.mubr.bf16.mxu1 %v471_v58  ;;  %v901_v58 = vmul.f32 0.6931472, %v2925_v9  ;;  %2944 = vlog2.f32 %v869_v59 }
 0x143   :  { %v871_v7 = vadd.f32 1e-20, %v839_v53  ;;  %v840_v6 = vsub.f32 0.0, %v785_v57  ;;  %2946 = vlog2.f32 %v748_v3 }
 0x144   :  { %v962_v12 = vsub.f32 0.0, %v901_v58  ;;  %2948 = vlog2.f32 %v750_v2 }
 0x145   :  { %2950 = vlog2.f32 %v871_v7  ;;  %v872_v30 = vadd.f32 1e-20, %v840_v6 }
 0x146   :  { %2952 = vlog2.f32 %v749_v17 }
 0x147   :  { %v2929_v34 = vpop.eup %2928  ;;  %2954 = vlog2.f32 %v751_v26 }
 0x148   :  { %v2931_v55 = vpop.eup %2930  ;;  %v897_v63 = vmul.f32 0.6931472, %v2929_v34  ;;  %2956 = vlog2.f32 %v752_v23 }
 0x149   :  { %2798 = vmatmul.mubr.bf16.gmra.mxu1 %v472_v60  ;;  %v2933_v60 = vpop.eup %2932  ;;  %v903_v5 = vmul.f32 0.6931472, %v2931_v55  ;;  %2958 = vlog2.f32 %v872_v30  ;;  %v758_v55 = vadd.f32 1e-20, %v726_v16 }
 0x14a   :  { %v2935_v62 = vpop.eup %2934  ;;  %v899_v13 = vmul.f32 0.6931472, %v2933_v60  ;;  %v960_v18 = vsub.f32 0.0, %v897_v63  ;;  %2960 = vlog2.f32 %v754_v44  ;;  %v727_v60 = vld [vmem:[%s4780_s1 + $0xb8] sm:$0xff] }
 0x14b   :  { %v2937_v10 = vpop.eup %2936  ;;  %v789_v15 = vmul.f32 0.6931472, %v2935_v62  ;;  %v963_v20 = vsub.f32 0.0, %v903_v5  ;;  %2962 = vlog2.f32 %v753_v37  ;;  %v759_v7 = vadd.f32 1e-20, %v727_v60 }
 0x14c   :  { %v2939_v19 = vpop.eup %2938  ;;  %v787_v22 = vmul.f32 0.6931472, %v2937_v10  ;;  %v961_v28 = vsub.f32 0.0, %v899_v13  ;;  %2964 = vlog2.f32 %v755_v42 }
 0x14d   :  { %v842_v36 = vsub.f32 0.0, %v789_v15  ;;  %v791_v41 = vmul.f32 0.6931472, %v2939_v19  ;;  %v2941_v24 = vpop.eup %2940 }
 0x14e   :  { %v841_v4 = vsub.f32 0.0, %v787_v22  ;;  %v2943_v50 = vpop.eup %2942  ;;  %v905_v59 = vmul.f32 0.6931472, %v2941_v24 }
 0x14f   :  { %v874_v49 = vadd.f32 1e-20, %v842_v36  ;;  %v843_v9 = vsub.f32 0.0, %v791_v41  ;;  %v2945_v53 = vpop.eup %2944  ;;  %v909_v62 = vmul.f32 0.6931472, %v2943_v50 }
 0x150   :  { %v873_v34 = vadd.f32 1e-20, %v841_v4  ;;  %v2947_v58 = vpop.eup %2946  ;;  %v964_v10 = vsub.f32 0.0, %v905_v59 }
 0x151   :  { %2966 = vlog2.f32 %v874_v49  ;;  %v875_v57 = vadd.f32 1e-20, %v843_v9  ;;  %v2949_v63 = vpop.eup %2948  ;;  %v793_v5 = vmul.f32 0.6931472, %v2947_v58  ;;  %v966_v19 = vsub.f32 0.0, %v909_v62 }
 0x152   :  { %2968 = vlog2.f32 %v873_v34  ;;  %v2951_v3 = vpop.eup %2950  ;;  %v797_v13 = vmul.f32 0.6931472, %v2949_v63 }
 0x153   :  { %2970 = vlog2.f32 %v756_v45  ;;  %v2953_v8 = vpop.eup %2952 }
 0x154   :  { %2972 = vlog2.f32 %v758_v55  ;;  %v2955_v6 = vpop.eup %2954  ;;  %v846_v30 = vsub.f32 0.0, %v797_v13 }
 0x155   :  { %2974 = vlog2.f32 %v875_v57  ;;  %v799_v31 = vmul.f32 0.6931472, %v2955_v6 }
 0x156   :  { %2976 = vlog2.f32 %v757_v1  ;;  %v878_v49 = vadd.f32 1e-20, %v846_v30 }
 0x157   :  { %2978 = vlog2.f32 %v759_v7  ;;  %v847_v9 = vsub.f32 0.0, %v799_v31 }
 0x1b9   :  { %v2771_v14 = vpop.f32.mrf.mxu1 }
 0x1ba   :  { %v3794_v21 = vadd.f32 %v2771_v14, %v3782_v61  ;;  %v911_v14 = vmul.f32 0.6931472, %v2951_v3  ;;  %v879_v3 = vadd.f32 1e-20, %v847_v9 }
 0x1bb   :  { %v577_v33 = vpop.f32.mrf.mxu1 }
 0x1bc   :  { %v3800_v25 = vadd.f32 %v3782_v61, %v577_v33  ;;  %v3803_v27 = vadd.f32 %v962_v12, %v3794_v21  ;;  %v907_v12 = vmul.f32 0.6931472, %v2945_v53  ;;  %v844_v33 = vsub.f32 0.0, %v793_v5 }
 0x1bd   :  { %v2772_v32 = vpop.f32.mrf.mxu1  ;;  %v967_v36 = vsub.f32 0.0, %v911_v14 }
 0x1be   :  { %v3809_v48 = vadd.f32 %v2772_v32, %v3782_v61  ;;  %v1031_v35 = vsel %vm1024_vm0, %v3803_v27, -inf  ;;  %v3814_v51 = vadd.f32 %v960_v18, %v3800_v25  ;;  %v2957_v18 = vpop.eup %2956  ;;  %v876_v37 = vadd.f32 1e-20, %v844_v33 }
 0x1bf   :  { %1032 = vmax.xlane.f32.xlu1 %v1031_v35  ;;  %v580_v0 = vpop.f32.mrf.mxu1  ;;  %v2959_v26 = vpop.eup %2958  ;;  %v801_v41 = vmul.f32 0.6931472, %v2957_v18 }
 0x1c0   :  { %v3820_v38 = vadd.f32 %v3782_v61, %v580_v0  ;;  %v1025_v39 = vsel %vm1024_vm0, %v3814_v51, -inf  ;;  %v3825_v40 = vadd.f32 %v963_v20, %v3809_v48  ;;  %v795_v20 = vmul.f32 0.6931472, %v2953_v8  ;;  %v2961_v22 = vpop.eup %2960 }
 0x1c1   :  { %1026 = vmax.xlane.f32.xlu0 %v1025_v39  ;;  %v2963_v44 = vpop.eup %2962  ;;  %v805_v42 = vmul.f32 0.6931472, %v2961_v22  ;;  %v913_v24 = vmul.f32 0.6931472, %v2959_v26  ;;  %v848_v54 = vsub.f32 0.0, %v801_v41  ;;  %2980 = vlog2.f32 %v876_v37 }
 0x1c2   :  { %v1034_v46 = vsel %vm1024_vm0, %v3825_v40, -inf  ;;  %v3833_v47 = vadd.f32 %v961_v28, %v3820_v38  ;;  %v965_v28 = vsub.f32 0.0, %v907_v12  ;;  %v845_v39 = vsub.f32 0.0, %v795_v20  ;;  %v2965_v43 = vpop.eup %2964 }
 0x1c3   :  { %1035 = vmax.xlane.f32.xlu1 %v1034_v46  ;;  %v2967_v16 = vpop.eup %2966  ;;  %v803_v34 = vmul.f32 0.6931472, %v2963_v44  ;;  %v850_v59 = vsub.f32 0.0, %v805_v42  ;;  %v807_v57 = vmul.f32 0.6931472, %v2965_v43  ;;  %2982 = vlog2.f32 %v878_v49 }
 0x1c4   :  { %v1028_v52 = vsel %vm1024_vm0, %v3833_v47, -inf  ;;  %v2969_v50 = vpop.eup %2968  ;;  %v877_v58 = vadd.f32 1e-20, %v845_v39  ;;  %v917_v63 = vmul.f32 0.6931472, %v2967_v16  ;;  %v968_v7 = vsub.f32 0.0, %v913_v24 }
 0x1c5   :  { %1029 = vmax.xlane.f32.xlu0 %v1028_v52  ;;  %v2971_v55 = vpop.eup %2970  ;;  %v915_v1 = vmul.f32 0.6931472, %v2969_v50  ;;  %v880_v8 = vadd.f32 1e-20, %v848_v54  ;;  %v882_v6 = vadd.f32 1e-20, %v850_v59 }
 0x1c6   :  { %v2973_v60 = vpop.eup %2972  ;;  %2984 = vlog2.f32 %v877_v58  ;;  %v970_v26 = vsub.f32 0.0, %v917_v63 }
 0x1c7   :  { %v2975_v62 = vpop.eup %2974  ;;  %v813_v14 = vmul.f32 0.6931472, %v2973_v60  ;;  %2986 = vlog2.f32 %v879_v3  ;;  %v969_v20 = vsub.f32 0.0, %v915_v1 }
 0x1c8   :  { %v2977_v12 = vpop.eup %2976  ;;  %2988 = vlog2.f32 %v880_v8 }
 0x1c9   :  { %v2775_v2 = vpop.f32.mrf.mxu1  ;;  %v2979_v18 = vpop.eup %2978  ;;  %v811_v31 = vmul.f32 0.6931472, %v2977_v12  ;;  %2990 = vlog2.f32 %v882_v6  ;;  %v854_v41 = vsub.f32 0.0, %v813_v14 }
 0x1ca   :  { %v3847_v15 = vadd.f32 %v2775_v2, %v3782_v61  ;;  %v849_v2 = vsub.f32 0.0, %v803_v34  ;;  %v815_v44 = vmul.f32 0.6931472, %v2979_v18 }
 0x1cb   :  { %v593_v11 = vpop.f32.mrf.mxu1  ;;  %v853_v24 = vsub.f32 0.0, %v811_v31  ;;  %v886_v34 = vadd.f32 1e-20, %v854_v41 }
 0x1cc   :  { %v3850_v17 = vadd.f32 %v3782_v61, %v593_v11  ;;  %v3864_v4 = vadd.f32 %v966_v19, %v3847_v15  ;;  %v851_v11 = vsub.f32 0.0, %v807_v57  ;;  %v881_v22 = vadd.f32 1e-20, %v849_v2 }
 0x1cd   :  { %v2776_v29 = vpop.f32.mrf.mxu1  ;;  %v855_v50 = vsub.f32 0.0, %v815_v44  ;;  %v885_v57 = vadd.f32 1e-20, %v853_v24 }
 0x1ce   :  { %v3853_v23 = vadd.f32 %v964_v10, %v3850_v17  ;;  %v3856_v35 = vadd.f32 %v2776_v29, %v3782_v61  ;;  %v1043_v45 = vsel %vm1024_vm0, %v3864_v4, -inf  ;;  %v809_v10 = vmul.f32 0.6931472, %v2971_v55 }
 0x1cf   :  { %v596_v32 = vpop.f32.mrf.mxu1  ;;  %v919_v29 = vmul.f32 0.6931472, %v2975_v62  ;;  %2992 = vlog2.f32 %v881_v22  ;;  %v887_v60 = vadd.f32 1e-20, %v855_v50 }
 0x1d0   :  { %v3859_v56 = vadd.f32 %v3782_v61, %v596_v32  ;;  %v1037_v0 = vsel %vm1024_vm0, %v3853_v23, -inf  ;;  %v3874_v53 = vadd.f32 %v967_v36, %v3856_v35  ;;  %v852_v30 = vsub.f32 0.0, %v809_v10 }
 0x1d1   :  { %1038 = vmax.xlane.f32.xlu0 %v1037_v0  ;;  %v883_v36 = vadd.f32 1e-20, %v851_v11  ;;  %v971_v42 = vsub.f32 0.0, %v919_v29 }
 0x1d2   :  { %v3867_v46 = vadd.f32 %v965_v28, %v3859_v56  ;;  %v1046_v5 = vsel %vm1024_vm0, %v3874_v53, -inf  ;;  %v884_v16 = vadd.f32 1e-20, %v852_v30 }
 0x1d3   :  { %2994 = vlog2.f32 %v883_v36 }
 0x1d4   :  { %v1040_v52 = vsel %vm1024_vm0, %v3867_v46, -inf  ;;  %2996 = vlog2.f32 %v884_v16 }
 0x1d5   :  { %1041 = vmax.xlane.f32.xlu1 %v1040_v52  ;;  %1044 = vmax.xlane.f32.xlu0 %v1043_v45  ;;  %v2981_v52 = vpop.eup %2980  ;;  %2998 = vlog2.f32 %v886_v34 }
 0x1d6   :  { %v2983_v58 = vpop.eup %2982  ;;  %v921_v62 = vmul.f32 0.6931472, %v2981_v52  ;;  %3000 = vlog2.f32 %v885_v57 }
 0x1d7   :  { %v2985_v63 = vpop.eup %2984  ;;  %v925_v1 = vmul.f32 0.6931472, %v2983_v58  ;;  %3002 = vlog2.f32 %v887_v60 }
 0x1d8   :  { %v2987_v2 = vpop.eup %2986  ;;  %v923_v8 = vmul.f32 0.6931472, %v2985_v63 }
 0x1d9   :  { %v2779_v13 = vpop.f32.mrf.mxu1  ;;  %1047 = vmax.xlane.f32.xlu1 %v1046_v5  ;;  %v2989_v5 = vpop.eup %2988  ;;  %v974_v6 = vsub.f32 0.0, %v925_v1  ;;  %v927_v11 = vmul.f32 0.6931472, %v2987_v2 }
 0x1da   :  { %v3879_v19 = vadd.f32 %v2779_v13, %v3782_v61  ;;  %v2991_v10 = vpop.eup %2990  ;;  %v972_v13 = vsub.f32 0.0, %v921_v62 }
 0x1db   :  { %v609_v33 = vpop.f32.mrf.mxu1  ;;  %v933_v22 = vmul.f32 0.6931472, %v2991_v10  ;;  %v975_v41 = vsub.f32 0.0, %v927_v11 }
 0x1dc   :  { %v3882_v28 = vadd.f32 %v3782_v61, %v609_v33  ;;  %v3891_v39 = vadd.f32 %v970_v26, %v3879_v19  ;;  %v2993_v18 = vpop.eup %2992  ;;  %v973_v33 = vsub.f32 0.0, %v923_v8 }
 0x1dd   :  { %v2780_v32 = vpop.f32.mrf.mxu1  ;;  %v931_v34 = vmul.f32 0.6931472, %v2993_v18  ;;  %v978_v50 = vsub.f32 0.0, %v933_v22 }
 0x1de   :  { %v3885_v0 = vadd.f32 %v2780_v32, %v3782_v61  ;;  %v3888_v37 = vadd.f32 %v968_v7, %v3882_v28  ;;  %v1055_v54 = vsel %vm1024_vm0, %v3891_v39, -inf }
 0x1df   :  { %v612_v43 = vpop.f32.mrf.mxu1 }
 0x1e0   :  { %v3894_v49 = vadd.f32 %v3782_v61, %v612_v43  ;;  %v1049_v9 = vsel %vm1024_vm0, %v3888_v37, -inf  ;;  %v3904_v55 = vadd.f32 %v971_v42, %v3885_v0  ;;  %v2995_v30 = vpop.eup %2994 }
 0x1e1   :  { %1050 = vmax.xlane.f32.xlu0 %v1049_v9  ;;  %v2997_v9 = vpop.eup %2996  ;;  %v935_v52 = vmul.f32 0.6931472, %v2995_v30 }
 0x1e2   :  { %v3899_v45 = vadd.f32 %v969_v20, %v3894_v49  ;;  %v1058_v3 = vsel %vm1024_vm0, %v3904_v55, -inf  ;;  %v929_v20 = vmul.f32 0.6931472, %v2989_v5  ;;  %v977_v5 = vsub.f32 0.0, %v931_v34 }
 0x1e3   :  { %v937_v8 = vmul.f32 0.6931472, %v2997_v9 }
 0x1e4   :  { %v1052_v59 = vsel %vm1024_vm0, %v3899_v45, -inf  ;;  %v976_v24 = vsub.f32 0.0, %v929_v20 }
 0x1e5   :  { %1053 = vmax.xlane.f32.xlu1 %v1052_v59  ;;  %1056 = vmax.xlane.f32.xlu0 %v1055_v54  ;;  %v2999_v54 = vpop.eup %2998  ;;  %v980_v30 = vsub.f32 0.0, %v937_v8 }
 0x1e6   :  { %v3001_v1 = vpop.eup %3000  ;;  %v941_v10 = vmul.f32 0.6931472, %v2999_v54 }
 0x1e9   :  { %v2783_v7 = vpop.f32.mrf.mxu1  ;;  %1059 = vmax.xlane.f32.xlu1 %v1058_v3 }
 0x1ea   :  { %v3911_v12 = vadd.f32 %v2783_v7, %v3782_v61  ;;  %v979_v7 = vsub.f32 0.0, %v935_v52 }
 0x1eb   :  { %v625_v14 = vpop.f32.mrf.mxu1 }
 0x1ec   :  { %v3914_v26 = vadd.f32 %v3782_v61, %v625_v14  ;;  %v3923_v36 = vadd.f32 %v974_v6, %v3911_v12 }
 0x1ed   :  { %v2784_v29 = vpop.f32.mrf.mxu1 }
 0x1ee   :  { %v3917_v31 = vadd.f32 %v2784_v29, %v3782_v61  ;;  %v3920_v32 = vadd.f32 %v972_v13, %v3914_v26  ;;  %v1067_v57 = vsel %vm1024_vm0, %v3923_v36, -inf  ;;  %v3003_v13 = vpop.eup %3002 }
 0x1ef   :  { %v628_v44 = vpop.f32.mrf.mxu1 }
 0x1f0   :  { %v3926_v42 = vadd.f32 %v3782_v61, %v628_v44  ;;  %v1061_v43 = vsel %vm1024_vm0, %v3920_v32, -inf  ;;  %v3939_v60 = vadd.f32 %v975_v41, %v3917_v31  ;;  %v939_v41 = vmul.f32 0.6931472, %v3001_v1 }
 0x1f1   :  { %v2787_v16 = vpop.f32.mrf.mxu1  ;;  %1062 = vmax.xlane.f32.xlu0 %v1061_v43  ;;  %v982_v44 = vsub.f32 0.0, %v941_v10  ;;  %v943_v43 = vmul.f32 0.6931472, %v3003_v13 }
 0x1f2   :  { %4803 = vst [vmem:[#allocation5_spill] sm:$0xff] %v3926_v42  ;;  %v3931_v58 = vadd.f32 %v2787_v16, %v3782_v61  ;;  %v3934_v59 = vadd.f32 %v973_v33, %v3926_v42  ;;  %v1070_v11 = vsel %vm1024_vm0, %v3939_v60, -inf }
 0x1f3   :  { %v641_v63 = vpop.f32.mrf.mxu1 }
 0x1f4   :  { %v3942_v3 = vadd.f32 %v3782_v61, %v641_v63  ;;  %v1064_v62 = vsel %vm1024_vm0, %v3934_v59, -inf  ;;  %v3955_v18 = vadd.f32 %v978_v50, %v3931_v58  ;;  %v981_v63 = vsub.f32 0.0, %v939_v41  ;;  %v728_v41 = vld [vmem:[%s4780_s1 + $0xc0] sm:$0xff] }
 0x1f5   :  { %v2788_v2 = vpop.f32.mrf.mxu1  ;;  %1065 = vmax.xlane.f32.xlu1 %v1064_v62  ;;  %1068 = vmax.xlane.f32.xlu0 %v1067_v57  ;;  %v983_v62 = vsub.f32 0.0, %v943_v43  ;;  %v730_v43 = vld [vmem:[%s4780_s1 + $0xd0] sm:$0xff] }
 0x1f6   :  { %4804 = vst [vmem:[#allocation6_spill] sm:$0xff] %v3942_v3  ;;  %v3947_v6 = vadd.f32 %v2788_v2, %v3782_v61  ;;  %v3952_v14 = vadd.f32 %v976_v24, %v3942_v3  ;;  %v1079_v24 = vsel %vm1024_vm0, %v3955_v18, -inf }
 0x1f7   :  { %v644_v29 = vpop.f32.mrf.mxu1 }
 0x1f8   :  { %4805 = vst [vmem:[#allocation7_spill] sm:$0xff] %v3947_v6  ;;  %v3958_v33 = vadd.f32 %v3782_v61, %v644_v29  ;;  %v1073_v20 = vsel %vm1024_vm0, %v3952_v14, -inf  ;;  %v3971_v34 = vadd.f32 %v979_v7, %v3947_v6 }
 0x1f9   :  { %v2791_v22 = vpop.f32.mrf.mxu1  ;;  %1071 = vmax.xlane.f32.xlu1 %v1070_v11  ;;  %1074 = vmax.xlane.f32.xlu0 %v1073_v20 }
 0x1fa   :  { %4806 = vst [vmem:[#allocation8_spill] sm:$0xff] %v3958_v33  ;;  %v3963_v9 = vadd.f32 %v2791_v22, %v3782_v61  ;;  %v3966_v16 = vadd.f32 %v977_v5, %v3958_v33  ;;  %v1082_v2 = vsel %vm1024_vm0, %v3971_v34, -inf }
 0x1fb   :  { %v657_v50 = vpop.f32.mrf.mxu1 }
 0x1fc   :  { %4807 = vst [vmem:[#allocation9_spill] sm:$0xff] %v3963_v9  ;;  %v3974_v52 = vadd.f32 %v3782_v61, %v657_v50  ;;  %v1076_v54 = vsel %vm1024_vm0, %v3966_v16, -inf  ;;  %v3987_v7 = vadd.f32 %v982_v44, %v3963_v9  ;;  %v760_v44 = vadd.f32 1e-20, %v728_v41 }
 0x1fd   :  { %v2792_v57 = vpop.f32.mrf.mxu1  ;;  %1077 = vmax.xlane.f32.xlu1 %v1076_v54  ;;  %1080 = vmax.xlane.f32.xlu0 %v1079_v24  ;;  %v729_v24 = vld [vmem:[%s4780_s1 + $0xc8] sm:$0xff]  ;;  %v762_v50 = vadd.f32 1e-20, %v730_v43 }
 0x1fe   :  { %4808 = vst [vmem:[#allocation10_spill] sm:$0xff] %v3974_v52  ;;  %v3979_v1 = vadd.f32 %v2792_v57, %v3782_v61  ;;  %v3984_v5 = vadd.f32 %v980_v30, %v3974_v52  ;;  %v1091_v29 = vsel %vm1024_vm0, %v3987_v7, -inf  ;;  %3004 = vlog2.f32 %v760_v44  ;;  %v731_v57 = vld [vmem:[%s4780_s1 + $0xd8] sm:$0xff] }
 0x1ff   :  { %v660_v8 = vpop.f32.mrf.mxu1  ;;  %v761_v54 = vadd.f32 1e-20, %v729_v24  ;;  %3006 = vlog2.f32 %v762_v50 }
 0x200   :  { %4809 = vst [vmem:[#allocation11_spill] sm:$0xff] %v3979_v1  ;;  %v3990_v10 = vadd.f32 %v3782_v61, %v660_v8  ;;  %v1085_v13 = vsel %vm1024_vm0, %v3984_v5, -inf  ;;  %v4000_v20 = vadd.f32 %v983_v62, %v3979_v1 }
 0x201   :  { %1083 = vmax.xlane.f32.xlu1 %v1082_v2  ;;  %1086 = vmax.xlane.f32.xlu0 %v1085_v13  ;;  %3008 = vlog2.f32 %v761_v54  ;;  %v732_v13 = vld [vmem:[%s4780_s1 + $0xe0] sm:$0xff]  ;;  %v734_v54 = vld [vmem:[%s4780_s1 + $0xf0] sm:$0xff] }
 0x202   :  { %4810 = vst [vmem:[#allocation12_spill] sm:$0xff] %v3990_v10  ;;  %v3995_v11 = vadd.f32 %v981_v63, %v3990_v10  ;;  %v1094_v30 = vsel %vm1024_vm0, %v4000_v20, -inf  ;;  %v763_v63 = vadd.f32 1e-20, %v731_v57  ;;  %v764_v41 = vadd.f32 1e-20, %v732_v13 }
 0x203   :  { %v735_v57 = vld [vmem:[%s4780_s1 + $0xf8] sm:$0xff]  ;;  %v766_v10 = vadd.f32 1e-20, %v734_v54 }
 0x204   :  { %v1088_v22 = vsel %vm1024_vm0, %v3995_v11, -inf  ;;  %3010 = vlog2.f32 %v763_v63 }
 0x205   :  { %1089 = vmax.xlane.f32.xlu1 %v1088_v22  ;;  %1092 = vmax.xlane.f32.xlu0 %v1091_v29  ;;  %v733_v22 = vld [vmem:[%s4780_s1 + $0xe8] sm:$0xff]  ;;  %3012 = vlog2.f32 %v764_v41 }
 0x206   :  { %v765_v50 = vadd.f32 1e-20, %v733_v22 }
 0x208   :  { %3014 = vlog2.f32 %v765_v50 }
 0x209   :  { %1095 = vmax.xlane.f32.xlu1 %v1094_v30  ;;  %3016 = vlog2.f32 %v766_v10 }
 0x20b   :  { %v3005_v62 = vpop.eup %3004 }
 0x20c   :  { %v3007_v2 = vpop.eup %3006  ;;  %v817_v8 = vmul.f32 0.6931472, %v3005_v62 }
 0x20d   :  { %v821_v30 = vmul.f32 0.6931472, %v3007_v2  ;;  %v767_v2 = vadd.f32 1e-20, %v735_v57 }
 0x20e   :  { %v3009_v29 = vpop.eup %3008  ;;  %v856_v43 = vsub.f32 0.0, %v817_v8 }
 0x20f   :  { %v819_v24 = vmul.f32 0.6931472, %v3009_v29  ;;  %v858_v63 = vsub.f32 0.0, %v821_v30 }
 0x210   :  { %v888_v1 = vadd.f32 1e-20, %v856_v43 }
 0x211   :  { %v3011_v44 = vpop.eup %3010  ;;  %v857_v33 = vsub.f32 0.0, %v819_v24  ;;  %v890_v13 = vadd.f32 1e-20, %v858_v63  ;;  %v2795_v63 = vpop.f32.mrf.mxu1 }
 0x212   :  { %v823_v62 = vmul.f32 0.6931472, %v3011_v44  ;;  %3018 = vlog2.f32 %v888_v1  ;;  %v3013_v24 = vpop.eup %3012 }
 0x213   :  { %v889_v29 = vadd.f32 1e-20, %v857_v33  ;;  %3020 = vlog2.f32 %v767_v2 }
 0x214   :  { %v859_v8 = vsub.f32 0.0, %v823_v62  ;;  %3022 = vlog2.f32 %v890_v13 }
 0x215   :  { %3024 = vlog2.f32 %v889_v29  ;;  %v3015_v1 = vpop.eup %3014 }
 0x216   :  { %v891_v52 = vadd.f32 1e-20, %v859_v8  ;;  %v3017_v62 = vpop.eup %3016  ;;  %v827_v2 = vmul.f32 0.6931472, %v3015_v1 }
 0x217   :  { %v829_v29 = vmul.f32 0.6931472, %v3017_v62 }
 0x218   :  { %3026 = vlog2.f32 %v891_v52  ;;  %v673_v52 = vpop.f32.mrf.mxu1 }
 0x219   :  { %v4037_v1 = vadd.f32 %v3782_v61, %v673_v52  ;;  %v4046_v52 = vadd.f32 %v2795_v63, %v3782_v61 }
 0x21b   :  { %4811 = vst [vmem:[#allocation13_spill] sm:$0xff] %v4037_v1 }
 0x248   :  { %v1033_v22 = vpop.xlane.xlu1 %1032 }
 0x249   :  { %v1123_v6 = vsub.f32 %v3803_v27, %v1033_v22  ;;  %v825_v27 = vmul.f32 0.6931472, %v3013_v24 }
 0x24a   :  { %v1027_v30 = vpop.xlane.xlu0 %1026 }
 0x24b   :  { %v1157_v44 = vmul.f32 1.442695, %v1123_v6  ;;  %v1121_v41 = vsub.f32 %v3814_v51, %v1027_v30  ;;  %v3019_v51 = vpop.eup %3018  ;;  %v860_v8 = vsub.f32 0.0, %v825_v27 }
 0x24c   :  { %v1036_v43 = vpop.xlane.xlu1 %1035  ;;  %v3021_v13 = vpop.eup %3020 }
 0x24d   :  { %3028 = vpow2.f32 %v1157_v44  ;;  %v1153_v50 = vmul.f32 1.442695, %v1121_v41  ;;  %v1124_v10 = vsub.f32 %v3825_v40, %v1036_v43  ;;  %v3023_v22 = vpop.eup %3022  ;;  %v861_v40 = vsub.f32 0.0, %v827_v2  ;;  %v2796_v43 = vpop.f32.mrf.mxu1 }
 0x24e   :  { %v1030_v33 = vpop.xlane.xlu0 %1029  ;;  %v3025_v30 = vpop.eup %3024  ;;  %v945_v44 = vmul.f32 0.6931472, %v3019_v51  ;;  %v831_v41 = vmul.f32 0.6931472, %v3021_v13  ;;  %v949_v24 = vmul.f32 0.6931472, %v3023_v22 }
 0x24f   :  { %3030 = vpow2.f32 %v1153_v50  ;;  %v1159_v54 = vmul.f32 1.442695, %v1124_v10  ;;  %v1122_v57 = vsub.f32 %v3833_v47, %v1030_v33  ;;  %v892_v50 = vadd.f32 1e-20, %v860_v8  ;;  %v3027_v10 = vpop.eup %3026  ;;  %v676_v13 = vpop.f32.mrf.mxu1 }
 0x250   :  { %v862_v47 = vsub.f32 0.0, %v829_v29  ;;  %v947_v33 = vmul.f32 0.6931472, %v3025_v30  ;;  %v984_v27 = vsub.f32 0.0, %v945_v44  ;;  %v863_v62 = vsub.f32 0.0, %v831_v41 }
 0x251   :  { %3032 = vpow2.f32 %v1159_v54  ;;  %v1155_v6 = vmul.f32 1.442695, %v1122_v57  ;;  %v893_v54 = vadd.f32 1e-20, %v861_v40  ;;  %v986_v29 = vsub.f32 0.0, %v949_v24 }
 0x252   :  { %v894_v8 = vadd.f32 1e-20, %v862_v47  ;;  %v985_v22 = vsub.f32 0.0, %v947_v33  ;;  %v951_v40 = vmul.f32 0.6931472, %v3027_v10  ;;  %v4050_v42 = vadd.f32 %v984_v27, %v4037_v1 }
 0x253   :  { %3034 = vpow2.f32 %v1155_v6  ;;  %v895_v3 = vadd.f32 1e-20, %v863_v62 }
 0x254   :  { %3036 = vlog2.f32 %v892_v50  ;;  %v4053_v50 = vadd.f32 %v3782_v61, %v676_v13 }
 0x255   :  { %3038 = vlog2.f32 %v893_v54  ;;  %v987_v54 = vsub.f32 0.0, %v951_v40  ;;  %v2799_v40 = vpop.f32.mrf.mxu1 }
 0x256   :  { %4812 = vst [vmem:[#allocation14_spill] sm:$0xff] %v4053_v50  ;;  %3040 = vlog2.f32 %v894_v8 }
 0x257   :  { %3042 = vlog2.f32 %v895_v3 }
 0x25a   :  { %v4034_v57 = vpop.eup %3028  ;;  %v1039_v6 = vpop.xlane.xlu0 %1038 }
 0x25b   :  { %v1223_v2 = vsel %vm1024_vm0, %v4034_v57, 0.0  ;;  %v1125_v44 = vsub.f32 %v3853_v23, %v1039_v6  ;;  %v4064_v6 = vadd.f32 %v2796_v43, %v3782_v61 }
 0x25c   :  { %v4041_v51 = vpop.eup %3030  ;;  %1224 = vadd.xlane.f32.xlu0 %v1223_v2  ;;  %v1097_v2 = vsel %vm1024_vm0, %v4050_v42, -inf }
 0x25d   :  { %v1217_v63 = vsel %vm1024_vm0, %v4041_v51, 0.0  ;;  %4813 = vst [vmem:[#allocation15_spill] sm:$0xff] %v4064_v6  ;;  %v1161_v27 = vmul.f32 1.442695, %v1125_v44  ;;  %v689_v44 = vpop.f32.mrf.mxu1 }
 0x25e   :  { %v4043_v30 = vpop.eup %3032  ;;  %v1042_v41 = vpop.xlane.xlu1 %1041 }
 0x25f   :  { %v1045_v9 = vpop.xlane.xlu0 %1044  ;;  %v1226_v10 = vsel %vm1024_vm0, %v4043_v30, 0.0  ;;  %v1126_v23 = vsub.f32 %v3867_v46, %v1042_v41  ;;  %v4075_v46 = vadd.f32 %v985_v22, %v4053_v50  ;;  %v4092_v50 = vadd.f32 %v3782_v61, %v689_v44 }
 0x260   :  { %v1127_v47 = vsub.f32 %v3864_v4, %v1045_v9  ;;  %v4060_v24 = vpop.eup %3034  ;;  %1227 = vadd.xlane.f32.xlu1 %v1226_v10  ;;  %1218 = vadd.xlane.f32.xlu0 %v1217_v63  ;;  %v4067_v9 = vadd.f32 %v986_v29, %v4046_v52  ;;  %v4082_v29 = vadd.f32 %v987_v54, %v4064_v6 }
 0x261   :  { %v1220_v13 = vsel %vm1024_vm0, %v4060_v24, 0.0  ;;  %v1163_v43 = vmul.f32 1.442695, %v1126_v23  ;;  %v1100_v3 = vsel %vm1024_vm0, %v4075_v46, -inf  ;;  %v3037_v22 = vpop.eup %3036  ;;  %4814 = vst [vmem:[#allocation16_spill] sm:$0xff] %v4092_v50 }
 0x262   :  { %v1165_v33 = vmul.f32 1.442695, %v1127_v47  ;;  %v1048_v4 = vpop.xlane.xlu1 %1047  ;;  %v3039_v41 = vpop.eup %3038  ;;  %v1106_v63 = vsel %vm1024_vm0, %v4082_v29, -inf }
 0x263   :  { %v1128_v62 = vsub.f32 %v3874_v53, %v1048_v4  ;;  %v1103_v53 = vsel %vm1024_vm0, %v4067_v9, -inf  ;;  %v3041_v23 = vpop.eup %3040 }
 0x264   :  { %3044 = vpow2.f32 %v1165_v33  ;;  %1098 = vmax.xlane.f32.xlu0 %v1097_v2  ;;  %1221 = vadd.xlane.f32.xlu1 %v1220_v13  ;;  %v2800_v33 = vpop.f32.mrf.mxu1  ;;  %v3043_v2 = vpop.eup %3042 }
 0x265   :  { %v1167_v8 = vmul.f32 1.442695, %v1128_v62  ;;  %3046 = vpow2.f32 %v1161_v27  ;;  %v953_v27 = vmul.f32 0.6931472, %v3037_v22 }
 0x267   :  { %3048 = vpow2.f32 %v1167_v8  ;;  %v955_v8 = vmul.f32 0.6931472, %v3039_v41 }
 0x268   :  { %1104 = vmax.xlane.f32.xlu0 %v1103_v53  ;;  %1101 = vmax.xlane.f32.xlu1 %v1100_v3  ;;  %3050 = vpow2.f32 %v1163_v43  ;;  %v957_v53 = vmul.f32 0.6931472, %v3041_v23 }
 0x269   :  { %v989_v41 = vsub.f32 0.0, %v955_v8  ;;  %v4120_v8 = vadd.f32 %v2800_v33, %v3782_v61  ;;  %v2883_v33 = vld [vmem:[%s4783_s4] sm:$0xff]  }
 0x26a   :  { %v1051_v47 = vpop.xlane.xlu0 %1050  ;;  %v990_v23 = vsub.f32 0.0, %v957_v53 }
 0x26b   :  { %v1129_v10 = vsub.f32 %v3888_v37, %v1051_v47  ;;  %v988_v47 = vsub.f32 0.0, %v953_v27  ;;  %v959_v27 = vmul.f32 0.6931472, %v3043_v2  ;;  %4817 = vst [vmem:[#allocation19_spill] sm:$0xff] %v4120_v8 }
 0x26c   :  { %1107 = vmax.xlane.f32.xlu1 %v1106_v63  ;;  %v692_v63 = vpop.f32.mrf.mxu1 }
 0x26d   :  { %v1169_v4 = vmul.f32 1.442695, %v1129_v10  ;;  %v4102_v44 = vadd.f32 %v3782_v61, %v692_v63  ;;  %v991_v2 = vsub.f32 0.0, %v959_v27 }
 0x26e   :  { %v1054_v62 = vpop.xlane.xlu1 %1053  ;;  %v1057_v54 = vpop.xlane.xlu0 %1056 }
 0x26f   :  { %v1130_v13 = vsub.f32 %v3899_v45, %v1054_v62  ;;  %v1131_v43 = vsub.f32 %v3891_v39, %v1057_v54  ;;  %3052 = vpow2.f32 %v1169_v4  ;;  %4815 = vst [vmem:[#allocation17_spill] sm:$0xff] %v4102_v44  ;;  %v4125_v53 = vadd.f32 %v989_v41, %v4102_v44 }
 0x271   :  { %v4089_v3 = vpop.eup %3044  ;;  %v1171_v37 = vmul.f32 1.442695, %v1130_v13  ;;  %v1173_v22 = vmul.f32 1.442695, %v1131_v43  ;;  %v4109_v13 = vadd.f32 %v2799_v40, %v3782_v61  ;;  %v2882_v43 = vld [vmem:[%s4783_s4 + $0x8] sm:$0xff]  }
 0x272   :  { %v1060_v10 = vpop.xlane.xlu1 %1059  ;;  %v1235_v1 = vsel %vm1024_vm0, %v4089_v3, 0.0  ;;  %v4096_v6 = vpop.eup %3046  ;;  %2801 = vmatprep.subr.bf16.mxu1 %v2882_v43 }
 0x273   :  { %v1132_v39 = vsub.f32 %v3904_v55, %v1060_v10  ;;  %1236 = vadd.xlane.f32.xlu0 %v1235_v1  ;;  %3054 = vpow2.f32 %v1171_v37  ;;  %4816 = vst [vmem:[#allocation18_spill] sm:$0xff] %v4109_v13  ;;  %v1229_v55 = vsel %vm1024_vm0, %v4096_v6, 0.0  ;;  %v4114_v1 = vadd.f32 %v988_v47, %v4092_v50  ;;  %2802 = vmatpush3.bf16.msra.mxu1 %v2882_v43 }
 0x274   :  { %v4099_v45 = vpop.eup %3048  ;;  %3056 = vpow2.f32 %v1173_v22  ;;  %v4130_v63 = vadd.f32 %v990_v23, %v4109_v13  ;;  %v1112_v10 = vsel %vm1024_vm0, %v4125_v53, -inf  ;;  %2803 = vmatprep.subr.bf16.mxu1 %v2883_v33 }
 0x275   :  { %v1175_v4 = vmul.f32 1.442695, %v1132_v39  ;;  %v1238_v62 = vsel %vm1024_vm0, %v4099_v45, 0.0  ;;  %v4106_v54 = vpop.eup %3050  ;;  %v1109_v37 = vsel %vm1024_vm0, %v4114_v1, -inf  ;;  %v4139_v39 = vadd.f32 %v991_v2, %v4120_v8 }
 0x276   :  { %1239 = vadd.xlane.f32.xlu1 %v1238_v62  ;;  %v1232_v40 = vsel %vm1024_vm0, %v4106_v54, 0.0  ;;  %v1115_v23 = vsel %vm1024_vm0, %v4130_v63, -inf }
 0x277   :  { %1230 = vadd.xlane.f32.xlu0 %v1229_v55  ;;  %3058 = vpow2.f32 %v1175_v4  ;;  %2804 = vmatpush3.bf16.msra.mxu1 %v2883_v33  ;;  %v1118_v2 = vsel %vm1024_vm0, %v4139_v39, -inf }
 0x27a   :  { %1233 = vadd.xlane.f32.xlu1 %v1232_v40  ;;  %v1063_v47 = vpop.xlane.xlu0 %1062 }
 0x27b   :  { %1110 = vmax.xlane.f32.xlu0 %v1109_v37  ;;  %v1133_v61 = vsub.f32 %v3920_v32, %v1063_v47 }
 0x27c   :  { %v4143_v32 = vpop.eup %3052 }
 0x27d   :  { %v1177_v22 = vmul.f32 1.442695, %v1133_v61  ;;  %v1241_v47 = vsel %vm1024_vm0, %v4143_v32, 0.0 }
 0x27e   :  { %v1066_v41 = vpop.xlane.xlu1 %1065  ;;  %1113 = vmax.xlane.f32.xlu1 %v1112_v10  ;;  %v1069_v27 = vpop.xlane.xlu0 %1068 }
 0x27f   :  { %3060 = vpow2.f32 %v1177_v22  ;;  %v1134_v4 = vsub.f32 %v3934_v59, %v1066_v41  ;;  %1116 = vmax.xlane.f32.xlu0 %v1115_v23  ;;  %v1135_v62 = vsub.f32 %v3923_v36, %v1069_v27 }
 0x280   :  { %v4149_v40 = vpop.eup %3054 }
 0x281   :  { %v1179_v55 = vmul.f32 1.442695, %v1134_v4  ;;  %v1181_v43 = vmul.f32 1.442695, %v1135_v62  ;;  %v4153_v22 = vpop.eup %3056  ;;  %v1244_v41 = vsel %vm1024_vm0, %v4149_v40, 0.0 }
 0x282   :  { %v1072_v37 = vpop.xlane.xlu1 %1071  ;;  %1119 = vmax.xlane.f32.xlu1 %v1118_v2  ;;  %v1075_v61 = vpop.xlane.xlu0 %1074  ;;  %v1247_v4 = vsel %vm1024_vm0, %v4153_v22, 0.0 }
 0x283   :  { %3062 = vpow2.f32 %v1179_v55  ;;  %v1136_v59 = vsub.f32 %v3939_v60, %v1072_v37  ;;  %1242 = vadd.xlane.f32.xlu0 %v1241_v47  ;;  %v1137_v36 = vsub.f32 %v3952_v14, %v1075_v61 }
 0x284   :  { %3064 = vpow2.f32 %v1181_v43  ;;  %v4159_v23 = vpop.eup %3058 }
 0x285   :  { %v1183_v33 = vmul.f32 1.442695, %v1136_v59  ;;  %v1185_v10 = vmul.f32 1.442695, %v1137_v36  ;;  %v1250_v2 = vsel %vm1024_vm0, %v4159_v23, 0.0 }
 0x286   :  { %v1078_v27 = vpop.xlane.xlu1 %1077  ;;  %1245 = vadd.xlane.f32.xlu1 %v1244_v41  ;;  %v1081_v62 = vpop.xlane.xlu0 %1080 }
 0x287   :  { %3066 = vpow2.f32 %v1183_v33  ;;  %v1138_v60 = vsub.f32 %v3966_v16, %v1078_v27  ;;  %1248 = vadd.xlane.f32.xlu0 %v1247_v4  ;;  %v1139_v14 = vsub.f32 %v3955_v18, %v1081_v62 }
 0x288   :  { %3068 = vpow2.f32 %v1185_v10 }
 0x289   :  { %v1187_v55 = vmul.f32 1.442695, %v1138_v60  ;;  %v1189_v43 = vmul.f32 1.442695, %v1139_v14 }
 0x28a   :  { %v1084_v37 = vpop.xlane.xlu1 %1083  ;;  %1251 = vadd.xlane.f32.xlu1 %v1250_v2  ;;  %v1087_v47 = vpop.xlane.xlu0 %1086 }
 0x28b   :  { %3070 = vpow2.f32 %v1187_v55  ;;  %v1140_v61 = vsub.f32 %v3971_v34, %v1084_v37  ;;  %v1141_v59 = vsub.f32 %v3984_v5, %v1087_v47 }
 0x28c   :  { %v4169_v36 = vpop.eup %3060  ;;  %3072 = vpow2.f32 %v1189_v43 }
 0x28d   :  { %v1191_v16 = vmul.f32 1.442695, %v1140_v61  ;;  %v1193_v33 = vmul.f32 1.442695, %v1141_v59  ;;  %v1253_v18 = vsel %vm1024_vm0, %v4169_v36, 0.0 }
 0x28e   :  { %v1090_v10 = vpop.xlane.xlu1 %1089  ;;  %1254 = vadd.xlane.f32.xlu0 %v1253_v18  ;;  %v1093_v41 = vpop.xlane.xlu0 %1092 }
 0x28f   :  { %3074 = vpow2.f32 %v1191_v16  ;;  %v1142_v27 = vsub.f32 %v3995_v11, %v1090_v10  ;;  %v1143_v4 = vsub.f32 %v3987_v7, %v1093_v41 }
 0x290   :  { %v4175_v62 = vpop.eup %3062  ;;  %3076 = vpow2.f32 %v1193_v33 }
 0x291   :  { %v4177_v34 = vpop.eup %3064  ;;  %v1195_v5 = vmul.f32 1.442695, %v1142_v27  ;;  %v1197_v60 = vmul.f32 1.442695, %v1143_v4  ;;  %v1256_v14 = vsel %vm1024_vm0, %v4175_v62, 0.0 }
 0x292   :  { %v1096_v55 = vpop.xlane.xlu1 %1095  ;;  %1257 = vadd.xlane.f32.xlu1 %v1256_v14  ;;  %v1259_v43 = vsel %vm1024_vm0, %v4177_v34, 0.0 }
 0x293   :  { %3078 = vpow2.f32 %v1195_v5  ;;  %v1144_v11 = vsub.f32 %v4000_v20, %v1096_v55  ;;  %1260 = vadd.xlane.f32.xlu0 %v1259_v43 }
 0x294   :  { %v4184_v7 = vpop.eup %3066  ;;  %3080 = vpow2.f32 %v1197_v60 }
 0x295   :  { %v4186_v2 = vpop.eup %3068  ;;  %v1199_v37 = vmul.f32 1.442695, %v1144_v11  ;;  %v1262_v47 = vsel %vm1024_vm0, %v4184_v7, 0.0 }
 0x296   :  { %1263 = vadd.xlane.f32.xlu1 %v1262_v47  ;;  %v1265_v61 = vsel %vm1024_vm0, %v4186_v2, 0.0 }
 0x297   :  { %3082 = vpow2.f32 %v1199_v37  ;;  %1266 = vadd.xlane.f32.xlu0 %v1265_v61 }
 0x298   :  { %v4192_v59 = vpop.eup %3070 }
 0x299   :  { %v4194_v16 = vpop.eup %3072  ;;  %v1268_v20 = vsel %vm1024_vm0, %v4192_v59, 0.0 }
 0x29a   :  { %1269 = vadd.xlane.f32.xlu1 %v1268_v20  ;;  %v1271_v33 = vsel %vm1024_vm0, %v4194_v16, 0.0 }
 0x29b   :  { %1272 = vadd.xlane.f32.xlu0 %v1271_v33 }
 0x29c   :  { %v4200_v18 = vpop.eup %3074 }
 0x29d   :  { %v4202_v10 = vpop.eup %3076  ;;  %v1274_v41 = vsel %vm1024_vm0, %v4200_v18, 0.0 }
 0x29e   :  { %1275 = vadd.xlane.f32.xlu1 %v1274_v41  ;;  %v1277_v27 = vsel %vm1024_vm0, %v4202_v10, 0.0 }
 0x29f   :  { %1278 = vadd.xlane.f32.xlu0 %v1277_v27 }
 0x2a0   :  { %v4208_v4 = vpop.eup %3078 }
 0x2a1   :  { %v4210_v5 = vpop.eup %3080  ;;  %v1280_v60 = vsel %vm1024_vm0, %v4208_v4, 0.0 }
 0x2a2   :  { %1281 = vadd.xlane.f32.xlu1 %v1280_v60  ;;  %v1283_v14 = vsel %vm1024_vm0, %v4210_v5, 0.0 }
 0x2a3   :  { %1284 = vadd.xlane.f32.xlu0 %v1283_v14 }
 0x2a4   :  { %v4216_v55 = vpop.eup %3082 }
 0x2a5   :  { %v1286_v43 = vsel %vm1024_vm0, %v4216_v55, 0.0 }
 0x2a6   :  { %1287 = vadd.xlane.f32.xlu1 %v1286_v43 }
 0x2e5   :  { %v1225_v11 = vpop.xlane.xlu0 %1224 }
 0x2e9   :  { %v1228_v37 = vpop.xlane.xlu1 %1227  ;;  %v1219_v47 = vpop.xlane.xlu0 %1218 }
 0x2ea   :  { %3084 = vrcp.f32 %v1228_v37 }
 0x2eb   :  { %3086 = vrcp.f32 %v1219_v47 }
 0x2ec   :  { %3088 = vrcp.f32 %v1225_v11 }
 0x2ed   :  { %v1222_v61 = vpop.xlane.xlu1 %1221  ;;  %v1099_v20 = vpop.xlane.xlu0 %1098 }
 0x2ee   :  { %3090 = vrcp.f32 %v1222_v61  ;;  %v1145_v33 = vsub.f32 %v4050_v42, %v1099_v20 }
 0x2f0   :  { %v1201_v41 = vmul.f32 1.442695, %v1145_v33 }
 0x2f1   :  { %v1102_v27 = vpop.xlane.xlu1 %1101  ;;  %v1105_v60 = vpop.xlane.xlu0 %1104 }
 0x2f2   :  { %3092 = vpow2.f32 %v1201_v41  ;;  %v1146_v14 = vsub.f32 %v4075_v46, %v1102_v27  ;;  %v1147_v8 = vsub.f32 %v4067_v9, %v1105_v60 }
 0x2f4   :  { %v1203_v43 = vmul.f32 1.442695, %v1146_v14  ;;  %v1205_v13 = vmul.f32 1.442695, %v1147_v8 }
 0x2f5   :  { %v1108_v44 = vpop.xlane.xlu1 %1107 }
 0x2f6   :  { %3094 = vpow2.f32 %v1203_v43  ;;  %v1148_v37 = vsub.f32 %v4082_v29, %v1108_v44 }
 0x2f7   :  { %3096 = vpow2.f32 %v1205_v13  ;;  %v3085_v11 = vpop.eup %3084 }
 0x2f8   :  { %v1207_v47 = vmul.f32 1.442695, %v1148_v37  ;;  %v3087_v61 = vpop.eup %3086  ;;  %v4225_v20 = vmul.f32 %v3085_v11, %v4043_v30 }
 0x2f9   :  { %v3089_v50 = vpop.eup %3088  ;;  %v4228_v46 = vmul.f32 %v3087_v61, %v4041_v51 }
 0x2fa   :  { %3098 = vpow2.f32 %v1207_v47  ;;  %v4234_v8 = vmul.f32 %v3089_v50, %v4034_v57 }
 0x2fb   :  { %v3091_v42 = vpop.eup %3090 }
 0x2fc   :  { %v1237_v33 = vpop.xlane.xlu0 %1236  ;;  %v4231_v9 = vmul.f32 %v3091_v42, %v4060_v24  ;;  %v1378_v13 = vpack.c.bf16 %v4225_v20, %v4234_v8 }
 0x2fe   :  { %v1377_v29 = vpack.c.bf16 %v4231_v9, %v4228_v46 }
 0x2ff   :  { %v4238_v44 = vpop.eup %3092  ;;  %v1240_v30 = vpop.xlane.xlu1 %1239 }
 0x300   :  { %v1231_v41 = vpop.xlane.xlu0 %1230  ;;  %2805 = vmatprep.mubr.msk.bf16.mxu1 %vm1024_vm0, %v1377_v29  ;;  %v1289_v51 = vsel %vm1024_vm0, %v4238_v44, 0.0  ;;  %3100 = vrcp.f32 %v1240_v30 }
 0x301   :  { %2806 = vmatmul.mubr.msk.bf16.vlgmr.msra.gmra.mxu1 %vm1024_vm0, %v1378_v13  ;;  %1290 = vadd.xlane.f32.xlu0 %v1289_v51  ;;  %3102 = vrcp.f32 %v1231_v41 }
 0x302   :  { %3104 = vrcp.f32 %v1237_v33 }
 0x303   :  { %v4246_v57 = vpop.eup %3094  ;;  %v1234_v50 = vpop.xlane.xlu1 %1233 }
 0x304   :  { %v4248_v24 = vpop.eup %3096  ;;  %3106 = vrcp.f32 %v1234_v50  ;;  %v1111_v27 = vpop.xlane.xlu0 %1110  ;;  %v1292_v60 = vsel %vm1024_vm0, %v4246_v57, 0.0 }
 0x305   :  { %v1149_v14 = vsub.f32 %v4114_v1, %v1111_v27  ;;  %1293 = vadd.xlane.f32.xlu1 %v1292_v60  ;;  %v1295_v43 = vsel %vm1024_vm0, %v4248_v24, 0.0 }
 0x306   :  { %1296 = vadd.xlane.f32.xlu0 %v1295_v43 }
 0x307   :  { %v4255_v37 = vpop.eup %3098  ;;  %v1209_v11 = vmul.f32 1.442695, %v1149_v14  ;;  %v1114_v47 = vpop.xlane.xlu1 %1113 }
 0x308   :  { %v1150_v61 = vsub.f32 %v4125_v53, %v1114_v47  ;;  %v1117_v42 = vpop.xlane.xlu0 %1116  ;;  %v1298_v33 = vsel %vm1024_vm0, %v4255_v37, 0.0 }
 0x309   :  { %3108 = vpow2.f32 %v1209_v11  ;;  %v1151_v29 = vsub.f32 %v4130_v63, %v1117_v42  ;;  %1299 = vadd.xlane.f32.xlu1 %v1298_v33 }
 0x30a   :  { %v1211_v1 = vmul.f32 1.442695, %v1150_v61 }
 0x30b   :  { %v1213_v13 = vmul.f32 1.442695, %v1151_v29  ;;  %v1120_v30 = vpop.xlane.xlu1 %1119 }
 0x30c   :  { %3110 = vpow2.f32 %v1211_v1  ;;  %v1152_v41 = vsub.f32 %v4139_v39, %v1120_v30  ;;  %v1243_v51 = vpop.xlane.xlu0 %1242 }
 0x30d   :  { %3112 = vpow2.f32 %v1213_v13  ;;  %v3101_v50 = vpop.eup %3100 }
 0x30e   :  { %v1215_v27 = vmul.f32 1.442695, %v1152_v41  ;;  %v3103_v60 = vpop.eup %3102  ;;  %3114 = vrcp.f32 %v1243_v51  ;;  %v4263_v63 = vmul.f32 %v3101_v50, %v4099_v45 }
 0x30f   :  { %v1246_v53 = vpop.xlane.xlu1 %1245  ;;  %v3105_v14 = vpop.eup %3104  ;;  %v4266_v47 = vmul.f32 %v3103_v60, %v4096_v6 }
 0x310   :  { %3116 = vpow2.f32 %v1215_v27  ;;  %v1249_v43 = vpop.xlane.xlu0 %1248  ;;  %v4272_v42 = vmul.f32 %v3105_v14, %v4089_v3 }
 0x311   :  { %v3107_v11 = vpop.eup %3106  ;;  %3118 = vrcp.f32 %v1246_v53 }
 0x312   :  { %3120 = vrcp.f32 %v1249_v43  ;;  %v4269_v39 = vmul.f32 %v3107_v11, %v4106_v54  ;;  %v1380_v29 = vpack.c.bf16 %v4263_v63, %v4272_v42 }
 0x313   :  { %v1252_v61 = vpop.xlane.xlu1 %1251 }
 0x314   :  { %3122 = vrcp.f32 %v1252_v61  ;;  %v1379_v33 = vpack.c.bf16 %v4269_v39, %v4266_v47 }
 0x316   :  { %v4278_v45 = vpop.eup %3108  ;;  %2809 = vmatprep.mubr.msk.bf16.mxu1 %vm1024_vm0, %v1379_v33 }
 0x317   :  { %2810 = vmatmul.mubr.msk.bf16.gmra.mxu1 %vm1024_vm0, %v1380_v29  ;;  %v1301_v6 = vsel %vm1024_vm0, %v4278_v45, 0.0  ;;  %v1255_v54 = vpop.xlane.xlu0 %1254 }
 0x318   :  { %1302 = vadd.xlane.f32.xlu0 %v1301_v6  ;;  %3124 = vrcp.f32 %v1255_v54 }
 0x319   :  { %v4284_v3 = vpop.eup %3110 }
 0x31a   :  { %v4286_v1 = vpop.eup %3112  ;;  %v1304_v13 = vsel %vm1024_vm0, %v4284_v3, 0.0 }
 0x31b   :  { %1305 = vadd.xlane.f32.xlu1 %v1304_v13  ;;  %v1258_v30 = vpop.xlane.xlu1 %1257  ;;  %v1307_v41 = vsel %vm1024_vm0, %v4286_v1, 0.0  ;;  %v3115_v51 = vpop.eup %3114 }
 0x31c   :  { %3126 = vrcp.f32 %v1258_v30  ;;  %1308 = vadd.xlane.f32.xlu0 %v1307_v41  ;;  %v1261_v50 = vpop.xlane.xlu0 %1260  ;;  %v4297_v11 = vmul.f32 %v3115_v51, %v4143_v32 }
 0x31d   :  { %v4292_v27 = vpop.eup %3116  ;;  %3128 = vrcp.f32 %v1261_v50 }
 0x31e   :  { %v3119_v60 = vpop.eup %3118  ;;  %v1310_v53 = vsel %vm1024_vm0, %v4292_v27, 0.0 }
 0x31f   :  { %v3121_v14 = vpop.eup %3120  ;;  %1311 = vadd.xlane.f32.xlu1 %v1310_v53  ;;  %v1264_v43 = vpop.xlane.xlu1 %1263  ;;  %v4300_v61 = vmul.f32 %v3119_v60, %v4149_v40 }
 0x320   :  { %3130 = vrcp.f32 %v1264_v43  ;;  %v1267_v33 = vpop.xlane.xlu0 %1266  ;;  %v4305_v54 = vmul.f32 %v3121_v14, %v4153_v22 }
 0x321   :  { %v3123_v29 = vpop.eup %3122  ;;  %v1381_v6 = vpack.c.bf16 %v4300_v61, %v4297_v11  ;;  %3132 = vrcp.f32 %v1267_v33 }
 0x322   :  { %v4308_v13 = vmul.f32 %v3123_v29, %v4159_v23 }
 0x323   :  { %2813 = vmatprep.mubr.msk.bf16.mxu1 %vm1024_vm0, %v1381_v6  ;;  %v1270_v32 = vpop.xlane.xlu1 %1269 }
 0x324   :  { %3134 = vrcp.f32 %v1270_v32  ;;  %v1273_v30 = vpop.xlane.xlu0 %1272  ;;  %v1382_v40 = vpack.c.bf16 %v4308_v13, %v4305_v54 }
 0x325   :  { %3136 = vrcp.f32 %v1273_v30  ;;  %v3125_v41 = vpop.eup %3124 }
 0x326   :  { %2814 = vmatmul.mubr.msk.bf16.gmra.mxu1 %vm1024_vm0, %v1382_v40  ;;  %v4315_v23 = vmul.f32 %v3125_v41, %v4169_v36  ;;  %v2884_v40 = vld [vmem:[%s4784_s5 + $0x70] ss:$8 sps:$4 sm:$0xff]  }
 0x327   :  { %v1276_v51 = vpop.xlane.xlu1 %1275 }
 0x328   :  { %3138 = vrcp.f32 %v1276_v51  ;;  %v1279_v50 = vpop.xlane.xlu0 %1278 }
 0x329   :  { %v3127_v22 = vpop.eup %3126  ;;  %3140 = vrcp.f32 %v1279_v50 }
 0x32a   :  { %v4318_v60 = vmul.f32 %v3127_v22, %v4175_v62  ;;  %v3129_v53 = vpop.eup %3128  ;;  %v2886_v62 = vld [vmem:[%s4784_s5 + $0x74] ss:$8 sps:$4 sm:$0xff]   ;;  %v2887_v22 = vld [vmem:[%s4784_s5 + $0x60] ss:$8 sps:$4 sm:$0xff]  }
 0x32b   :  { %v1282_v14 = vpop.xlane.xlu1 %1281  ;;  %v4324_v6 = vmul.f32 %v3129_v53, %v4177_v34  ;;  %1779 = vmatprep.subr.bf16.mxu0 %v2886_v62 }
 0x32c   :  { %3142 = vrcp.f32 %v1282_v14  ;;  %v1285_v43 = vpop.xlane.xlu0 %1284  ;;  %v1383_v33 = vpack.c.bf16 %v4318_v60, %v4315_v23  ;;  %1780 = vmatpush1.bf16.msra.mxu0 %v2884_v40  ;;  %v2892_v14 = vld [vmem:[%s4784_s5 + $0x54] ss:$8 sps:$4 sm:$0xff]  }
 0x32d   :  { %v3131_v29 = vpop.eup %3130  ;;  %3144 = vrcp.f32 %v1285_v43  ;;  %v2890_v43 = vld [vmem:[%s4784_s5 + $0x50] ss:$8 sps:$4 sm:$0xff]  }
 0x32e   :  { %2817 = vmatprep.mubr.msk.bf16.mxu1 %vm1024_vm0, %v1383_v33  ;;  %v4327_v36 = vmul.f32 %v3131_v29, %v4184_v7  ;;  %v3133_v32 = vpop.eup %3132  ;;  %v2895_v29 = vld [vmem:[%s4784_s5 + $0x44] ss:$8 sps:$4 sm:$0xff]  }
 0x32f   :  { %v1288_v30 = vpop.xlane.xlu1 %1287  ;;  %v4343_v41 = vmul.f32 %v3133_v32, %v4186_v2 }
 0x330   :  { %3146 = vrcp.f32 %v1288_v30  ;;  %2328 = vrot.lane.b32.xlu1 %v4234_v8, %s3314_s20  ;;  %v1384_v34 = vpack.c.bf16 %v4327_v36, %v4324_v6  ;;  %v2889_v8 = vld [vmem:[%s4784_s5 + $0x64] ss:$8 sps:$4 sm:$0xff]   ;;  %v2898_v30 = vld [vmem:[%s4784_s5 + $0x34] ss:$8 sps:$4 sm:$0xff]  }
 0x331   :  { %v3135_v7 = vpop.eup %3134  ;;  %1781 = vmatprep.subr.bf16.mxu0 %v2889_v8 }
 0x332   :  { %2324 = vrot.lane.b32.xlu0 %v4228_v46, %s3314_s20  ;;  %2818 = vmatmul.mubr.msk.bf16.gmra.mxu1 %vm1024_vm0, %v1384_v34  ;;  %v4346_v51 = vmul.f32 %v3135_v7, %v4192_v59  ;;  %v3137_v50 = vpop.eup %3136 }
 0x333   :  { %1782 = vmatpush1.bf16.msra.mxu0 %v2887_v22  ;;  %v1350_v59 = vmul.f32 %v3137_v50, %v4194_v16 }
 0x334   :  { %2330 = vrot.lane.b32.xlu1 %v4225_v20, %s3314_s20  ;;  %v1385_v46 = vpack.c.bf16 %v4346_v51, %v4343_v41  ;;  %1783 = vmatprep.subr.bf16.mxu0 %v2892_v14 }
 0x335   :  { %v3139_v2 = vpop.eup %3138 }
 0x336   :  { %2336 = vrot.lane.b32.xlu0 %v4272_v42, %s3314_s20  ;;  %2821 = vmatprep.mubr.msk.bf16.mxu1 %vm1024_vm0, %v1385_v46  ;;  %v1352_v53 = vmul.f32 %v3139_v2, %v4200_v18  ;;  %v3141_v20 = vpop.eup %3140 }
 0x337   :  { %1784 = vmatpush1.bf16.msra.mxu0 %v2890_v43  ;;  %v1354_v16 = vmul.f32 %v3141_v20, %v4202_v10 }
 0x338   :  { %2326 = vrot.lane.b32.xlu1 %v4231_v9, %s3314_s20  ;;  %v1386_v33 = vpack.c.bf16 %v1352_v53, %v1350_v59  ;;  %v2893_v9 = vld [vmem:[%s4784_s5 + $0x40] ss:$8 sps:$4 sm:$0xff]   ;;  %1785 = vmatprep.subr.bf16.mxu0 %v2895_v29 }
 0x339   :  { %v3143_v42 = vpop.eup %3142 }
 0x33a   :  { %2332 = vrot.lane.b32.xlu0 %v4266_v47, %s3314_s20  ;;  %2822 = vmatmul.mubr.msk.bf16.gmra.mxu1 %vm1024_vm0, %v1386_v33  ;;  %v1356_v18 = vmul.f32 %v3143_v42, %v4208_v4  ;;  %v3145_v62 = vpop.eup %3144 }
 0x33b   :  { %1786 = vmatpush1.bf16.msra.mxu0 %v2893_v9  ;;  %v1358_v10 = vmul.f32 %v3145_v62, %v4210_v5  ;;  %v2901_v5 = vld [vmem:[%s4784_s5 + $0x24] ss:$8 sps:$4 sm:$0xff]  }
 0x33c   :  { %2338 = vrot.lane.b32.xlu1 %v4263_v63, %s3314_s20  ;;  %v1387_v32 = vpack.c.bf16 %v1356_v18, %v1354_v16  ;;  %v2896_v63 = vld [vmem:[%s4784_s5 + $0x30] ss:$8 sps:$4 sm:$0xff]   ;;  %1787 = vmatprep.subr.bf16.mxu0 %v2898_v30 }
 0x33d   :  { %v3147_v47 = vpop.eup %3146 }
 0x33e   :  { %2344 = vrot.lane.b32.xlu0 %v4305_v54, %s3314_s20  ;;  %2825 = vmatprep.mubr.msk.bf16.mxu1 %vm1024_vm0, %v1387_v32  ;;  %v1360_v4 = vmul.f32 %v3147_v47, %v4216_v55  ;;  %v2899_v55 = vld [vmem:[%s4784_s5 + $0x20] ss:$8 sps:$4 sm:$0xff]   ;;  %v2907_v54 = vld [vmem:[%s4784_s5 + $0x4] ss:$8 sps:$4 sm:$0xff]  }
 0x33f   :  { %1788 = vmatpush1.bf16.msra.mxu0 %v2896_v63 }
 0x340   :  { %2334 = vrot.lane.b32.xlu1 %v4269_v39, %s3314_s20  ;;  %v1388_v40 = vpack.c.bf16 %v1360_v4, %v1358_v10  ;;  %1789 = vmatprep.subr.bf16.mxu0 %v2901_v5  ;;  %v2904_v39 = vld [vmem:[%s4784_s5 + $0x14] ss:$8 sps:$4 sm:$0xff]  }
 0x342   :  { %2340 = vrot.lane.b32.xlu0 %v4297_v11, %s3314_s20  ;;  %2826 = vmatmul.mubr.msk.bf16.gmra.mxu1 %vm1024_vm0, %v1388_v40  ;;  %v2902_v11 = vld [vmem:[%s4784_s5 + $0x10] ss:$8 sps:$4 sm:$0xff]  }
 0x343   :  { %1790 = vmatpush1.bf16.msra.mxu0 %v2899_v55 }
 0x344   :  { %2346 = vrot.lane.b32.xlu1 %v4308_v13, %s3314_s20  ;;  %1791 = vmatprep.subr.bf16.mxu0 %v2904_v39  ;;  %v2905_v13 = vld [vmem:[%s4784_s5] ss:$8 sps:$4 sm:$0xff]  }
 0x346   :  { %2352 = vrot.lane.b32.xlu0 %v4324_v6, %s3314_s20 }
 0x347   :  { %1792 = vmatpush1.bf16.msra.mxu0 %v2902_v11 }
 0x348   :  { %2342 = vrot.lane.b32.xlu1 %v4300_v61, %s3314_s20  ;;  %1793 = vmatprep.subr.bf16.mxu0 %v2907_v54  ;;  %v3315_v61 = vmov 0  }
 0x349   :  { %1811 = vmatprep.mubr.bf16.mxu0 %v3315_v61 }
 0x34a   :  { %2348 = vrot.lane.b32.xlu0 %v4315_v23, %s3314_s20 }
 0x34b   :  { %1794 = vmatpush1.bf16.msra.mxu0 %v2905_v13 }
 0x34c   :  { %2354 = vrot.lane.b32.xlu1 %v4327_v36, %s3314_s20 }
 0x34e   :  { %2360 = vrot.lane.b32.xlu0 %v1350_v59, %s3314_s20 }
 0x350   :  { %2350 = vrot.lane.b32.xlu1 %v4318_v60, %s3314_s20 }
 0x352   :  { %2356 = vrot.lane.b32.xlu0 %v4343_v41, %s3314_s20 }
 0x354   :  { %2362 = vrot.lane.b32.xlu1 %v1352_v53, %s3314_s20 }
 0x356   :  { %2368 = vrot.lane.b32.xlu0 %v1358_v10, %s3314_s20 }
 0x358   :  { %2358 = vrot.lane.b32.xlu1 %v4346_v51, %s3314_s20 }
 0x35a   :  { %2364 = vrot.lane.b32.xlu0 %v1354_v16, %s3314_s20 }
 0x35c   :  { %2370 = vrot.lane.b32.xlu1 %v1360_v4, %s3314_s20 }
 0x360   :  { %2366 = vrot.lane.b32.xlu1 %v1356_v18, %s3314_s20 }
 0x38a   :  { %v1291_v23 = vpop.xlane.xlu0 %1290 }
 0x38b   :  { %3148 = vrcp.f32 %v1291_v23 }
 0x38e   :  { %v1294_v6 = vpop.xlane.xlu1 %1293 }
 0x38f   :  { %3150 = vrcp.f32 %v1294_v6  ;;  %v1297_v60 = vpop.xlane.xlu0 %1296 }
 0x390   :  { %3152 = vrcp.f32 %v1297_v60 }
 0x392   :  { %v1300_v36 = vpop.xlane.xlu1 %1299 }
 0x393   :  { %3154 = vrcp.f32 %v1300_v36 }
 0x398   :  { %v3149_v34 = vpop.eup %3148 }
 0x399   :  { %v1362_v8 = vmul.f32 %v3149_v34, %v4238_v44 }
 0x39c   :  { %v3151_v7 = vpop.eup %3150 }
 0x39d   :  { %v3153_v41 = vpop.eup %3152  ;;  %v1364_v51 = vmul.f32 %v3151_v7, %v4246_v57 }
 0x39e   :  { %v1366_v50 = vmul.f32 %v3153_v41, %v4248_v24 }
 0x39f   :  { %v1389_v22 = vpack.c.bf16 %v1364_v51, %v1362_v8 }
 0x3a0   :  { %v3155_v46 = vpop.eup %3154  ;;  %2376 = vrot.lane.b32.xlu0 %v1366_v50, %s3314_s20 }
 0x3a1   :  { %v1303_v2 = vpop.xlane.xlu0 %1302  ;;  %2829 = vmatprep.mubr.msk.bf16.mxu1 %vm1024_vm0, %v1389_v22  ;;  %v1368_v59 = vmul.f32 %v3155_v46, %v4255_v37 }
 0x3a2   :  { %3156 = vrcp.f32 %v1303_v2 }
 0x3a3   :  { %2378 = vrot.lane.b32.xlu1 %v1368_v59, %s3314_s20  ;;  %v1390_v53 = vpack.c.bf16 %v1368_v59, %v1366_v50 }
 0x3a4   :  { %2372 = vrot.lane.b32.xlu0 %v1362_v8, %s3314_s20  ;;  %v1306_v44 = vpop.xlane.xlu1 %1305 }
 0x3a5   :  { %3158 = vrcp.f32 %v1306_v44  ;;  %v1309_v57 = vpop.xlane.xlu0 %1308  ;;  %2830 = vmatmul.mubr.msk.bf16.gmra.mxu1 %vm1024_vm0, %v1390_v53 }
 0x3a6   :  { %3160 = vrcp.f32 %v1309_v57 }
 0x3a7   :  { %2374 = vrot.lane.b32.xlu1 %v1364_v51, %s3314_s20 }
 0x3a8   :  { %v1312_v24 = vpop.xlane.xlu1 %1311 }
 0x3a9   :  { %3162 = vrcp.f32 %v1312_v24  ;;  %v2325_v14 = vpop.permute.xlu0 %2324 }
 0x3aa   :  { %v2421_v37 = vsel %vm2420_vm1, %v3800_v25, %v2325_v14 }
 0x3ab   :  { %v2454_v20 = vsel %vm2453_vm2, %v2421_v37, 0.0 }
 0x3ac   :  { %2486 = vst [vmem:[%s4786_s7] sm:$0xff] %v2454_v20  ;;  %v2329_v43 = vpop.permute.xlu1 %2328 }
 0x3ad   :  { %v2423_v33 = vsel %vm2420_vm1, %v3794_v21, %v2329_v43  ;;  %v2337_v42 = vpop.permute.xlu0 %2336 }
 0x3ae   :  { %v2456_v16 = vsel %vm2453_vm2, %v2423_v33, 0.0  ;;  %v2427_v18 = vsel %vm2420_vm1, %v3847_v15, %v2337_v42 }
 0x3af   :  { %v3157_v29 = vpop.eup %3156  ;;  %2488 = vst [vmem:[%s4786_s7 + $0x10] sm:$0xff] %v2456_v16  ;;  %v2460_v25 = vsel %vm2453_vm2, %v2427_v18, 0.0  ;;  %v4818_v18 = vld [vmem:[#allocation6_spill] sm:$0xff] }
 0x3b0   :  { %2492 = vst [vmem:[%s4786_s7 + $0x30] sm:$0xff] %v2460_v25  ;;  %v2331_v62 = vpop.permute.xlu1 %2330  ;;  %v1370_v21 = vmul.f32 %v3157_v29, %v4278_v45 }
 0x3b1   :  { %v2424_v9 = vsel %vm2420_vm1, %v3809_v48, %v2331_v62  ;;  %v2333_v32 = vpop.permute.xlu0 %2332 }
 0x3b2   :  { %v3159_v47 = vpop.eup %3158  ;;  %v2457_v15 = vsel %vm2453_vm2, %v2424_v9, 0.0  ;;  %v2425_v10 = vsel %vm2420_vm1, %v3850_v17, %v2333_v32  ;;  %2380 = vrot.lane.b32.xlu0 %v1370_v21, %s3314_s20  ;;  %v4819_v9 = vld [vmem:[#allocation5_spill] sm:$0xff] }
 0x3b3   :  { %v3161_v4 = vpop.eup %3160  ;;  %2489 = vst [vmem:[%s4786_s7 + $0x18] sm:$0xff] %v2457_v15  ;;  %v2458_v30 = vsel %vm2453_vm2, %v2425_v10, 0.0  ;;  %v1372_v45 = vmul.f32 %v3159_v47, %v4284_v3 }
 0x3b4   :  { %2490 = vst [vmem:[%s4786_s7 + $0x20] sm:$0xff] %v2458_v30  ;;  %v2327_v48 = vpop.permute.xlu1 %2326  ;;  %v1374_v63 = vmul.f32 %v3161_v4, %v4286_v1  ;;  %v4820_v4 = vld [vmem:[#allocation9_spill] sm:$0xff] }
 0x3b5   :  { %v2422_v17 = vsel %vm2420_vm1, %v3820_v38, %v2327_v48  ;;  %v2345_v40 = vpop.permute.xlu0 %2344  ;;  %2382 = vrot.lane.b32.xlu1 %v1372_v45, %s3314_s20  ;;  %v1391_v5 = vpack.c.bf16 %v1372_v45, %v1370_v21 }
 0x3b6   :  { %v3163_v55 = vpop.eup %3162  ;;  %v2455_v39 = vsel %vm2453_vm2, %v2422_v17, 0.0  ;;  %v2431_v3 = vsel %vm2420_vm1, %v3879_v19, %v2345_v40  ;;  %2384 = vrot.lane.b32.xlu0 %v1374_v63, %s3314_s20  ;;  %v4821_v17 = vld [vmem:[#allocation7_spill] sm:$0xff] }
 0x3b7   :  { %2487 = vst [vmem:[%s4786_s7 + $0x8] sm:$0xff] %v2455_v39  ;;  %v2464_v1 = vsel %vm2453_vm2, %v2431_v3, 0.0  ;;  %2833 = vmatprep.mubr.msk.bf16.mxu1 %vm1024_vm0, %v1391_v5  ;;  %v1376_v38 = vmul.f32 %v3163_v55, %v4292_v27  ;;  %v4822_v3 = vld [vmem:[#allocation10_spill] sm:$0xff] }
 0x3b8   :  { %2496 = vst [vmem:[%s4786_s7 + $0x50] sm:$0xff] %v2464_v1  ;;  %v2339_v11 = vpop.permute.xlu1 %2338 }
 0x3b9   :  { %v2428_v19 = vsel %vm2420_vm1, %v3856_v35, %v2339_v11  ;;  %v2341_v54 = vpop.permute.xlu0 %2340  ;;  %2386 = vrot.lane.b32.xlu1 %v1376_v38, %s3314_s20  ;;  %v1392_v13 = vpack.c.bf16 %v1376_v38, %v1374_v63 }
 0x3ba   :  { %v2461_v23 = vsel %vm2453_vm2, %v2428_v19, 0.0  ;;  %v2429_v6 = vsel %vm2420_vm1, %v3882_v28, %v2341_v54  ;;  %v4823_v54 = vld [vmem:[#allocation8_spill] sm:$0xff] }
 0x3bb   :  { %2493 = vst [vmem:[%s4786_s7 + $0x38] sm:$0xff] %v2461_v23  ;;  %v2462_v27 = vsel %vm2453_vm2, %v2429_v6, 0.0  ;;  %2834 = vmatmul.mubr.msk.bf16.gmra.mxu1 %vm1024_vm0, %v1392_v13 }
 0x3bc   :  { %2494 = vst [vmem:[%s4786_s7 + $0x40] sm:$0xff] %v2462_v27  ;;  %v2335_v35 = vpop.permute.xlu1 %2334 }
 0x3bd   :  { %v2426_v60 = vsel %vm2420_vm1, %v3859_v56, %v2335_v35  ;;  %v2353_v36 = vpop.permute.xlu0 %2352  ;;  %v4824_v35 = vld [vmem:[#allocation11_spill] sm:$0xff] }
 0x3be   :  { %v2459_v34 = vsel %vm2453_vm2, %v2426_v60, 0.0  ;;  %v2435_v28 = vsel %vm2420_vm1, %v3911_v12, %v2353_v36 }
 0x3bf   :  { %2491 = vst [vmem:[%s4786_s7 + $0x28] sm:$0xff] %v2459_v34  ;;  %v2468_v7 = vsel %vm2453_vm2, %v2435_v28, 0.0 }
 0x3c0   :  { %2500 = vst [vmem:[%s4786_s7 + $0x70] sm:$0xff] %v2468_v7  ;;  %v2347_v41 = vpop.permute.xlu1 %2346 }
 0x3c1   :  { %v2432_v56 = vsel %vm2420_vm1, %v3885_v0, %v2347_v41  ;;  %v2349_v8 = vpop.permute.xlu0 %2348  ;;  %v2807_v51 = vpop.f32.mrf.mxu1  ;;  %v4542_v0 = vld [vmem:[%s4785_s6 + $0x2] ss:$0 sm:$0xff] }
 0x3c2   :  { %v2465_v50 = vsel %vm2453_vm2, %v2432_v56, 0.0  ;;  %v2433_v12 = vsel %vm2420_vm1, %v3914_v26, %v2349_v8  ;;  %v1506_v15 = vadd.f32 %v2807_v51, %v4542_v0  ;;  %v4825_v56 = vld [vmem:[#allocation12_spill] sm:$0xff] }
 0x3c3   :  { %2497 = vst [vmem:[%s4786_s7 + $0x58] sm:$0xff] %v2465_v50  ;;  %v2466_v22 = vsel %vm2453_vm2, %v2433_v12, 0.0  ;;  %v1497_v46 = vpop.f32.mrf.mxu1 }
 0x3c4   :  { %2498 = vst [vmem:[%s4786_s7 + $0x60] sm:$0xff] %v2466_v22  ;;  %v2343_v2 = vpop.permute.xlu1 %2342  ;;  %v1498_v44 = vadd.f32 %v4542_v0, %v1497_v46  ;;  %v1626_v55 = vmax.f32 %v1506_v15, 0.0 }
 0x3c5   :  { %v2430_v26 = vsel %vm2420_vm1, %v3894_v49, %v2343_v2  ;;  %v2361_v59 = vpop.permute.xlu0 %2360  ;;  %v2808_v53 = vpop.f32.mrf.mxu1 }
 0x3c6   :  { %v2463_v57 = vsel %vm2453_vm2, %v2430_v26, 0.0  ;;  %v2439_v24 = vsel %vm2420_vm1, %v3931_v58, %v2361_v59  ;;  %v1624_v42 = vmax.f32 %v1498_v44, 0.0  ;;  %v1509_v62 = vadd.f32 %v2808_v53, %v4542_v0 }
 0x3c7   :  { %2495 = vst [vmem:[%s4786_s7 + $0x48] sm:$0xff] %v2463_v57  ;;  %v2472_v14 = vsel %vm2453_vm2, %v2439_v24, 0.0  ;;  %v1500_v37 = vpop.f32.mrf.mxu1 }
 0x3c8   :  { %2504 = vst [vmem:[%s4786_s7 + $0x90] sm:$0xff] %v2472_v14  ;;  %v1501_v49 = vadd.f32 %v4542_v0, %v1500_v37  ;;  %v2355_v20 = vpop.permute.xlu1 %2354  ;;  %v1627_v48 = vmax.f32 %v1509_v62, 0.0 }
 0x3c9   :  { %v2436_v43 = vsel %vm2420_vm1, %v3917_v31, %v2355_v20  ;;  %v2357_v33 = vpop.permute.xlu0 %2356 }
 0x3ca   :  { %v1625_v58 = vmax.f32 %v1501_v49, 0.0  ;;  %v2469_v16 = vsel %vm2453_vm2, %v2436_v43, 0.0  ;;  %v2437_v29 = vsel %vm2420_vm1, %v4818_v18, %v2357_v33  ;;  %v1657_v11 = vpack.c.bf16 %v1627_v48, %v1626_v55 }
 0x3cb   :  { %2501 = vst [vmem:[%s4786_s7 + $0x78] sm:$0xff] %v2469_v16  ;;  %v2470_v25 = vsel %vm2453_vm2, %v2437_v29, 0.0 }
 0x3cc   :  { %v1656_v21 = vpack.c.bf16 %v1625_v58, %v1624_v42  ;;  %2502 = vst [vmem:[%s4786_s7 + $0x80] sm:$0xff] %v2470_v25  ;;  %v2351_v31 = vpop.permute.xlu1 %2350 }
 0x3cd   :  { %v2434_v32 = vsel %vm2420_vm1, %v4819_v9, %v2351_v31  ;;  %v2369_v47 = vpop.permute.xlu0 %2368 }
 0x3ce   :  { %v2467_v10 = vsel %vm2453_vm2, %v2434_v32, 0.0  ;;  %v2443_v30 = vsel %vm2420_vm1, %v4820_v4, %v2369_v47  ;;  %1812 = vmatmul.mubr.bf16.vlgmr.msra.gmra.mxu0 %v1656_v21 }
 0x3cf   :  { %2499 = vst [vmem:[%s4786_s7 + $0x68] sm:$0xff] %v2467_v10  ;;  %v2476_v45 = vsel %vm2453_vm2, %v2443_v30, 0.0  ;;  %1821 = vmatprep.mubr.bf16.mxu0 %v3315_v61 }
 0x3d0   :  { %2508 = vst [vmem:[%s4786_s7 + $0xb0] sm:$0xff] %v2476_v45  ;;  %v2363_v63 = vpop.permute.xlu1 %2362 }
 0x3d1   :  { %v2440_v40 = vsel %vm2420_vm1, %v4821_v17, %v2363_v63  ;;  %v2365_v5 = vpop.permute.xlu0 %2364 }
 0x3d2   :  { %v2473_v39 = vsel %vm2453_vm2, %v2440_v40, 0.0  ;;  %v2441_v1 = vsel %vm2420_vm1, %v4822_v3, %v2365_v5 }
 0x3d3   :  { %2505 = vst [vmem:[%s4786_s7 + $0x98] sm:$0xff] %v2473_v39  ;;  %v2474_v38 = vsel %vm2453_vm2, %v2441_v1, 0.0 }
 0x3d4   :  { %2506 = vst [vmem:[%s4786_s7 + $0xa0] sm:$0xff] %v2474_v38  ;;  %v2359_v19 = vpop.permute.xlu1 %2358 }
 0x3d5   :  { %v2438_v13 = vsel %vm2420_vm1, %v4823_v54, %v2359_v19 }
 0x3d6   :  { %v2471_v23 = vsel %vm2453_vm2, %v2438_v13, 0.0  ;;  %1822 = vmatmul.mubr.bf16.gmra.mxu0 %v1657_v11 }
 0x3d7   :  { %2503 = vst [vmem:[%s4786_s7 + $0x88] sm:$0xff] %v2471_v23  ;;  %v2811_v6 = vpop.f32.mrf.mxu1  ;;  %1831 = vmatprep.mubr.bf16.mxu0 %v3315_v61 }
 0x3d8   :  { %v2371_v27 = vpop.permute.xlu1 %2370  ;;  %v1522_v59 = vadd.f32 %v2811_v6, %v4542_v0 }
 0x3d9   :  { %v2444_v60 = vsel %vm2420_vm1, %v4824_v35, %v2371_v27  ;;  %v1513_v36 = vpop.f32.mrf.mxu1 }
 0x3da   :  { %v2477_v34 = vsel %vm2453_vm2, %v2444_v60, 0.0  ;;  %v1514_v7 = vadd.f32 %v4542_v0, %v1513_v36  ;;  %v1630_v57 = vmax.f32 %v1522_v59, 0.0 }
 0x3db   :  { %2509 = vst [vmem:[%s4786_s7 + $0xb8] sm:$0xff] %v2477_v34  ;;  %v2812_v28 = vpop.f32.mrf.mxu1 }
 0x3dc   :  { %v2367_v41 = vpop.permute.xlu1 %2366  ;;  %v1628_v22 = vmax.f32 %v1514_v7, 0.0  ;;  %v1525_v2 = vadd.f32 %v2812_v28, %v4542_v0 }
 0x3dd   :  { %v2442_v8 = vsel %vm2420_vm1, %v4825_v56, %v2367_v41  ;;  %v1516_v51 = vpop.f32.mrf.mxu1  ;;  %v4826_v41 = vld [vmem:[#allocation15_spill] sm:$0xff] }
 0x3de   :  { %v2475_v50 = vsel %vm2453_vm2, %v2442_v8, 0.0  ;;  %v1517_v12 = vadd.f32 %v4542_v0, %v1516_v51  ;;  %v1631_v53 = vmax.f32 %v1525_v2, 0.0 }
 0x3df   :  { %2507 = vst [vmem:[%s4786_s7 + $0xa8] sm:$0xff] %v2475_v50  ;;  %v4827_v50 = vld [vmem:[#allocation13_spill] sm:$0xff] }
 0x3e0   :  { %v1629_v46 = vmax.f32 %v1517_v12, 0.0  ;;  %v1659_v14 = vpack.c.bf16 %v1631_v53, %v1630_v57  ;;  %v4828_v53 = vld [vmem:[#allocation14_spill] sm:$0xff] }
 0x3e2   :  { %v1658_v26 = vpack.c.bf16 %v1629_v46, %v1628_v22 }
 0x3e4   :  { %1832 = vmatmul.mubr.bf16.gmra.mxu0 %v1658_v26 }
 0x3e5   :  { %1841 = vmatprep.mubr.bf16.mxu0 %v3315_v61 }
 0x3e6   :  { %v2815_v44 = vpop.f32.mrf.mxu1 }
 0x3e7   :  { %v1538_v29 = vadd.f32 %v2815_v44, %v4542_v0 }
 0x3e8   :  { %v1529_v24 = vpop.f32.mrf.mxu1 }
 0x3e9   :  { %v1530_v49 = vadd.f32 %v4542_v0, %v1529_v24  ;;  %v1634_v31 = vmax.f32 %v1538_v29, 0.0 }
 0x3ea   :  { %v2816_v37 = vpop.f32.mrf.mxu1 }
 0x3eb   :  { %v1632_v33 = vmax.f32 %v1530_v49, 0.0  ;;  %v1541_v16 = vadd.f32 %v2816_v37, %v4542_v0 }
 0x3ec   :  { %v1532_v20 = vpop.f32.mrf.mxu1  ;;  %1842 = vmatmul.mubr.bf16.gmra.mxu0 %v1659_v14 }
 0x3ed   :  { %v1533_v43 = vadd.f32 %v4542_v0, %v1532_v20  ;;  %1851 = vmatprep.mubr.bf16.mxu0 %v3315_v61  ;;  %v1635_v62 = vmax.f32 %v1541_v16, 0.0 }
 0x3ef   :  { %v1633_v42 = vmax.f32 %v1533_v43, 0.0  ;;  %v1661_v32 = vpack.c.bf16 %v1635_v62, %v1634_v31  ;;  %v4830_v62 = vld [vmem:[#allocation17_spill] sm:$0xff] }
 0x3f1   :  { %v1660_v58 = vpack.c.bf16 %v1633_v42, %v1632_v33  ;;  %v4829_v42 = vld [vmem:[#allocation16_spill] sm:$0xff] }
 0x3f2   :  { %v2819_v18 = vpop.f32.mrf.mxu1 }
 0x3f3   :  { %v1554_v40 = vadd.f32 %v2819_v18, %v4542_v0 }
 0x3f4   :  { %v1545_v25 = vpop.f32.mrf.mxu1  ;;  %1852 = vmatmul.mubr.bf16.gmra.mxu0 %v1660_v58 }
 0x3f5   :  { %1861 = vmatprep.mubr.bf16.mxu0 %v3315_v61  ;;  %v1546_v10 = vadd.f32 %v4542_v0, %v1545_v25  ;;  %v1638_v39 = vmax.f32 %v1554_v40, 0.0 }
 0x3f6   :  { %v2820_v21 = vpop.f32.mrf.mxu1 }
 0x3f7   :  { %v1636_v45 = vmax.f32 %v1546_v10, 0.0  ;;  %v1557_v48 = vadd.f32 %v2820_v21, %v4542_v0 }
 0x3f8   :  { %v1548_v9 = vpop.f32.mrf.mxu1 }
 0x3f9   :  { %v1549_v47 = vadd.f32 %v4542_v0, %v1548_v9  ;;  %v1639_v5 = vmax.f32 %v1557_v48, 0.0 }
 0x3fa   :  { %v2823_v15 = vpop.f32.mrf.mxu1 }
 0x3fb   :  { %v1637_v4 = vmax.f32 %v1549_v47, 0.0  ;;  %v1663_v3 = vpack.c.bf16 %v1639_v5, %v1638_v39  ;;  %v1570_v36 = vadd.f32 %v2823_v15, %v4542_v0 }
 0x3fc   :  { %1862 = vmatmul.mubr.bf16.gmra.mxu0 %v1661_v32  ;;  %v1561_v30 = vpop.f32.mrf.mxu1  ;;  %v4831_v32 = vld [vmem:[#allocation18_spill] sm:$0xff] }
 0x3fd   :  { %1871 = vmatprep.mubr.bf16.mxu0 %v3315_v61  ;;  %v1662_v63 = vpack.c.bf16 %v1637_v4, %v1636_v45  ;;  %v1562_v11 = vadd.f32 %v4542_v0, %v1561_v30  ;;  %v1642_v22 = vmax.f32 %v1570_v36, 0.0  ;;  %v4832_v30 = vld [vmem:[#allocation19_spill] sm:$0xff] }
 0x3fe   :  { %v2824_v17 = vpop.f32.mrf.mxu1 }
 0x3ff   :  { %v1640_v13 = vmax.f32 %v1562_v11, 0.0  ;;  %v1573_v23 = vadd.f32 %v2824_v17, %v4542_v0 }
 0x400   :  { %v1564_v55 = vpop.f32.mrf.mxu1 }
 0x401   :  { %v1565_v1 = vadd.f32 %v4542_v0, %v1564_v55  ;;  %v1643_v7 = vmax.f32 %v1573_v23, 0.0 }
 0x402   :  { %v2827_v38 = vpop.f32.mrf.mxu1 }
 0x403   :  { %v1641_v19 = vmax.f32 %v1565_v1, 0.0  ;;  %v1665_v26 = vpack.c.bf16 %v1643_v7, %v1642_v22  ;;  %v1586_v43 = vadd.f32 %v2827_v38, %v4542_v0 }
 0x404   :  { %1872 = vmatmul.mubr.bf16.gmra.mxu0 %v1662_v63  ;;  %v1577_v54 = vpop.f32.mrf.mxu1 }
 0x405   :  { %1881 = vmatprep.mubr.bf16.mxu0 %v3315_v61  ;;  %v1664_v6 = vpack.c.bf16 %v1641_v19, %v1640_v13  ;;  %v1578_v24 = vadd.f32 %v4542_v0, %v1577_v54  ;;  %v1646_v25 = vmax.f32 %v1586_v43, 0.0 }
 0x406   :  { %v2828_v35 = vpop.f32.mrf.mxu1 }
 0x407   :  { %v1644_v37 = vmax.f32 %v1578_v24, 0.0  ;;  %v1589_v49 = vadd.f32 %v2828_v35, %v4542_v0 }
 0x408   :  { %v1580_v51 = vpop.f32.mrf.mxu1 }
 0x409   :  { %v1581_v59 = vadd.f32 %v4542_v0, %v1580_v51  ;;  %v1647_v16 = vmax.f32 %v1589_v49, 0.0 }
 0x40b   :  { %v1645_v14 = vmax.f32 %v1581_v59, 0.0  ;;  %v1667_v15 = vpack.c.bf16 %v1647_v16, %v1646_v25 }
 0x40c   :  { %1882 = vmatmul.mubr.bf16.gmra.mxu0 %v1663_v3 }
 0x40d   :  { %1891 = vmatprep.mubr.bf16.mxu0 %v3315_v61  ;;  %v1666_v20 = vpack.c.bf16 %v1645_v14, %v1644_v37 }
 0x412   :  { %v2377_v27 = vpop.permute.xlu0 %2376 }
 0x413   :  { %v2447_v60 = vsel %vm2420_vm1, %v4046_v52, %v2377_v27 }
 0x414   :  { %v2480_v34 = vsel %vm2453_vm2, %v2447_v60, 0.0  ;;  %1892 = vmatmul.mubr.bf16.gmra.mxu0 %v1664_v6  ;;  %v1689_v60 = vlaneseq }
 0x415   :  { %2512 = vst [vmem:[%s4786_s7 + $0xd0] sm:$0xff] %v2480_v34  ;;  %v2379_v28 = vpop.permute.xlu1 %2378  ;;  %1901 = vmatprep.mubr.bf16.mxu0 %v3315_v61 }
 0x416   :  { %v2448_v56 = vsel %vm2420_vm1, %v4826_v41, %v2379_v28  ;;  %v2373_v8 = vpop.permute.xlu0 %2372  ;;  %v1690_v7 = vshrl.u32 %v1689_v60, 7 }
 0x417   :  { %v2481_v52 = vsel %vm2453_vm2, %v2448_v56, 0.0  ;;  %v2445_v12 = vsel %vm2420_vm1, %v4827_v50, %v2373_v8 }
 0x418   :  { %2513 = vst [vmem:[%s4786_s7 + $0xd8] sm:$0xff] %v2481_v52  ;;  %v2478_v46 = vsel %vm2453_vm2, %v2445_v12, 0.0  ;;  %v1691_v52 = vsub.s32 0, %v1690_v7  ;;  %v33_v12 = vld [vmem:[%s4785_s6 + $0x3] sm:$0x3]  ;;  %v1695_v22 = vsub.s32 1, %v1690_v7 }
 0x419   :  { %2510 = vst [vmem:[%s4786_s7 + $0xc0] sm:$0xff] %v2478_v46  ;;  %v2375_v2 = vpop.permute.xlu1 %2374  ;;  %s3316_s6 = smov [#allocation2]  }
 0x41a   :  { %v2446_v44 = vsel %vm2420_vm1, %v4828_v53, %v2375_v2  ;;  %v4708_v2 = vrot.slane %v33_v12, %v1691_v52  ;;  %v4710_v59 = vrot.slane %v33_v12, %v1695_v22  ;;  %s2525_s2 = sshll.u32 %s3316_s6, 4  ;;  %s2526_s2 = int_to_ptr.vmem [resolvable:$true] %s2525_s2 }
 0x41b   :  { %v2479_v57 = vsel %vm2453_vm2, %v2446_v44, 0.0  ;;  %s3292_s9 = scalar_lea.vmem %s2526_s2, 8192  ;;  %p3297_p1 = scmp.lt.s32.totalorder %s2526_s2, %s2526_s2 }
 0x41c   :  { %2511 = vst [vmem:[%s4786_s7 + $0xc8] sm:$0xff] %v2479_v57  ;;  %1902 = vmatmul.mubr.bf16.gmra.mxu0 %v1665_v26  ;;  %p3293_p0 = scmp.ne.s32.totalorder %s2526_s2, %s3292_s9  ;;  %p3298_p2 = scmp.lt.s32.totalorder %s3292_s9, %s3292_s9 }
 0x41d   :  { %1911 = vmatprep.mubr.bf16.mxu0 %v3315_v61 }
 0x41e   :  { %p3299_p3 = por %p3298_p2, %p3297_p1 }
 0x420   :  { %p3300_p4 = pnand %p3299_p3, %p3293_p0 }
 0x424   :  { %v2381_v33 = vpop.permute.xlu0 %2380  ;;  %1912 = vmatmul.mubr.bf16.gmra.mxu0 %v1666_v20 }
 0x425   :  { %v2449_v58 = vsel %vm2420_vm1, %v4829_v42, %v2381_v33  ;;  %1921 = vmatprep.mubr.bf16.mxu0 %v3315_v61 }
 0x426   :  { %v2482_v18 = vsel %vm2453_vm2, %v2449_v58, 0.0 }
 0x427   :  { %2514 = vst [vmem:[%s4786_s7 + $0xe0] sm:$0xff] %v2482_v18  ;;  %v2383_v29 = vpop.permute.xlu1 %2382 }
 0x428   :  { %v2450_v21 = vsel %vm2420_vm1, %v4830_v62, %v2383_v29  ;;  %v2385_v31 = vpop.permute.xlu0 %2384 }
 0x429   :  { %v2483_v9 = vsel %vm2453_vm2, %v2450_v21, 0.0  ;;  %v2451_v47 = vsel %vm2420_vm1, %v4831_v32, %v2385_v31 }
 0x42a   :  { %2515 = vst [vmem:[%s4786_s7 + $0xe8] sm:$0xff] %v2483_v9  ;;  %v2484_v10 = vsel %vm2453_vm2, %v2451_v47, 0.0 }
 0x42b   :  { %2516 = vst [vmem:[%s4786_s7 + $0xf0] sm:$0xff] %v2484_v10  ;;  %v2387_v4 = vpop.permute.xlu1 %2386 }
 0x42c   :  { %v2452_v45 = vsel %vm2420_vm1, %v4832_v30, %v2387_v4  ;;  %1922 = vmatmul.mubr.bf16.gmra.mxu0 %v1667_v15 }
 0x42d   :  { %v2485_v48 = vsel %vm2453_vm2, %v2452_v45, 0.0  ;;  %1931 = vmatprep.mubr.bf16.mxu0 %v3315_v61 }
 0x42e   :  { %2517 = vst [vmem:[%s4786_s7 + $0xf8] sm:$0xff] %v2485_v48 }
 0x465   :  { %v2831_v63 = vpop.f32.mrf.mxu1 }
 0x466   :  { %v1602_v19 = vadd.f32 %v2831_v63, %v4542_v0 }
 0x467   :  { %v1593_v17 = vpop.f32.mrf.mxu1 }
 0x468   :  { %v1594_v5 = vadd.f32 %v4542_v0, %v1593_v17  ;;  %v1650_v13 = vmax.f32 %v1602_v19, 0.0 }
 0x469   :  { %v2832_v40 = vpop.f32.mrf.mxu1 }
 0x46a   :  { %v1648_v3 = vmax.f32 %v1594_v5, 0.0  ;;  %v1605_v38 = vadd.f32 %v2832_v40, %v4542_v0 }
 0x46b   :  { %v1596_v55 = vpop.f32.mrf.mxu1 }
 0x46c   :  { %v1597_v39 = vadd.f32 %v4542_v0, %v1596_v55  ;;  %v1651_v54 = vmax.f32 %v1605_v38, 0.0 }
 0x46e   :  { %v1649_v1 = vmax.f32 %v1597_v39, 0.0  ;;  %v1669_v23 = vpack.c.bf16 %v1651_v54, %v1650_v13 }
 0x470   :  { %v1668_v11 = vpack.c.bf16 %v1649_v1, %v1648_v3 }
 0x472   :  { %1932 = vmatmul.mubr.bf16.gmra.mxu0 %v1668_v11 }
 0x473   :  { %1941 = vmatprep.mubr.bf16.mxu0 %v3315_v61 }
 0x47a   :  { %1942 = vmatmul.mubr.bf16.gmra.mxu0 %v1669_v23 }
 0x47b   :  { %v2835_v6 = vpop.f32.mrf.mxu1  ;;  %1951 = vmatprep.mubr.bf16.mxu0 %v3315_v61 }
 0x47c   :  { %v1618_v50 = vadd.f32 %v2835_v6, %v4542_v0 }
 0x47d   :  { %v1609_v27 = vpop.f32.mrf.mxu1 }
 0x47e   :  { %v1610_v36 = vadd.f32 %v4542_v0, %v1609_v27  ;;  %v1654_v26 = vmax.f32 %v1618_v50, 0.0 }
 0x47f   :  { %v2836_v35 = vpop.f32.mrf.mxu1 }
 0x480   :  { %v1652_v41 = vmax.f32 %v1610_v36, 0.0  ;;  %v1621_v8 = vadd.f32 %v2836_v35, %v4542_v0 }
 0x481   :  { %v1612_v34 = vpop.f32.mrf.mxu1 }
 0x482   :  { %v1613_v28 = vadd.f32 %v4542_v0, %v1612_v34  ;;  %v1655_v46 = vmax.f32 %v1621_v8, 0.0 }
 0x484   :  { %v1653_v56 = vmax.f32 %v1613_v28, 0.0  ;;  %v1671_v53 = vpack.c.bf16 %v1655_v46, %v1654_v26 }
 0x486   :  { %v1670_v51 = vpack.c.bf16 %v1653_v56, %v1652_v41 }
 0x488   :  { %1952 = vmatmul.mubr.bf16.gmra.mxu0 %v1670_v51 }
 0x489   :  { %1961 = vmatprep.mubr.bf16.mxu0 %v3315_v61 }
 0x48e   :  { %v1813_v44 = vpop.f32.mrf.mxu0 }
 0x48f   :  { %v1814_v57 = vadd.f32 %v1813_v44, %v4708_v2 }
 0x490   :  { %v1815_v24 = vpop.f32.mrf.mxu0  ;;  %1962 = vmatmul.mubr.bf16.gmra.mxu0 %v1671_v53 }
 0x491   :  { %v1972_v0 = vmul.f32 0.5, %v1814_v57  ;;  %v1816_v14 = vadd.f32 %v1815_v24, %v4710_v59 }
 0x492   :  { %v1817_v37 = vpop.f32.mrf.mxu0 }
 0x493   :  { %3164 = vtanh.f32 %v1972_v0  ;;  %v1973_v49 = vmul.f32 0.5, %v1816_v14  ;;  %v1818_v61 = vadd.f32 %v1817_v37, %v4708_v2 }
 0x494   :  { %v1819_v20 = vpop.f32.mrf.mxu0 }
 0x495   :  { %3166 = vtanh.f32 %v1973_v49  ;;  %v1974_v43 = vmul.f32 0.5, %v1818_v61  ;;  %v1820_v33 = vadd.f32 %v1819_v20, %v4710_v59 }
 0x496   :  { %v1823_v42 = vpop.f32.mrf.mxu0 }
 0x497   :  { %3168 = vtanh.f32 %v1974_v43  ;;  %v1975_v58 = vmul.f32 0.5, %v1820_v33  ;;  %v1824_v16 = vadd.f32 %v1823_v42, %v4708_v2 }
 0x498   :  { %v1825_v18 = vpop.f32.mrf.mxu0 }
 0x499   :  { %3170 = vtanh.f32 %v1975_v58  ;;  %v1976_v29 = vmul.f32 0.5, %v1824_v16  ;;  %v1826_v25 = vadd.f32 %v1825_v18, %v4710_v59 }
 0x49a   :  { %v1827_v62 = vpop.f32.mrf.mxu0 }
 0x49b   :  { %3172 = vtanh.f32 %v1976_v29  ;;  %v1977_v21 = vmul.f32 0.5, %v1826_v25  ;;  %v1828_v31 = vadd.f32 %v1827_v62, %v4708_v2 }
 0x49c   :  { %v1829_v9 = vpop.f32.mrf.mxu0 }
 0x49d   :  { %3174 = vtanh.f32 %v1977_v21  ;;  %v1978_v32 = vmul.f32 0.5, %v1828_v31  ;;  %v1830_v47 = vadd.f32 %v1829_v9, %v4710_v59 }
 0x49f   :  { %3176 = vtanh.f32 %v1978_v32  ;;  %v1979_v15 = vmul.f32 0.5, %v1830_v47 }
 0x4a0   :  { %v3165_v10 = vpop.eup %3164 }
 0x4a1   :  { %v2100_v4 = vmul.f32 0.5, %v3165_v10  ;;  %3178 = vtanh.f32 %v1979_v15 }
 0x4a2   :  { %v3167_v30 = vpop.eup %3166 }
 0x4a3   :  { %v2164_v45 = vadd.f32 0.5, %v2100_v4  ;;  %v2101_v48 = vmul.f32 0.5, %v3167_v30 }
 0x4a4   :  { %v3169_v63 = vpop.eup %3168  ;;  %v1833_v17 = vpop.f32.mrf.mxu0 }
 0x4a5   :  { %2228 = vst [vmem:[#allocation2] sm:$0xff] %v2164_v45  ;;  %v2165_v40 = vadd.f32 0.5, %v2101_v48  ;;  %v2102_v5 = vmul.f32 0.5, %v3169_v63  ;;  %v1834_v55 = vadd.f32 %v1833_v17, %v4708_v2 }
 0x4a6   :  { %v3171_v39 = vpop.eup %3170  ;;  %v1835_v3 = vpop.f32.mrf.mxu0 }
 0x4a7   :  { %2229 = vst [vmem:[#allocation2 + $0x8] sm:$0xff] %v2165_v40  ;;  %v2166_v1 = vadd.f32 0.5, %v2102_v5  ;;  %v2103_v38 = vmul.f32 0.5, %v3171_v39  ;;  %v1980_v11 = vmul.f32 0.5, %v1834_v55  ;;  %v1836_v19 = vadd.f32 %v1835_v3, %v4710_v59 }
 0x4a8   :  { %v3173_v54 = vpop.eup %3172  ;;  %v1837_v13 = vpop.f32.mrf.mxu0 }
 0x4a9   :  { %2230 = vst [vmem:[#allocation2 + $0x10] sm:$0xff] %v2166_v1  ;;  %v2167_v23 = vadd.f32 0.5, %v2103_v38  ;;  %v2104_v6 = vmul.f32 0.5, %v3173_v54  ;;  %3180 = vtanh.f32 %v1980_v11  ;;  %v1981_v27 = vmul.f32 0.5, %v1836_v19 }
 0x4aa   :  { %v3175_v35 = vpop.eup %3174  ;;  %v1838_v60 = vadd.f32 %v1837_v13, %v4708_v2  ;;  %v1839_v36 = vpop.f32.mrf.mxu0 }
 0x4ab   :  { %2231 = vst [vmem:[#allocation2 + $0x18] sm:$0xff] %v2167_v23  ;;  %v2168_v34 = vadd.f32 0.5, %v2104_v6  ;;  %v2105_v28 = vmul.f32 0.5, %v3175_v35  ;;  %3182 = vtanh.f32 %v1981_v27  ;;  %v1840_v7 = vadd.f32 %v1839_v36, %v4710_v59 }
 0x4ac   :  { %v3177_v41 = vpop.eup %3176  ;;  %v1982_v56 = vmul.f32 0.5, %v1838_v60  ;;  %v1843_v8 = vpop.f32.mrf.mxu0 }
 0x4ad   :  { %2232 = vst [vmem:[#allocation2 + $0x20] sm:$0xff] %v2168_v34  ;;  %v2169_v51 = vadd.f32 0.5, %v2105_v28  ;;  %v2106_v52 = vmul.f32 0.5, %v3177_v41  ;;  %v1983_v50 = vmul.f32 0.5, %v1840_v7  ;;  %v1844_v12 = vadd.f32 %v1843_v8, %v4708_v2 }
 0x4ae   :  { %v3179_v22 = vpop.eup %3178  ;;  %3184 = vtanh.f32 %v1982_v56  ;;  %v1845_v46 = vpop.f32.mrf.mxu0 }
 0x4af   :  { %2233 = vst [vmem:[#allocation2 + $0x28] sm:$0xff] %v2169_v51  ;;  %v2170_v26 = vadd.f32 0.5, %v2106_v52  ;;  %v2107_v53 = vmul.f32 0.5, %v3179_v22  ;;  %3186 = vtanh.f32 %v1983_v50  ;;  %v1984_v44 = vmul.f32 0.5, %v1844_v12 }
 0x4b0   :  { %v1846_v57 = vadd.f32 %v1845_v46, %v4710_v59  ;;  %v1847_v24 = vpop.f32.mrf.mxu0 }
 0x4b1   :  { %2234 = vst [vmem:[#allocation2 + $0x30] sm:$0xff] %v2170_v26  ;;  %v2171_v0 = vadd.f32 0.5, %v2107_v53  ;;  %3188 = vtanh.f32 %v1984_v44  ;;  %v1848_v14 = vadd.f32 %v1847_v24, %v4708_v2 }
 0x4b2   :  { %v1985_v37 = vmul.f32 0.5, %v1846_v57  ;;  %v1849_v49 = vpop.f32.mrf.mxu0 }
 0x4b3   :  { %2235 = vst [vmem:[#allocation2 + $0x38] sm:$0xff] %v2171_v0  ;;  %v1986_v61 = vmul.f32 0.5, %v1848_v14  ;;  %v1850_v20 = vadd.f32 %v1849_v49, %v4710_v59 }
 0x4b4   :  { %3190 = vtanh.f32 %v1985_v37  ;;  %v1853_v43 = vpop.f32.mrf.mxu0 }
 0x4b5   :  { %3192 = vtanh.f32 %v1986_v61  ;;  %v1987_v33 = vmul.f32 0.5, %v1850_v20  ;;  %v1854_v42 = vadd.f32 %v1853_v43, %v4708_v2 }
 0x4b6   :  { %v3181_v58 = vpop.eup %3180  ;;  %v1855_v16 = vpop.f32.mrf.mxu0 }
 0x4b7   :  { %v2108_v18 = vmul.f32 0.5, %v3181_v58  ;;  %3194 = vtanh.f32 %v1987_v33  ;;  %v1988_v29 = vmul.f32 0.5, %v1854_v42  ;;  %v1856_v25 = vadd.f32 %v1855_v16, %v4710_v59 }
 0x4b8   :  { %v3183_v62 = vpop.eup %3182  ;;  %v1857_v21 = vpop.f32.mrf.mxu0 }
 0x4b9   :  { %v2172_v31 = vadd.f32 0.5, %v2108_v18  ;;  %v2109_v9 = vmul.f32 0.5, %v3183_v62  ;;  %3196 = vtanh.f32 %v1988_v29  ;;  %v1989_v32 = vmul.f32 0.5, %v1856_v25 }
 0x4ba   :  { %v1858_v47 = vadd.f32 %v1857_v21, %v4708_v2  ;;  %v1859_v15 = vpop.f32.mrf.mxu0 }
 0x4bb   :  { %v3185_v10 = vpop.eup %3184  ;;  %2236 = vst [vmem:[#allocation2 + $0x40] sm:$0xff] %v2172_v31  ;;  %v2173_v4 = vadd.f32 0.5, %v2109_v9  ;;  %3198 = vtanh.f32 %v1989_v32  ;;  %v1860_v30 = vadd.f32 %v1859_v15, %v4710_v59 }
 0x4bc   :  { %v3187_v45 = vpop.eup %3186  ;;  %v2110_v48 = vmul.f32 0.5, %v3185_v10  ;;  %v1990_v63 = vmul.f32 0.5, %v1858_v47  ;;  %v1863_v17 = vpop.f32.mrf.mxu0 }
 0x4bd   :  { %2237 = vst [vmem:[#allocation2 + $0x48] sm:$0xff] %v2173_v4  ;;  %v2111_v40 = vmul.f32 0.5, %v3187_v45  ;;  %v1991_v5 = vmul.f32 0.5, %v1860_v30  ;;  %v1864_v55 = vadd.f32 %v1863_v17, %v4708_v2 }
 0x4be   :  { %v3189_v39 = vpop.eup %3188  ;;  %v2174_v3 = vadd.f32 0.5, %v2110_v48  ;;  %3200 = vtanh.f32 %v1990_v63  ;;  %v1865_v1 = vpop.f32.mrf.mxu0 }
 0x4bf   :  { %v2175_v38 = vadd.f32 0.5, %v2111_v40  ;;  %v2112_v11 = vmul.f32 0.5, %v3189_v39  ;;  %3202 = vtanh.f32 %v1991_v5  ;;  %v1992_v19 = vmul.f32 0.5, %v1864_v55 }
 0x4c0   :  { %2238 = vst [vmem:[#allocation2 + $0x50] sm:$0xff] %v2174_v3  ;;  %v1866_v54 = vadd.f32 %v1865_v1, %v4710_v59  ;;  %v1867_v13 = vpop.f32.mrf.mxu0 }
 0x4c1   :  { %v3191_v23 = vpop.eup %3190  ;;  %2239 = vst [vmem:[#allocation2 + $0x58] sm:$0xff] %v2175_v38  ;;  %v2176_v6 = vadd.f32 0.5, %v2112_v11  ;;  %3204 = vtanh.f32 %v1992_v19  ;;  %v1868_v27 = vadd.f32 %v1867_v13, %v4708_v2 }
 0x4c2   :  { %v3193_v35 = vpop.eup %3192  ;;  %v2113_v60 = vmul.f32 0.5, %v3191_v23  ;;  %v1993_v36 = vmul.f32 0.5, %v1866_v54  ;;  %v1869_v34 = vpop.f32.mrf.mxu0 }
 0x4c3   :  { %2240 = vst [vmem:[#allocation2 + $0x60] sm:$0xff] %v2176_v6  ;;  %v2114_v28 = vmul.f32 0.5, %v3193_v35  ;;  %v1994_v7 = vmul.f32 0.5, %v1868_v27  ;;  %v1870_v41 = vadd.f32 %v1869_v34, %v4710_v59 }
 0x4c4   :  { %v3195_v56 = vpop.eup %3194  ;;  %v2177_v8 = vadd.f32 0.5, %v2113_v60  ;;  %3206 = vtanh.f32 %v1993_v36  ;;  %v1873_v51 = vpop.f32.mrf.mxu0 }
 0x4c5   :  { %v2178_v52 = vadd.f32 0.5, %v2114_v28  ;;  %v2115_v50 = vmul.f32 0.5, %v3195_v56  ;;  %3208 = vtanh.f32 %v1994_v7  ;;  %v1995_v12 = vmul.f32 0.5, %v1870_v41 }
 0x4c6   :  { %v3197_v22 = vpop.eup %3196  ;;  %2241 = vst [vmem:[#allocation2 + $0x68] sm:$0xff] %v2177_v8  ;;  %v1874_v46 = vadd.f32 %v1873_v51, %v4708_v2  ;;  %v1875_v26 = vpop.f32.mrf.mxu0 }
 0x4c7   :  { %2242 = vst [vmem:[#allocation2 + $0x70] sm:$0xff] %v2178_v52  ;;  %v2179_v53 = vadd.f32 0.5, %v2115_v50  ;;  %v2116_v44 = vmul.f32 0.5, %v3197_v22  ;;  %3210 = vtanh.f32 %v1995_v12  ;;  %v1876_v57 = vadd.f32 %v1875_v26, %v4710_v59 }
 0x4c8   :  { %v3199_v24 = vpop.eup %3198  ;;  %v1996_v0 = vmul.f32 0.5, %v1874_v46  ;;  %v1877_v14 = vpop.f32.mrf.mxu0 }
 0x4c9   :  { %2243 = vst [vmem:[#allocation2 + $0x78] sm:$0xff] %v2179_v53  ;;  %v2180_v37 = vadd.f32 0.5, %v2116_v44  ;;  %v2117_v49 = vmul.f32 0.5, %v3199_v24  ;;  %v1997_v61 = vmul.f32 0.5, %v1876_v57  ;;  %v1878_v20 = vadd.f32 %v1877_v14, %v4708_v2 }
 0x4ca   :  { %3212 = vtanh.f32 %v1996_v0  ;;  %v1879_v43 = vpop.f32.mrf.mxu0 }
 0x4cb   :  { %v3201_v33 = vpop.eup %3200  ;;  %2244 = vst [vmem:[#allocation2 + $0x80] sm:$0xff] %v2180_v37  ;;  %v2181_v42 = vadd.f32 0.5, %v2117_v49  ;;  %3214 = vtanh.f32 %v1997_v61  ;;  %v1998_v58 = vmul.f32 0.5, %v1878_v20  ;;  %v1880_v16 = vadd.f32 %v1879_v43, %v4710_v59 }
 0x4cc   :  { %v3203_v18 = vpop.eup %3202  ;;  %v2118_v29 = vmul.f32 0.5, %v3201_v33  ;;  %v1883_v25 = vpop.f32.mrf.mxu0 }
 0x4cd   :  { %2245 = vst [vmem:[#allocation2 + $0x88] sm:$0xff] %v2181_v42  ;;  %v2119_v62 = vmul.f32 0.5, %v3203_v18  ;;  %3216 = vtanh.f32 %v1998_v58  ;;  %v1999_v21 = vmul.f32 0.5, %v1880_v16  ;;  %v1884_v31 = vadd.f32 %v1883_v25, %v4708_v2 }
 0x4ce   :  { %v3205_v9 = vpop.eup %3204  ;;  %v2182_v32 = vadd.f32 0.5, %v2118_v29  ;;  %v1885_v47 = vpop.f32.mrf.mxu0 }
 0x4cf   :  { %v2183_v15 = vadd.f32 0.5, %v2119_v62  ;;  %v2120_v10 = vmul.f32 0.5, %v3205_v9  ;;  %3218 = vtanh.f32 %v1999_v21  ;;  %v2000_v4 = vmul.f32 0.5, %v1884_v31 }
 0x4d0   :  { %2246 = vst [vmem:[#allocation2 + $0x90] sm:$0xff] %v2182_v32  ;;  %v1886_v30 = vadd.f32 %v1885_v47, %v4710_v59  ;;  %v1887_v45 = vpop.f32.mrf.mxu0 }
 0x4d1   :  { %v3207_v48 = vpop.eup %3206  ;;  %2247 = vst [vmem:[#allocation2 + $0x98] sm:$0xff] %v2183_v15  ;;  %v2184_v63 = vadd.f32 0.5, %v2120_v10  ;;  %3220 = vtanh.f32 %v2000_v4  ;;  %v1888_v17 = vadd.f32 %v1887_v45, %v4708_v2 }
 0x4d2   :  { %v3209_v40 = vpop.eup %3208  ;;  %v2121_v5 = vmul.f32 0.5, %v3207_v48  ;;  %v2001_v55 = vmul.f32 0.5, %v1886_v30  ;;  %v1889_v39 = vpop.f32.mrf.mxu0 }
 0x4d3   :  { %2248 = vst [vmem:[#allocation2 + $0xa0] sm:$0xff] %v2184_v63  ;;  %v2122_v3 = vmul.f32 0.5, %v3209_v40  ;;  %v2002_v1 = vmul.f32 0.5, %v1888_v17  ;;  %v1890_v38 = vadd.f32 %v1889_v39, %v4710_v59 }
 0x4d4   :  { %v3211_v11 = vpop.eup %3210  ;;  %v2185_v19 = vadd.f32 0.5, %v2121_v5  ;;  %3222 = vtanh.f32 %v2001_v55  ;;  %v1893_v54 = vpop.f32.mrf.mxu0 }
 0x4d5   :  { %v2186_v13 = vadd.f32 0.5, %v2122_v3  ;;  %v2123_v23 = vmul.f32 0.5, %v3211_v11  ;;  %3224 = vtanh.f32 %v2002_v1  ;;  %v2003_v6 = vmul.f32 0.5, %v1890_v38 }
 0x4d6   :  { %2249 = vst [vmem:[#allocation2 + $0xa8] sm:$0xff] %v2185_v19  ;;  %v1894_v27 = vadd.f32 %v1893_v54, %v4708_v2  ;;  %v1895_v35 = vpop.f32.mrf.mxu0 }
 0x4d7   :  { %v3213_v60 = vpop.eup %3212  ;;  %2250 = vst [vmem:[#allocation2 + $0xb0] sm:$0xff] %v2186_v13  ;;  %v2187_v36 = vadd.f32 0.5, %v2123_v23  ;;  %3226 = vtanh.f32 %v2003_v6  ;;  %v1896_v34 = vadd.f32 %v1895_v35, %v4710_v59 }
 0x4d8   :  { %v3215_v28 = vpop.eup %3214  ;;  %v2124_v7 = vmul.f32 0.5, %v3213_v60  ;;  %v2004_v41 = vmul.f32 0.5, %v1894_v27  ;;  %v1897_v56 = vpop.f32.mrf.mxu0 }
 0x4d9   :  { %2251 = vst [vmem:[#allocation2 + $0xb8] sm:$0xff] %v2187_v36  ;;  %v2125_v8 = vmul.f32 0.5, %v3215_v28  ;;  %v2005_v51 = vmul.f32 0.5, %v1896_v34  ;;  %v1898_v52 = vadd.f32 %v1897_v56, %v4708_v2 }
 0x4da   :  { %v3217_v50 = vpop.eup %3216  ;;  %v2188_v12 = vadd.f32 0.5, %v2124_v7  ;;  %3228 = vtanh.f32 %v2004_v41  ;;  %v1899_v22 = vpop.f32.mrf.mxu0 }
 0x4db   :  { %v2189_v46 = vadd.f32 0.5, %v2125_v8  ;;  %v2126_v26 = vmul.f32 0.5, %v3217_v50  ;;  %3230 = vtanh.f32 %v2005_v51  ;;  %v2006_v53 = vmul.f32 0.5, %v1898_v52 }
 0x4dc   :  { %v3219_v44 = vpop.eup %3218  ;;  %2252 = vst [vmem:[#allocation2 + $0xc0] sm:$0xff] %v2188_v12  ;;  %v1900_v57 = vadd.f32 %v1899_v22, %v4710_v59  ;;  %v1903_v24 = vpop.f32.mrf.mxu0 }
 0x4dd   :  { %2253 = vst [vmem:[#allocation2 + $0xc8] sm:$0xff] %v2189_v46  ;;  %v2190_v0 = vadd.f32 0.5, %v2126_v26  ;;  %v2127_v14 = vmul.f32 0.5, %v3219_v44  ;;  %3232 = vtanh.f32 %v2006_v53  ;;  %v1904_v37 = vadd.f32 %v1903_v24, %v4708_v2 }
 0x4de   :  { %v3221_v49 = vpop.eup %3220  ;;  %v2007_v61 = vmul.f32 0.5, %v1900_v57  ;;  %v1905_v20 = vpop.f32.mrf.mxu0 }
 0x4df   :  { %2254 = vst [vmem:[#allocation2 + $0xd0] sm:$0xff] %v2190_v0  ;;  %v2191_v43 = vadd.f32 0.5, %v2127_v14  ;;  %v2128_v33 = vmul.f32 0.5, %v3221_v49  ;;  %v2008_v42 = vmul.f32 0.5, %v1904_v37  ;;  %v1906_v58 = vadd.f32 %v1905_v20, %v4710_v59 }
 0x4e0   :  { %3234 = vtanh.f32 %v2007_v61  ;;  %v1907_v16 = vpop.f32.mrf.mxu0 }
 0x4e1   :  { %v3223_v18 = vpop.eup %3222  ;;  %2255 = vst [vmem:[#allocation2 + $0xd8] sm:$0xff] %v2191_v43  ;;  %v2192_v29 = vadd.f32 0.5, %v2128_v33  ;;  %3236 = vtanh.f32 %v2008_v42  ;;  %v2009_v25 = vmul.f32 0.5, %v1906_v58  ;;  %v1908_v62 = vadd.f32 %v1907_v16, %v4708_v2 }
 0x4e2   :  { %v3225_v21 = vpop.eup %3224  ;;  %v2129_v31 = vmul.f32 0.5, %v3223_v18  ;;  %v1909_v9 = vpop.f32.mrf.mxu0 }
 0x4e3   :  { %2256 = vst [vmem:[#allocation2 + $0xe0] sm:$0xff] %v2192_v29  ;;  %v2130_v32 = vmul.f32 0.5, %v3225_v21  ;;  %3238 = vtanh.f32 %v2009_v25  ;;  %v2010_v47 = vmul.f32 0.5, %v1908_v62  ;;  %v1910_v15 = vadd.f32 %v1909_v9, %v4710_v59 }
 0x4e4   :  { %v3227_v10 = vpop.eup %3226  ;;  %v2193_v4 = vadd.f32 0.5, %v2129_v31  ;;  %v1913_v30 = vpop.f32.mrf.mxu0 }
 0x4e5   :  { %v2194_v45 = vadd.f32 0.5, %v2130_v32  ;;  %v2131_v48 = vmul.f32 0.5, %v3227_v10  ;;  %3240 = vtanh.f32 %v2010_v47  ;;  %v2011_v63 = vmul.f32 0.5, %v1910_v15 }
 0x4e6   :  { %2257 = vst [vmem:[#allocation2 + $0xe8] sm:$0xff] %v2193_v4  ;;  %v1914_v17 = vadd.f32 %v1913_v30, %v4708_v2  ;;  %v1915_v40 = vpop.f32.mrf.mxu0 }
 0x4e7   :  { %v3229_v5 = vpop.eup %3228  ;;  %2258 = vst [vmem:[#allocation2 + $0xf0] sm:$0xff] %v2194_v45  ;;  %v2195_v55 = vadd.f32 0.5, %v2131_v48  ;;  %3242 = vtanh.f32 %v2011_v63  ;;  %v1916_v39 = vadd.f32 %v1915_v40, %v4710_v59 }
 0x4e8   :  { %v3231_v3 = vpop.eup %3230  ;;  %v2132_v1 = vmul.f32 0.5, %v3229_v5  ;;  %v2012_v38 = vmul.f32 0.5, %v1914_v17  ;;  %v1917_v11 = vpop.f32.mrf.mxu0 }
 0x4e9   :  { %2259 = vst [vmem:[#allocation2 + $0xf8] sm:$0xff] %v2195_v55  ;;  %v2133_v19 = vmul.f32 0.5, %v3231_v3  ;;  %v2013_v54 = vmul.f32 0.5, %v1916_v39  ;;  %v1918_v13 = vadd.f32 %v1917_v11, %v4708_v2 }
 0x4ea   :  { %v3233_v23 = vpop.eup %3232  ;;  %v2196_v6 = vadd.f32 0.5, %v2132_v1  ;;  %3244 = vtanh.f32 %v2012_v38  ;;  %v1919_v27 = vpop.f32.mrf.mxu0 }
 0x4eb   :  { %v2197_v35 = vadd.f32 0.5, %v2133_v19  ;;  %v2134_v60 = vmul.f32 0.5, %v3233_v23  ;;  %3246 = vtanh.f32 %v2013_v54  ;;  %v2014_v36 = vmul.f32 0.5, %v1918_v13 }
 0x4ec   :  { %2260 = vst [vmem:[#allocation2 + $0x100] sm:$0xff] %v2196_v6  ;;  %v1920_v34 = vadd.f32 %v1919_v27, %v4710_v59  ;;  %v1923_v28 = vpop.f32.mrf.mxu0 }
 0x4ed   :  { %v3235_v7 = vpop.eup %3234  ;;  %2261 = vst [vmem:[#allocation2 + $0x108] sm:$0xff] %v2197_v35  ;;  %v2198_v41 = vadd.f32 0.5, %v2134_v60  ;;  %3248 = vtanh.f32 %v2014_v36  ;;  %v1924_v56 = vadd.f32 %v1923_v28, %v4708_v2 }
 0x4ee   :  { %v3237_v8 = vpop.eup %3236  ;;  %v2135_v51 = vmul.f32 0.5, %v3235_v7  ;;  %v2015_v52 = vmul.f32 0.5, %v1920_v34  ;;  %v1925_v50 = vpop.f32.mrf.mxu0 }
 0x4ef   :  { %2262 = vst [vmem:[#allocation2 + $0x110] sm:$0xff] %v2198_v41  ;;  %v2136_v12 = vmul.f32 0.5, %v3237_v8  ;;  %v2016_v22 = vmul.f32 0.5, %v1924_v56  ;;  %v1926_v46 = vadd.f32 %v1925_v50, %v4710_v59 }
 0x4f0   :  { %v3239_v26 = vpop.eup %3238  ;;  %v2199_v53 = vadd.f32 0.5, %v2135_v51  ;;  %3250 = vtanh.f32 %v2015_v52  ;;  %v1927_v44 = vpop.f32.mrf.mxu0 }
 0x4f1   :  { %v2200_v57 = vadd.f32 0.5, %v2136_v12  ;;  %v2137_v24 = vmul.f32 0.5, %v3239_v26  ;;  %3252 = vtanh.f32 %v2016_v22  ;;  %v2017_v0 = vmul.f32 0.5, %v1926_v46 }
 0x4f2   :  { %v3241_v14 = vpop.eup %3240  ;;  %2263 = vst [vmem:[#allocation2 + $0x118] sm:$0xff] %v2199_v53  ;;  %v1928_v37 = vadd.f32 %v1927_v44, %v4708_v2  ;;  %v1929_v49 = vpop.f32.mrf.mxu0 }
 0x4f3   :  { %2264 = vst [vmem:[#allocation2 + $0x120] sm:$0xff] %v2200_v57  ;;  %v2201_v61 = vadd.f32 0.5, %v2137_v24  ;;  %v2138_v20 = vmul.f32 0.5, %v3241_v14  ;;  %3254 = vtanh.f32 %v2017_v0  ;;  %v1930_v43 = vadd.f32 %v1929_v49, %v4710_v59 }
 0x4f4   :  { %v3243_v33 = vpop.eup %3242  ;;  %v2018_v42 = vmul.f32 0.5, %v1928_v37 }
 0x4f5   :  { %2265 = vst [vmem:[#allocation2 + $0x128] sm:$0xff] %v2201_v61  ;;  %v2202_v58 = vadd.f32 0.5, %v2138_v20  ;;  %v2139_v16 = vmul.f32 0.5, %v3243_v33  ;;  %v2019_v18 = vmul.f32 0.5, %v1930_v43 }
 0x4f6   :  { %3256 = vtanh.f32 %v2018_v42 }
 0x4f7   :  { %v3245_v29 = vpop.eup %3244  ;;  %2266 = vst [vmem:[#allocation2 + $0x130] sm:$0xff] %v2202_v58  ;;  %v2203_v25 = vadd.f32 0.5, %v2139_v16  ;;  %3258 = vtanh.f32 %v2019_v18 }
 0x4f8   :  { %v3247_v62 = vpop.eup %3246  ;;  %v2140_v21 = vmul.f32 0.5, %v3245_v29 }
 0x4f9   :  { %2267 = vst [vmem:[#allocation2 + $0x138] sm:$0xff] %v2203_v25  ;;  %v2141_v31 = vmul.f32 0.5, %v3247_v62 }
 0x4fa   :  { %v3249_v9 = vpop.eup %3248  ;;  %v2204_v32 = vadd.f32 0.5, %v2140_v21 }
 0x4fb   :  { %v2205_v47 = vadd.f32 0.5, %v2141_v31  ;;  %v2142_v15 = vmul.f32 0.5, %v3249_v9 }
 0x4fc   :  { %2268 = vst [vmem:[#allocation2 + $0x140] sm:$0xff] %v2204_v32 }
 0x4fd   :  { %v3251_v10 = vpop.eup %3250  ;;  %2269 = vst [vmem:[#allocation2 + $0x148] sm:$0xff] %v2205_v47  ;;  %v2206_v4 = vadd.f32 0.5, %v2142_v15 }
 0x4fe   :  { %v3253_v30 = vpop.eup %3252  ;;  %v2143_v45 = vmul.f32 0.5, %v3251_v10 }
 0x4ff   :  { %2270 = vst [vmem:[#allocation2 + $0x150] sm:$0xff] %v2206_v4  ;;  %v2144_v48 = vmul.f32 0.5, %v3253_v30 }
 0x500   :  { %v3255_v63 = vpop.eup %3254  ;;  %v2207_v17 = vadd.f32 0.5, %v2143_v45 }
 0x501   :  { %v2208_v40 = vadd.f32 0.5, %v2144_v48  ;;  %v2145_v5 = vmul.f32 0.5, %v3255_v63 }
 0x502   :  { %2271 = vst [vmem:[#allocation2 + $0x158] sm:$0xff] %v2207_v17 }
 0x503   :  { %v3257_v55 = vpop.eup %3256  ;;  %2272 = vst [vmem:[#allocation2 + $0x160] sm:$0xff] %v2208_v40  ;;  %v2209_v39 = vadd.f32 0.5, %v2145_v5 }
 0x504   :  { %v3259_v3 = vpop.eup %3258  ;;  %v2146_v1 = vmul.f32 0.5, %v3257_v55 }
 0x505   :  { %2273 = vst [vmem:[#allocation2 + $0x168] sm:$0xff] %v2209_v39  ;;  %v2147_v38 = vmul.f32 0.5, %v3259_v3 }
 0x506   :  { %v2210_v11 = vadd.f32 0.5, %v2146_v1 }
 0x507   :  { %v2211_v19 = vadd.f32 0.5, %v2147_v38 }
 0x508   :  { %2274 = vst [vmem:[#allocation2 + $0x170] sm:$0xff] %v2210_v11 }
 0x509   :  { %2275 = vst [vmem:[#allocation2 + $0x178] sm:$0xff] %v2211_v19 }
 0x532   :  { %v1933_v54 = vpop.f32.mrf.mxu0 }
 0x533   :  { %v1934_v13 = vadd.f32 %v1933_v54, %v4708_v2 }
 0x534   :  { %v1935_v23 = vpop.f32.mrf.mxu0 }
 0x535   :  { %v2020_v6 = vmul.f32 0.5, %v1934_v13  ;;  %v1936_v27 = vadd.f32 %v1935_v23, %v4710_v59 }
 0x536   :  { %v1937_v35 = vpop.f32.mrf.mxu0 }
 0x537   :  { %3260 = vtanh.f32 %v2020_v6  ;;  %v2021_v60 = vmul.f32 0.5, %v1936_v27  ;;  %v1938_v36 = vadd.f32 %v1937_v35, %v4708_v2 }
 0x538   :  { %v1939_v34 = vpop.f32.mrf.mxu0 }
 0x539   :  { %3262 = vtanh.f32 %v2021_v60  ;;  %v2022_v28 = vmul.f32 0.5, %v1938_v36  ;;  %v1940_v7 = vadd.f32 %v1939_v34, %v4710_v59 }
 0x53a   :  { %v1943_v41 = vpop.f32.mrf.mxu0 }
 0x53b   :  { %3264 = vtanh.f32 %v2022_v28  ;;  %v2023_v56 = vmul.f32 0.5, %v1940_v7  ;;  %v1944_v8 = vadd.f32 %v1943_v41, %v4708_v2 }
 0x53c   :  { %v1945_v51 = vpop.f32.mrf.mxu0 }
 0x53d   :  { %3266 = vtanh.f32 %v2023_v56  ;;  %v2024_v52 = vmul.f32 0.5, %v1944_v8  ;;  %v1946_v50 = vadd.f32 %v1945_v51, %v4710_v59 }
 0x53e   :  { %v1947_v12 = vpop.f32.mrf.mxu0 }
 0x53f   :  { %3268 = vtanh.f32 %v2024_v52  ;;  %v2025_v22 = vmul.f32 0.5, %v1946_v50  ;;  %v1948_v46 = vadd.f32 %v1947_v12, %v4708_v2 }
 0x540   :  { %v1949_v26 = vpop.f32.mrf.mxu0 }
 0x541   :  { %3270 = vtanh.f32 %v2025_v22  ;;  %v2026_v53 = vmul.f32 0.5, %v1948_v46  ;;  %v1950_v44 = vadd.f32 %v1949_v26, %v4710_v59 }
 0x543   :  { %3272 = vtanh.f32 %v2026_v53  ;;  %v2027_v57 = vmul.f32 0.5, %v1950_v44 }
 0x544   :  { %v3261_v24 = vpop.eup %3260 }
 0x545   :  { %v2148_v0 = vmul.f32 0.5, %v3261_v24  ;;  %3274 = vtanh.f32 %v2027_v57 }
 0x546   :  { %v3263_v14 = vpop.eup %3262 }
 0x547   :  { %v2212_v37 = vadd.f32 0.5, %v2148_v0  ;;  %v2149_v49 = vmul.f32 0.5, %v3263_v14 }
 0x548   :  { %v3265_v61 = vpop.eup %3264  ;;  %v1953_v20 = vpop.f32.mrf.mxu0 }
 0x549   :  { %2276 = vst [vmem:[#allocation2 + $0x180] sm:$0xff] %v2212_v37  ;;  %v2213_v43 = vadd.f32 0.5, %v2149_v49  ;;  %v2150_v33 = vmul.f32 0.5, %v3265_v61  ;;  %v1954_v42 = vadd.f32 %v1953_v20, %v4708_v2 }
 0x54a   :  { %v3267_v58 = vpop.eup %3266  ;;  %v1955_v16 = vpop.f32.mrf.mxu0 }
 0x54b   :  { %2277 = vst [vmem:[#allocation2 + $0x188] sm:$0xff] %v2213_v43  ;;  %v2214_v18 = vadd.f32 0.5, %v2150_v33  ;;  %v2151_v29 = vmul.f32 0.5, %v3267_v58  ;;  %v2028_v25 = vmul.f32 0.5, %v1954_v42  ;;  %v1956_v62 = vadd.f32 %v1955_v16, %v4710_v59 }
 0x54c   :  { %v3269_v21 = vpop.eup %3268  ;;  %v1957_v31 = vpop.f32.mrf.mxu0 }
 0x54d   :  { %2278 = vst [vmem:[#allocation2 + $0x190] sm:$0xff] %v2214_v18  ;;  %v2215_v9 = vadd.f32 0.5, %v2151_v29  ;;  %v2152_v32 = vmul.f32 0.5, %v3269_v21  ;;  %3276 = vtanh.f32 %v2028_v25  ;;  %v2029_v47 = vmul.f32 0.5, %v1956_v62 }
 0x54e   :  { %v3271_v15 = vpop.eup %3270  ;;  %v1958_v10 = vadd.f32 %v1957_v31, %v4708_v2  ;;  %v1959_v4 = vpop.f32.mrf.mxu0 }
 0x54f   :  { %2279 = vst [vmem:[#allocation2 + $0x198] sm:$0xff] %v2215_v9  ;;  %v2216_v30 = vadd.f32 0.5, %v2152_v32  ;;  %v2153_v45 = vmul.f32 0.5, %v3271_v15  ;;  %3278 = vtanh.f32 %v2029_v47  ;;  %v1960_v48 = vadd.f32 %v1959_v4, %v4710_v59 }
 0x550   :  { %v3273_v63 = vpop.eup %3272  ;;  %v2030_v17 = vmul.f32 0.5, %v1958_v10  ;;  %v1963_v40 = vpop.f32.mrf.mxu0 }
 0x551   :  { %2280 = vst [vmem:[#allocation2 + $0x1a0] sm:$0xff] %v2216_v30  ;;  %v2217_v5 = vadd.f32 0.5, %v2153_v45  ;;  %v2154_v55 = vmul.f32 0.5, %v3273_v63  ;;  %v2031_v39 = vmul.f32 0.5, %v1960_v48  ;;  %v1964_v3 = vadd.f32 %v1963_v40, %v4708_v2 }
 0x552   :  { %v3275_v1 = vpop.eup %3274  ;;  %3280 = vtanh.f32 %v2030_v17  ;;  %v1965_v38 = vpop.f32.mrf.mxu0 }
 0x553   :  { %2281 = vst [vmem:[#allocation2 + $0x1a8] sm:$0xff] %v2217_v5  ;;  %v2218_v11 = vadd.f32 0.5, %v2154_v55  ;;  %v2155_v19 = vmul.f32 0.5, %v3275_v1  ;;  %3282 = vtanh.f32 %v2031_v39  ;;  %v2032_v54 = vmul.f32 0.5, %v1964_v3 }
 0x554   :  { %v1966_v13 = vadd.f32 %v1965_v38, %v4710_v59  ;;  %v1967_v23 = vpop.f32.mrf.mxu0 }
 0x555   :  { %2282 = vst [vmem:[#allocation2 + $0x1b0] sm:$0xff] %v2218_v11  ;;  %v2219_v6 = vadd.f32 0.5, %v2155_v19  ;;  %3284 = vtanh.f32 %v2032_v54  ;;  %v1968_v27 = vadd.f32 %v1967_v23, %v4708_v2 }
 0x556   :  { %v2033_v35 = vmul.f32 0.5, %v1966_v13  ;;  %v1969_v60 = vpop.f32.mrf.mxu0 }
 0x557   :  { %2283 = vst [vmem:[#allocation2 + $0x1b8] sm:$0xff] %v2219_v6  ;;  %v2034_v36 = vmul.f32 0.5, %v1968_v27  ;;  %v1970_v34 = vadd.f32 %v1969_v60, %v4710_v59 }
 0x558   :  { %3286 = vtanh.f32 %v2033_v35 }
 0x559   :  { %3288 = vtanh.f32 %v2034_v36  ;;  %v2035_v28 = vmul.f32 0.5, %v1970_v34 }
 0x55a   :  { %v3277_v7 = vpop.eup %3276 }
 0x55b   :  { %v2156_v41 = vmul.f32 0.5, %v3277_v7  ;;  %3290 = vtanh.f32 %v2035_v28 }
 0x55c   :  { %v3279_v56 = vpop.eup %3278 }
 0x55d   :  { %v2220_v8 = vadd.f32 0.5, %v2156_v41  ;;  %v2157_v51 = vmul.f32 0.5, %v3279_v56 }
 0x55f   :  { %v3281_v52 = vpop.eup %3280  ;;  %2284 = vst [vmem:[#allocation2 + $0x1c0] sm:$0xff] %v2220_v8  ;;  %v2221_v50 = vadd.f32 0.5, %v2157_v51 }
 0x560   :  { %v3283_v12 = vpop.eup %3282  ;;  %v2158_v2 = vmul.f32 0.5, %v3281_v52 }
 0x561   :  { %2285 = vst [vmem:[#allocation2 + $0x1c8] sm:$0xff] %v2221_v50  ;;  %v2159_v22 = vmul.f32 0.5, %v3283_v12 }
 0x562   :  { %v3285_v46 = vpop.eup %3284  ;;  %v2222_v26 = vadd.f32 0.5, %v2158_v2 }
 0x563   :  { %v2223_v53 = vadd.f32 0.5, %v2159_v22  ;;  %v2160_v59 = vmul.f32 0.5, %v3285_v46 }
 0x564   :  { %2286 = vst [vmem:[#allocation2 + $0x1d0] sm:$0xff] %v2222_v26 }
 0x565   :  { %v3287_v44 = vpop.eup %3286  ;;  %2287 = vst [vmem:[#allocation2 + $0x1d8] sm:$0xff] %v2223_v53  ;;  %v2224_v57 = vadd.f32 0.5, %v2160_v59 }
 0x566   :  { %v3289_v24 = vpop.eup %3288  ;;  %v2161_v0 = vmul.f32 0.5, %v3287_v44 }
 0x567   :  { %2288 = vst [vmem:[#allocation2 + $0x1e0] sm:$0xff] %v2224_v57  ;;  %v2162_v14 = vmul.f32 0.5, %v3289_v24 }
 0x568   :  { %v3291_v37 = vpop.eup %3290  ;;  %v2225_v49 = vadd.f32 0.5, %v2161_v0 }
 0x569   :  { %v2226_v61 = vadd.f32 0.5, %v2162_v14  ;;  %v2163_v20 = vmul.f32 0.5, %v3291_v37 }
 0x56a   :  { %2289 = vst [vmem:[#allocation2 + $0x1e8] sm:$0xff] %v2225_v49 }
 0x56b   :  { %2290 = vst [vmem:[#allocation2 + $0x1f0] sm:$0xff] %v2226_v61  ;;  %v2227_v43 = vadd.f32 0.5, %v2163_v20 }
 0x56d   :  { %2291 = vst [vmem:[#allocation2 + $0x1f8] sm:$0xff] %v2227_v43 }
 0x56e   :  { %3303 = shalt.err (!%p3300_p4)
}
 0x56f   :  { %s3317_s10 = smov 256   ;;  %s3318_s11 = smov 16  }
 0x570   :  { %2531 = dma.vmem_to_hbm [thread:$0]  %s2526_s2, 8192, %s4787_s8, [#allocation3], %s3317_s10, %s3317_s10, %s3318_s11  }
 0x571   :  { %3312 = dma.done.wait [#allocation3], 8192  }
 0x572   :  { %3313 = vsyncadd [#allocation3], 4294959104 }
 0x573   :  { %2537 = vsyncpa [#allocation3], 1 }

</bundles_post_ra>
